<compile_context>
chip_gen: v6e
topology: v6e:2x2x1
jax: 0.10.0
libtpu: 0.0.40
codegen_flags: <defaults>
</compile_context>

<pallas_src>
import jax
import jax.numpy as jnp
from jax.experimental import pallas as pl
from jax.experimental.pallas import tpu as pltpu

EPS = 1e-5


def basic_block_kernel(x_ref, w1_ref, b1_ref, w2_ref, b2_ref, out_ref, col_ref):
    """conv1+bn1+relu -> conv2+bn2 -> +identity -> relu, per grid step."""
    nb, H, W, Cp = x_ref.shape
    cdt = col_ref.dtype

    # Hoisted zero blocks (halo material).  Only the 2 halo ROWS of the col
    # scratch are zeroed per step; the interior rows are fully rewritten below.
    zcol = jnp.zeros((H, 1, Cp), cdt)
    zrow = jnp.zeros((W, 3 * Cp), cdt)
    col_ref[0, :, :] = zrow
    col_ref[H + 1, :, :] = zrow

    def fill_col(v):
        # Column im2col: pack the dx neighborhood into the lane axis.
        # col[yp, x, dx*Cp:(dx+1)*Cp] == padded_input[yp, x+dx, :]
        col_ref[1:H + 1, :, 0:Cp] = jnp.concatenate([zcol, v[:, :W - 1, :]], axis=1)
        col_ref[1:H + 1, :, Cp:2 * Cp] = v
        col_ref[1:H + 1, :, 2 * Cp:3 * Cp] = jnp.concatenate([v[:, 1:, :], zcol], axis=1)

    def conv3x3(w_ref):
        # 3 MXU matmuls with K = 3*Cp; dy handled as free major-axis offsets;
        # f32 accumulation in registers (no scratch RMW).
        acc = jax.lax.dot_general(
            col_ref[0:H, :, :], w_ref[0],
            dimension_numbers=(((2,), (0,)), ((), ())),
            preferred_element_type=jnp.float32)
        for dy in (1, 2):
            acc = acc + jax.lax.dot_general(
                col_ref[dy:dy + H, :, :], w_ref[dy],
                dimension_numbers=(((2,), (0,)), ((), ())),
                preferred_element_type=jnp.float32)
        return acc                                       # (H, W, Cp) float32

    for b in range(nb):                                  # static unroll over images/step
        # conv1 (BN1 scale pre-folded into w1) + bias1 + ReLU; Dropout(p=0)==Identity.
        fill_col(x_ref[b].astype(cdt))
        mid = jnp.maximum(conv3x3(w1_ref) + b1_ref[...], 0.0)
        # conv2 (BN2 scale pre-folded into w2) + bias2 + identity residual + ReLU.
        fill_col(mid.astype(cdt))
        y = conv3x3(w2_ref) + b2_ref[...] + x_ref[b]     # f32 epilogue, exact residual
        out_ref[b] = jnp.maximum(y, 0.0).astype(out_ref.dtype)


def _fold_bn_into_conv(w, gamma, beta, mean, var):
    """bn(conv(x, w)) == conv(x, w * s) + (beta - mean * s), s = gamma/sqrt(var+eps)."""
    s = gamma / jnp.sqrt(var + EPS)
    return w * s, beta - mean * s


def _round_up(v, m):
    return (v + m - 1) // m * m


def basic_block_forward(x_nhwc, params, *, compute_dtype=jnp.bfloat16,
                        images_per_step=1):
    """Fused BasicBlock forward. x_nhwc: (N, H, W, C) float32, NHWC layout."""
    N, H, W, Cin = x_nhwc.shape
    w1, g1, b1, m1, v1, w2, g2, b2, m2, v2 = params
    Cout = w1.shape[-1]
    assert Cin == Cout, "identity residual path requires in_channels == out_channels"
    assert N % images_per_step == 0
    nb = images_per_step

    Cp = _round_up(Cout, 128)                # lane-dense channels (zero-padded, exact)
    w1f, bias1 = _fold_bn_into_conv(w1, g1, b1, m1, v1)
    w2f, bias2 = _fold_bn_into_conv(w2, g2, b2, m2, v2)

    def prep_w(w):                           # (3,3,Cin,Cout) -> (3, 3*Cp, Cp), tap rows concat'd
        w = jnp.pad(w, ((0, 0), (0, 0), (0, Cp - w.shape[2]), (0, Cp - w.shape[3])))
        return w.reshape(3, 3 * Cp, Cp).astype(compute_dtype)

    w1f = prep_w(w1f)
    w2f = prep_w(w2f)
    bias1 = jnp.pad(bias1, (0, Cp - Cout)).reshape(1, 1, Cp).astype(jnp.float32)
    bias2 = jnp.pad(bias2, (0, Cp - Cout)).reshape(1, 1, Cp).astype(jnp.float32)
    xp = jnp.pad(x_nhwc, ((0, 0), (0, 0), (0, 0), (0, Cp - Cin)))   # channel pad (glue)

    grid_spec = pltpu.PrefetchScalarGridSpec(
        num_scalar_prefetch=0,
        grid=(N // nb,),                     # images_per_step images per grid step
        in_specs=[
            pl.BlockSpec((nb, H, W, Cp), lambda n: (n, 0, 0, 0)),
            pl.BlockSpec((3, 3 * Cp, Cp), lambda n: (0, 0, 0)),   # DMA'd once
            pl.BlockSpec((1, 1, Cp), lambda n: (0, 0, 0)),
            pl.BlockSpec((3, 3 * Cp, Cp), lambda n: (0, 0, 0)),   # DMA'd once
            pl.BlockSpec((1, 1, Cp), lambda n: (0, 0, 0)),
        ],
        out_specs=pl.BlockSpec((nb, H, W, Cp), lambda n: (n, 0, 0, 0)),
        scratch_shapes=[
            pltpu.VMEM((H + 2, W, 3 * Cp), compute_dtype),        # column-im2col scratch
        ],
    )

    out = pl.pallas_call(
        basic_block_kernel,
        out_shape=jax.ShapeDtypeStruct((N, H, W, Cp), x_nhwc.dtype),
        grid_spec=grid_spec,
        compiler_params=pltpu.CompilerParams(
            dimension_semantics=("parallel",),          # shard batch across TCs (v7x)
            vmem_limit_bytes=32 * 1024 * 1024),         # ample for these tiles; < v7x 64 MiB
    )(xp, w1f, bias1, w2f, bias2)
    return out[..., :Cout]                              # drop channel padding (glue)


def ref_forward(x_nhwc, params):
    """Pure-JAX reference (lax conv) for validation."""
    w1, g1, b1, m1, v1, w2, g2, b2, m2, v2 = params
    conv = lambda x, w: jax.lax.conv_general_dilated(
        x, w, window_strides=(1, 1), padding="SAME",
        dimension_numbers=("NHWC", "HWIO", "NHWC"))
    bn = lambda x, g, b, m, v: (x - m) / jnp.sqrt(v + EPS) * g + b
    out = jnp.maximum(bn(conv(x_nhwc, w1), g1, b1, m1, v1), 0.0)
    out = bn(conv(out, w2), g2, b2, m2, v2)
    return jnp.maximum(out + x_nhwc, 0.0)


def make_params(key, cin, cout):
    ks = jax.random.split(key, 8)
    w1 = 0.1 * jax.random.normal(ks[0], (3, 3, cin, cout), jnp.float32)
    w2 = 0.1 * jax.random.normal(ks[1], (3, 3, cout, cout), jnp.float32)
    g1 = 1.0 + 0.1 * jax.random.normal(ks[2], (cout,), jnp.float32)
    b1 = 0.1 * jax.random.normal(ks[3], (cout,), jnp.float32)
    m1 = 0.05 * jax.random.normal(ks[4], (cout,), jnp.float32)
    v1 = 1.0 + 0.1 * jnp.abs(jax.random.normal(ks[5], (cout,), jnp.float32))
    g2 = 1.0 + 0.1 * jax.random.normal(ks[6], (cout,), jnp.float32)
    b2 = 0.1 * jax.random.normal(ks[7], (cout,), jnp.float32)
    m2 = jnp.zeros((cout,), jnp.float32)
    v2 = jnp.ones((cout,), jnp.float32)
    return (w1, g1, b1, m1, v1, w2, g2, b2, m2, v2)


if __name__ == "__main__":
    key = jax.random.PRNGKey(0)
    kx, kp = jax.random.split(key)

    N, C, H, W = 2, 4, 16, 16                      # PyTorch NCHW example input
    x_nchw = jax.random.normal(kx, (N, C, H, W), jnp.float32)
    x_nhwc = jnp.transpose(x_nchw, (0, 2, 3, 1))   # to TPU-friendly NHWC

    params = make_params(kp, C, C)                 # in==out channels, stride=1, no downsample
    ref = ref_forward(x_nhwc, params)

    fwd = jax.jit(basic_block_forward,
                  static_argnames=("compute_dtype", "images_per_step"))

    # f32 matmul operands: strict check vs the f32 reference.
    out_f32 = jax.block_until_ready(fwd(x_nhwc, params, compute_dtype=jnp.float32))
    assert out_f32.shape == (N, H, W, C)
    assert jnp.allclose(out_f32, ref, atol=1e-4, rtol=1e-4), "f32 mismatch vs JAX reference"

    # bf16 matmul operands (f32 accumulation + f32 epilogue): looser tolerance.
    out_bf16 = jax.block_until_ready(fwd(x_nhwc, params, compute_dtype=jnp.bfloat16))
    assert out_bf16.shape == (N, H, W, C)
    assert jnp.allclose(out_bf16, ref, atol=5e-2, rtol=5e-2), "bf16 mismatch vs JAX reference"

    print("KERNEL_OK")
</pallas_src>

<mosaic_0001>
module attributes {stable_mosaic.version = 11 : i64} {
  func.func @basic_block_kernel(%arg0: i32, %arg1: memref<1x16x16x128xf32, #tpu.memory_space<vmem>>, %arg2: memref<3x384x128xf32, #tpu.memory_space<vmem>>, %arg3: memref<1x1x128xf32, #tpu.memory_space<vmem>>, %arg4: memref<3x384x128xf32, #tpu.memory_space<vmem>>, %arg5: memref<1x1x128xf32, #tpu.memory_space<vmem>>, %arg6: memref<1x16x16x128xf32, #tpu.memory_space<vmem>>, %arg7: memref<18x16x384xf32, #tpu.memory_space<vmem>>) attributes {dimension_semantics = [#tpu.dimension_semantics<parallel>], iteration_bounds = array<i64: 2>, scalar_prefetch = 0 : i64, scratch_operands = 1 : i64, tpu.core_type = #tpu.core_type<tc>, window_params = [{transform_indices = @transform_0, window_bounds = array<i64: 1, 16, 16, 128>}, {pipeline_mode = #tpu.pipeline_mode<synchronous>, transform_indices = @transform_1, window_bounds = array<i64: 3, 384, 128>}, {pipeline_mode = #tpu.pipeline_mode<synchronous>, transform_indices = @transform_2, window_bounds = array<i64: 1, 1, 128>}, {pipeline_mode = #tpu.pipeline_mode<synchronous>, transform_indices = @transform_3, window_bounds = array<i64: 3, 384, 128>}, {pipeline_mode = #tpu.pipeline_mode<synchronous>, transform_indices = @transform_4, window_bounds = array<i64: 1, 1, 128>}, {transform_indices = @transform_5, window_bounds = array<i64: 1, 16, 16, 128>}]} {
    %cst = arith.constant 0.000000e+00 : f32
    %0 = vector.broadcast %cst : f32 to vector<16x1x128xf32>
    %cst_0 = arith.constant 0.000000e+00 : f32
    %1 = vector.broadcast %cst_0 : f32 to vector<16x384xf32>
    %c0 = arith.constant 0 : index
    %c0_1 = arith.constant 0 : index
    %c0_2 = arith.constant 0 : index
    %2 = vector.load %arg7[%c0, %c0_1, %c0_2] : memref<18x16x384xf32, #tpu.memory_space<vmem>>, vector<1x16x384xf32>
    %3 = vector.shape_cast %2 : vector<1x16x384xf32> to vector<16x384xf32>
    %4 = vector.shape_cast %1 : vector<16x384xf32> to vector<1x16x384xf32>
    tpu.vector_store %arg7[%c0, %c0_1, %c0_2], %4 {strides = array<i32>} : memref<18x16x384xf32, #tpu.memory_space<vmem>>, vector<1x16x384xf32>,
    %c17 = arith.constant 17 : index
    %c0_3 = arith.constant 0 : index
    %c0_4 = arith.constant 0 : index
    %5 = vector.load %arg7[%c17, %c0_3, %c0_4] : memref<18x16x384xf32, #tpu.memory_space<vmem>>, vector<1x16x384xf32>
    %6 = vector.shape_cast %5 : vector<1x16x384xf32> to vector<16x384xf32>
    %7 = vector.shape_cast %1 : vector<16x384xf32> to vector<1x16x384xf32>
    tpu.vector_store %arg7[%c17, %c0_3, %c0_4], %7 {strides = array<i32>} : memref<18x16x384xf32, #tpu.memory_space<vmem>>, vector<1x16x384xf32>,
    %c0_5 = arith.constant 0 : index
    %c0_6 = arith.constant 0 : index
    %c0_7 = arith.constant 0 : index
    %c0_8 = arith.constant 0 : index
    %8 = vector.load %arg1[%c0_5, %c0_6, %c0_7, %c0_8] : memref<1x16x16x128xf32, #tpu.memory_space<vmem>>, vector<1x16x16x128xf32>
    %9 = vector.shape_cast %8 : vector<1x16x16x128xf32> to vector<16x16x128xf32>
    %10 = vector.extract_strided_slice %9 {offsets = [0, 0, 0], sizes = [16, 15, 128], strides = [1, 1, 1]} : vector<16x16x128xf32> to vector<16x15x128xf32>
    %11 = tpu.concatenate %0, %10 in 1 : vector<16x1x128xf32>, vector<16x15x128xf32> -> vector<16x16x128xf32>
    %c1 = arith.constant 1 : index
    %c0_9 = arith.constant 0 : index
    %c0_10 = arith.constant 0 : index
    %12 = vector.load %arg7[%c1, %c0_9, %c0_10] : memref<18x16x384xf32, #tpu.memory_space<vmem>>, vector<16x16x128xf32>
    tpu.vector_store %arg7[%c1, %c0_9, %c0_10], %11 {strides = array<i32>} : memref<18x16x384xf32, #tpu.memory_space<vmem>>, vector<16x16x128xf32>,
    %c1_11 = arith.constant 1 : index
    %c0_12 = arith.constant 0 : index
    %c128 = arith.constant 128 : index
    %13 = vector.load %arg7[%c1_11, %c0_12, %c128] : memref<18x16x384xf32, #tpu.memory_space<vmem>>, vector<16x16x128xf32>
    tpu.vector_store %arg7[%c1_11, %c0_12, %c128], %9 {strides = array<i32>} : memref<18x16x384xf32, #tpu.memory_space<vmem>>, vector<16x16x128xf32>,
    %14 = vector.extract_strided_slice %9 {offsets = [0, 1, 0], sizes = [16, 15, 128], strides = [1, 1, 1]} : vector<16x16x128xf32> to vector<16x15x128xf32>
    %15 = tpu.concatenate %14, %0 in 1 : vector<16x15x128xf32>, vector<16x1x128xf32> -> vector<16x16x128xf32>
    %c1_13 = arith.constant 1 : index
    %c0_14 = arith.constant 0 : index
    %c256 = arith.constant 256 : index
    %16 = vector.load %arg7[%c1_13, %c0_14, %c256] : memref<18x16x384xf32, #tpu.memory_space<vmem>>, vector<16x16x128xf32>
    tpu.vector_store %arg7[%c1_13, %c0_14, %c256], %15 {strides = array<i32>} : memref<18x16x384xf32, #tpu.memory_space<vmem>>, vector<16x16x128xf32>,
    %c0_15 = arith.constant 0 : index
    %c0_16 = arith.constant 0 : index
    %c0_17 = arith.constant 0 : index
    %17 = vector.load %arg7[%c0_15, %c0_16, %c0_17] : memref<18x16x384xf32, #tpu.memory_space<vmem>>, vector<16x16x384xf32>
    %c0_18 = arith.constant 0 : index
    %c0_19 = arith.constant 0 : index
    %c0_20 = arith.constant 0 : index
    %18 = vector.load %arg2[%c0_18, %c0_19, %c0_20] : memref<3x384x128xf32, #tpu.memory_space<vmem>>, vector<1x384x128xf32>
    %19 = vector.shape_cast %18 : vector<1x384x128xf32> to vector<384x128xf32>
    %cst_21 = arith.constant dense<0.000000e+00> : vector<16x16x128xf32>
    %20 = tpu.matmul %17, %19, %cst_21 {dimension_numbers = #tpu.dot_dimension_numbers<[2], [0], [0, 1], [1], [0, 0, 0, 1, 1, 1], [], []>} : vector<16x16x384xf32>, vector<384x128xf32>, vector<16x16x128xf32> -> vector<16x16x128xf32>
    %c1_22 = arith.constant 1 : index
    %c0_23 = arith.constant 0 : index
    %c0_24 = arith.constant 0 : index
    %21 = vector.load %arg7[%c1_22, %c0_23, %c0_24] : memref<18x16x384xf32, #tpu.memory_space<vmem>>, vector<16x16x384xf32>
    %c1_25 = arith.constant 1 : index
    %c0_26 = arith.constant 0 : index
    %c0_27 = arith.constant 0 : index
    %22 = vector.load %arg2[%c1_25, %c0_26, %c0_27] : memref<3x384x128xf32, #tpu.memory_space<vmem>>, vector<1x384x128xf32>
    %23 = vector.shape_cast %22 : vector<1x384x128xf32> to vector<384x128xf32>
    %cst_28 = arith.constant dense<0.000000e+00> : vector<16x16x128xf32>
    %24 = tpu.matmul %21, %23, %cst_28 {dimension_numbers = #tpu.dot_dimension_numbers<[2], [0], [0, 1], [1], [0, 0, 0, 1, 1, 1], [], []>} : vector<16x16x384xf32>, vector<384x128xf32>, vector<16x16x128xf32> -> vector<16x16x128xf32>
    %25 = arith.addf %20, %24 : vector<16x16x128xf32>
    %c2 = arith.constant 2 : index
    %c0_29 = arith.constant 0 : index
    %c0_30 = arith.constant 0 : index
    %26 = vector.load %arg7[%c2, %c0_29, %c0_30] : memref<18x16x384xf32, #tpu.memory_space<vmem>>, vector<16x16x384xf32>
    %c2_31 = arith.constant 2 : index
    %c0_32 = arith.constant 0 : index
    %c0_33 = arith.constant 0 : index
    %27 = vector.load %arg2[%c2_31, %c0_32, %c0_33] : memref<3x384x128xf32, #tpu.memory_space<vmem>>, vector<1x384x128xf32>
    %28 = vector.shape_cast %27 : vector<1x384x128xf32> to vector<384x128xf32>
    %cst_34 = arith.constant dense<0.000000e+00> : vector<16x16x128xf32>
    %29 = tpu.matmul %26, %28, %cst_34 {dimension_numbers = #tpu.dot_dimension_numbers<[2], [0], [0, 1], [1], [0, 0, 0, 1, 1, 1], [], []>} : vector<16x16x384xf32>, vector<384x128xf32>, vector<16x16x128xf32> -> vector<16x16x128xf32>
    %30 = arith.addf %25, %29 : vector<16x16x128xf32>
    %c0_35 = arith.constant 0 : index
    %c0_36 = arith.constant 0 : index
    %c0_37 = arith.constant 0 : index
    %31 = vector.load %arg3[%c0_35, %c0_36, %c0_37] : memref<1x1x128xf32, #tpu.memory_space<vmem>>, vector<1x1x128xf32>
    %32 = vector.broadcast %31 : vector<1x1x128xf32> to vector<16x16x128xf32>
    %33 = arith.addf %30, %32 : vector<16x16x128xf32>
    %cst_38 = arith.constant 0.000000e+00 : f32
    %34 = vector.broadcast %cst_38 : f32 to vector<16x16x128xf32>
    %35 = arith.maximumf %33, %34 : vector<16x16x128xf32>
    %36 = vector.extract_strided_slice %35 {offsets = [0, 0, 0], sizes = [16, 15, 128], strides = [1, 1, 1]} : vector<16x16x128xf32> to vector<16x15x128xf32>
    %37 = tpu.concatenate %0, %36 in 1 : vector<16x1x128xf32>, vector<16x15x128xf32> -> vector<16x16x128xf32>
    %c1_39 = arith.constant 1 : index
    %c0_40 = arith.constant 0 : index
    %c0_41 = arith.constant 0 : index
    %38 = vector.load %arg7[%c1_39, %c0_40, %c0_41] : memref<18x16x384xf32, #tpu.memory_space<vmem>>, vector<16x16x128xf32>
    tpu.vector_store %arg7[%c1_39, %c0_40, %c0_41], %37 {strides = array<i32>} : memref<18x16x384xf32, #tpu.memory_space<vmem>>, vector<16x16x128xf32>,
    %c1_42 = arith.constant 1 : index
    %c0_43 = arith.constant 0 : index
    %c128_44 = arith.constant 128 : index
    %39 = vector.load %arg7[%c1_42, %c0_43, %c128_44] : memref<18x16x384xf32, #tpu.memory_space<vmem>>, vector<16x16x128xf32>
    tpu.vector_store %arg7[%c1_42, %c0_43, %c128_44], %35 {strides = array<i32>} : memref<18x16x384xf32, #tpu.memory_space<vmem>>, vector<16x16x128xf32>,
    %40 = vector.extract_strided_slice %35 {offsets = [0, 1, 0], sizes = [16, 15, 128], strides = [1, 1, 1]} : vector<16x16x128xf32> to vector<16x15x128xf32>
    %41 = tpu.concatenate %40, %0 in 1 : vector<16x15x128xf32>, vector<16x1x128xf32> -> vector<16x16x128xf32>
    %c1_45 = arith.constant 1 : index
    %c0_46 = arith.constant 0 : index
    %c256_47 = arith.constant 256 : index
    %42 = vector.load %arg7[%c1_45, %c0_46, %c256_47] : memref<18x16x384xf32, #tpu.memory_space<vmem>>, vector<16x16x128xf32>
    tpu.vector_store %arg7[%c1_45, %c0_46, %c256_47], %41 {strides = array<i32>} : memref<18x16x384xf32, #tpu.memory_space<vmem>>, vector<16x16x128xf32>,
    %c0_48 = arith.constant 0 : index
    %c0_49 = arith.constant 0 : index
    %c0_50 = arith.constant 0 : index
    %43 = vector.load %arg7[%c0_48, %c0_49, %c0_50] : memref<18x16x384xf32, #tpu.memory_space<vmem>>, vector<16x16x384xf32>
    %c0_51 = arith.constant 0 : index
    %c0_52 = arith.constant 0 : index
    %c0_53 = arith.constant 0 : index
    %44 = vector.load %arg4[%c0_51, %c0_52, %c0_53] : memref<3x384x128xf32, #tpu.memory_space<vmem>>, vector<1x384x128xf32>
    %45 = vector.shape_cast %44 : vector<1x384x128xf32> to vector<384x128xf32>
    %cst_54 = arith.constant dense<0.000000e+00> : vector<16x16x128xf32>
    %46 = tpu.matmul %43, %45, %cst_54 {dimension_numbers = #tpu.dot_dimension_numbers<[2], [0], [0, 1], [1], [0, 0, 0, 1, 1, 1], [], []>} : vector<16x16x384xf32>, vector<384x128xf32>, vector<16x16x128xf32> -> vector<16x16x128xf32>
    %c1_55 = arith.constant 1 : index
    %c0_56 = arith.constant 0 : index
    %c0_57 = arith.constant 0 : index
    %47 = vector.load %arg7[%c1_55, %c0_56, %c0_57] : memref<18x16x384xf32, #tpu.memory_space<vmem>>, vector<16x16x384xf32>
    %c1_58 = arith.constant 1 : index
    %c0_59 = arith.constant 0 : index
    %c0_60 = arith.constant 0 : index
    %48 = vector.load %arg4[%c1_58, %c0_59, %c0_60] : memref<3x384x128xf32, #tpu.memory_space<vmem>>, vector<1x384x128xf32>
    %49 = vector.shape_cast %48 : vector<1x384x128xf32> to vector<384x128xf32>
    %cst_61 = arith.constant dense<0.000000e+00> : vector<16x16x128xf32>
    %50 = tpu.matmul %47, %49, %cst_61 {dimension_numbers = #tpu.dot_dimension_numbers<[2], [0], [0, 1], [1], [0, 0, 0, 1, 1, 1], [], []>} : vector<16x16x384xf32>, vector<384x128xf32>, vector<16x16x128xf32> -> vector<16x16x128xf32>
    %51 = arith.addf %46, %50 : vector<16x16x128xf32>
    %c2_62 = arith.constant 2 : index
    %c0_63 = arith.constant 0 : index
    %c0_64 = arith.constant 0 : index
    %52 = vector.load %arg7[%c2_62, %c0_63, %c0_64] : memref<18x16x384xf32, #tpu.memory_space<vmem>>, vector<16x16x384xf32>
    %c2_65 = arith.constant 2 : index
    %c0_66 = arith.constant 0 : index
    %c0_67 = arith.constant 0 : index
    %53 = vector.load %arg4[%c2_65, %c0_66, %c0_67] : memref<3x384x128xf32, #tpu.memory_space<vmem>>, vector<1x384x128xf32>
    %54 = vector.shape_cast %53 : vector<1x384x128xf32> to vector<384x128xf32>
    %cst_68 = arith.constant dense<0.000000e+00> : vector<16x16x128xf32>
    %55 = tpu.matmul %52, %54, %cst_68 {dimension_numbers = #tpu.dot_dimension_numbers<[2], [0], [0, 1], [1], [0, 0, 0, 1, 1, 1], [], []>} : vector<16x16x384xf32>, vector<384x128xf32>, vector<16x16x128xf32> -> vector<16x16x128xf32>
    %56 = arith.addf %51, %55 : vector<16x16x128xf32>
    %c0_69 = arith.constant 0 : index
    %c0_70 = arith.constant 0 : index
    %c0_71 = arith.constant 0 : index
    %57 = vector.load %arg5[%c0_69, %c0_70, %c0_71] : memref<1x1x128xf32, #tpu.memory_space<vmem>>, vector<1x1x128xf32>
    %58 = vector.broadcast %57 : vector<1x1x128xf32> to vector<16x16x128xf32>
    %59 = arith.addf %56, %58 : vector<16x16x128xf32>
    %c0_72 = arith.constant 0 : index
    %c0_73 = arith.constant 0 : index
    %c0_74 = arith.constant 0 : index
    %c0_75 = arith.constant 0 : index
    %60 = vector.load %arg1[%c0_72, %c0_73, %c0_74, %c0_75] : memref<1x16x16x128xf32, #tpu.memory_space<vmem>>, vector<1x16x16x128xf32>
    %61 = vector.shape_cast %60 : vector<1x16x16x128xf32> to vector<16x16x128xf32>
    %62 = arith.addf %59, %61 : vector<16x16x128xf32>
    %cst_76 = arith.constant 0.000000e+00 : f32
    %63 = vector.broadcast %cst_76 : f32 to vector<16x16x128xf32>
    %64 = arith.maximumf %62, %63 : vector<16x16x128xf32>
    %c0_77 = arith.constant 0 : index
    %c0_78 = arith.constant 0 : index
    %c0_79 = arith.constant 0 : index
    %c0_80 = arith.constant 0 : index
    %65 = vector.load %arg6[%c0_77, %c0_78, %c0_79, %c0_80] : memref<1x16x16x128xf32, #tpu.memory_space<vmem>>, vector<1x16x16x128xf32>
    %66 = vector.shape_cast %65 : vector<1x16x16x128xf32> to vector<16x16x128xf32>
    %67 = vector.shape_cast %64 : vector<16x16x128xf32> to vector<1x16x16x128xf32>
    tpu.vector_store %arg6[%c0_77, %c0_78, %c0_79, %c0_80], %67 {strides = array<i32>} : memref<1x16x16x128xf32, #tpu.memory_space<vmem>>, vector<1x16x16x128xf32>,
    return
  }
  func.func @transform_0(%arg0: i32) -> (i32, i32, i32, i32) {
    %c0_i32 = arith.constant 0 : i32
    %c0_i32_0 = arith.constant 0 : i32
    %c0_i32_1 = arith.constant 0 : i32
    %c0_i32_2 = arith.constant 0 : i32
    return %arg0, %c0_i32, %c0_i32_0, %c0_i32_1 : i32, i32, i32, i32
  }
  func.func @transform_1(%arg0: i32) -> (i32, i32, i32) {
    %c0_i32 = arith.constant 0 : i32
    %c0_i32_0 = arith.constant 0 : i32
    %c0_i32_1 = arith.constant 0 : i32
    %c0_i32_2 = arith.constant 0 : i32
    return %c0_i32, %c0_i32_0, %c0_i32_1 : i32, i32, i32
  }
  func.func @transform_2(%arg0: i32) -> (i32, i32, i32) {
    %c0_i32 = arith.constant 0 : i32
    %c0_i32_0 = arith.constant 0 : i32
    %c0_i32_1 = arith.constant 0 : i32
    %c0_i32_2 = arith.constant 0 : i32
    return %c0_i32, %c0_i32_0, %c0_i32_1 : i32, i32, i32
  }
  func.func @transform_3(%arg0: i32) -> (i32, i32, i32) {
    %c0_i32 = arith.constant 0 : i32
    %c0_i32_0 = arith.constant 0 : i32
    %c0_i32_1 = arith.constant 0 : i32
    %c0_i32_2 = arith.constant 0 : i32
    return %c0_i32, %c0_i32_0, %c0_i32_1 : i32, i32, i32
  }
  func.func @transform_4(%arg0: i32) -> (i32, i32, i32) {
    %c0_i32 = arith.constant 0 : i32
    %c0_i32_0 = arith.constant 0 : i32
    %c0_i32_1 = arith.constant 0 : i32
    %c0_i32_2 = arith.constant 0 : i32
    return %c0_i32, %c0_i32_0, %c0_i32_1 : i32, i32, i32
  }
  func.func @transform_5(%arg0: i32) -> (i32, i32, i32, i32) {
    %c0_i32 = arith.constant 0 : i32
    %c0_i32_0 = arith.constant 0 : i32
    %c0_i32_1 = arith.constant 0 : i32
    %c0_i32_2 = arith.constant 0 : i32
    return %arg0, %c0_i32, %c0_i32_0, %c0_i32_1 : i32, i32, i32, i32
  }
}

</mosaic_0001>

<bundles_post_ra>
// kernel: basic_block_forward.1
= control target key start
LH: loop header
LB: loop body
LE: loop exit
PB: predicated region body
PF: predicated region fallthrough
CT: control target
= control target key end

     0   :  { %s6168_s18 = smov 0   ;;  %s9499_s0 = inlined_call_operand.vmem [shape: f32[2,16,16,128], index: 0, kind: input, shape index: {}]   ;;  %s9500_s1 = inlined_call_operand.vmem [shape: f32[3,384,128], index: 1, kind: input, shape index: {}]   ;;  %s9501_s2 = inlined_call_operand.vmem [shape: f32[1,1,128], index: 2, kind: input, shape index: {}]   ;;  %s9502_s3 = inlined_call_operand.vmem [shape: f32[3,384,128], index: 3, kind: input, shape index: {}]   ;;  %s9503_s4 = inlined_call_operand.vmem [shape: f32[1,1,128], index: 4, kind: input, shape index: {}]   ;;  %s9504_s5 = inlined_call_operand.vmem [shape: f32[2,16,16,128], index: 5, kind: output, shape index: {}]  }
   0x1 LB: > { %s4839_s19 = sadd.s32 4294967295, %s6135_s18   ;;  %p4843_p0 = scmp.ge.s32.totalorder %s6135_s18, 1  ;;  %s6135_s18 = sphi %s6168_s18, %s15_s18  }
   0x2   : > { %p187_p1 = scmp.lt.s32.totalorder %s6135_s18, 3 }
   0x4   : > { %p188_p2 = pnand %p4843_p0, %p187_p1 }
   0x6   : > { %191 = sbr.rel (%p188_p2) target bundleno = 1009 (0x3f1), region = 40 }
   0xb   : > { %v4895_v0 = vld [vmem:[%s9500_s1 + $0x2f8] sm:$0xff]  ;;  %v4894_v2 = vld [vmem:[%s9500_s1 + $0x2f0] sm:$0xff]  ;;  %v9513_v3 = vmov 0.0   ;;  %v4893_v5 = vld [vmem:[%s9500_s1 + $0x2e8] sm:$0xff]  ;;  %p215_p3 = scmp.lt.s32.totalorder %s4839_s19, 1  ;;  %vm464_vm0 = vcmask 1046528  }
   0xc   : > { %v4863_v1 = vld [vmem:[%s9500_s1 + $0x1f8] sm:$0xff]  ;;  %882 = vmatprep.subr.mxu0 %v9513_v3  ;;  %5610 = vmatprep.subr.mxu1 %v4895_v0  ;;  %v4862_v4 = vld [vmem:[%s9500_s1 + $0x1f0] sm:$0xff]  ;;  %v4861_v6 = vld [vmem:[%s9500_s1 + $0x1e8] sm:$0xff]  ;;  %vm302_vm1 = vcmask 1040384  }
   0xd   : > { %883 = vmatpush1.msra.mxu0 %v4863_v1  ;;  %5611 = vmatpush3.msra.mxu1 %v4895_v0  ;;  %v4892_v7 = vld [vmem:[%s9500_s1 + $0x2e0] sm:$0xff]  ;;  %v4891_v9 = vld [vmem:[%s9500_s1 + $0x2d8] sm:$0xff]  ;;  %v4890_v11 = vld [vmem:[%s9500_s1 + $0x2d0] sm:$0xff]  ;;  %s9830_s19 = smov (!%p215_p3, %s4839_s19), 1 }
   0xe   : > { %884 = vmatprep.subr.mxu0 %v9513_v3  ;;  %5612 = vmatprep.subr.mxu1 %v4894_v2  ;;  %v4860_v8 = vld [vmem:[%s9500_s1 + $0x1e0] sm:$0xff]  ;;  %v4859_v10 = vld [vmem:[%s9500_s1 + $0x1d8] sm:$0xff]  ;;  %v4858_v12 = vld [vmem:[%s9500_s1 + $0x1d0] sm:$0xff]  ;;  %s5044_s12 = sshll.u32 %s9830_s19, 8 }
   0xf   : > { %885 = vmatpush1.msra.mxu0 %v4862_v4  ;;  %5613 = vmatpush3.msra.mxu1 %v4894_v2  ;;  %v4889_v13 = vld [vmem:[%s9500_s1 + $0x2c8] sm:$0xff]  ;;  %v4888_v15 = vld [vmem:[%s9500_s1 + $0x2c0] sm:$0xff]  ;;  %v4887_v17 = vld [vmem:[%s9500_s1 + $0x2b8] sm:$0xff]  ;;  %s6267_s23 = scalar_lea.vmem %s9499_s0, %s5044_s12  ;;  %s9371_s10 = scalar_lea.vmem %s9504_s5, %s5044_s12 }
  0x10   : > { %886 = vmatprep.subr.mxu0 %v9513_v3  ;;  %5614 = vmatprep.subr.mxu1 %v4893_v5  ;;  %v4857_v14 = vld [vmem:[%s9500_s1 + $0x1c8] sm:$0xff]  ;;  %v4856_v16 = vld [vmem:[%s9500_s1 + $0x1c0] sm:$0xff]  ;;  %v4855_v18 = vld [vmem:[%s9500_s1 + $0x1b8] sm:$0xff] }
  0x11   : > { %887 = vmatpush1.msra.mxu0 %v4861_v6  ;;  %5615 = vmatpush3.msra.mxu1 %v4893_v5  ;;  %v4886_v19 = vld [vmem:[%s9500_s1 + $0x2b0] sm:$0xff]  ;;  %v4885_v21 = vld [vmem:[%s9500_s1 + $0x2a8] sm:$0xff]  ;;  %v4884_v23 = vld [vmem:[%s9500_s1 + $0x2a0] sm:$0xff] }
  0x12   : > { %888 = vmatprep.subr.mxu0 %v9513_v3  ;;  %5616 = vmatprep.subr.mxu1 %v4892_v7  ;;  %v4854_v20 = vld [vmem:[%s9500_s1 + $0x1b0] sm:$0xff]  ;;  %v4853_v22 = vld [vmem:[%s9500_s1 + $0x1a8] sm:$0xff]  ;;  %v4852_v24 = vld [vmem:[%s9500_s1 + $0x1a0] sm:$0xff] }
  0x13   : > { %889 = vmatpush1.msra.mxu0 %v4860_v8  ;;  %5617 = vmatpush3.msra.mxu1 %v4892_v7  ;;  %v4883_v25 = vld [vmem:[%s9500_s1 + $0x298] sm:$0xff]  ;;  %v6281_v27 = vld [vmem:[%s6267_s23] sm:$0xff]  ;;  %v6284_v28 = vld [vmem:[%s6267_s23 + $0x8] sm:$0xff] }
  0x14   : > { %890 = vmatprep.subr.mxu0 %v9513_v3  ;;  %5618 = vmatprep.subr.mxu1 %v4891_v9  ;;  %v4851_v26 = vld [vmem:[%s9500_s1 + $0x198] sm:$0xff]  ;;  %v4882_v29 = vld [vmem:[%s9500_s1 + $0x290] sm:$0xff]  ;;  %v4881_v31 = vld [vmem:[%s9500_s1 + $0x288] sm:$0xff]  ;;  %v465_v32 = vrot.slane %v6281_v27, 1  ;;  %v6298_v33 = vrot.slane %v6284_v28, 1 }
  0x15   : > { %891 = vmatpush1.msra.mxu0 %v4859_v10  ;;  %5619 = vmatpush3.msra.mxu1 %v4891_v9  ;;  %v4850_v30 = vld [vmem:[%s9500_s1 + $0x190] sm:$0xff]  ;;  %v4849_v34 = vld [vmem:[%s9500_s1 + $0x188] sm:$0xff]  ;;  %v6308_v36 = vld [vmem:[%s6267_s23 + $0x18] sm:$0xff] }
  0x16   : > { %892 = vmatprep.subr.mxu0 %v9513_v3  ;;  %5620 = vmatprep.subr.mxu1 %v4890_v11  ;;  %v6305_v35 = vld [vmem:[%s6267_s23 + $0x10] sm:$0xff]  ;;  %v4880_v37 = vld [vmem:[%s9500_s1 + $0x280] sm:$0xff]  ;;  %v6319_v39 = vsel %vm464_vm0, %v465_v32, %v6298_v33  ;;  %v6323_v41 = vrot.slane %v6308_v36, 1  ;;  %v4879_v42 = vld [vmem:[%s9500_s1 + $0x278] sm:$0xff] }
  0x17   : > { %893 = vmatpush1.msra.mxu0 %v4858_v12  ;;  %5621 = vmatpush3.msra.mxu1 %v4890_v11  ;;  %v4848_v38 = vld [vmem:[%s9500_s1 + $0x180] sm:$0xff]  ;;  %v468_v40 = vrot.slane %v6305_v35, 1  ;;  %v704_v43 = vld [vmem:[%s9500_s1 + $0x78] sm:$0xff]  ;;  %v6336_v45 = vld [vmem:[%s6267_s23 + $0x28] sm:$0xff] }
  0x18   : > { %894 = vmatprep.subr.mxu0 %v9513_v3  ;;  %5622 = vmatprep.subr.mxu1 %v4889_v13  ;;  %v6333_v44 = vld [vmem:[%s6267_s23 + $0x20] sm:$0xff]  ;;  %v4878_v46 = vld [vmem:[%s9500_s1 + $0x270] sm:$0xff]  ;;  %v6355_v50 = vrot.slane %v6336_v45, 1  ;;  %v4877_v51 = vld [vmem:[%s9500_s1 + $0x268] sm:$0xff] }
  0x19   : > { %895 = vmatpush1.msra.mxu0 %v4857_v14  ;;  %5623 = vmatpush3.msra.mxu1 %v4889_v13  ;;  %v6348_v47 = vsel %vm464_vm0, %v468_v40, %v6323_v41  ;;  %v703_v48 = vld [vmem:[%s9500_s1 + $0x70] sm:$0xff]  ;;  %v471_v49 = vrot.slane %v6333_v44, 1  ;;  %v702_v52 = vld [vmem:[%s9500_s1 + $0x68] sm:$0xff]  ;;  %v6370_v54 = vld [vmem:[%s6267_s23 + $0x38] sm:$0xff] }
  0x1a   : > { %896 = vmatprep.subr.mxu0 %v9513_v3  ;;  %5624 = vmatprep.subr.mxu1 %v4888_v15  ;;  %v6367_v53 = vld [vmem:[%s6267_s23 + $0x30] sm:$0xff]  ;;  %v4876_v55 = vld [vmem:[%s9500_s1 + $0x260] sm:$0xff]  ;;  %v6388_v59 = vrot.slane %v6370_v54, 1  ;;  %v4875_v60 = vld [vmem:[%s9500_s1 + $0x258] sm:$0xff] }
  0x1b   : > { %897 = vmatpush1.msra.mxu0 %v4856_v16  ;;  %5625 = vmatpush3.msra.mxu1 %v4888_v15  ;;  %v6381_v56 = vsel %vm464_vm0, %v471_v49, %v6355_v50  ;;  %v701_v57 = vld [vmem:[%s9500_s1 + $0x60] sm:$0xff]  ;;  %v474_v58 = vrot.slane %v6367_v53, 1  ;;  %v700_v61 = vld [vmem:[%s9500_s1 + $0x58] sm:$0xff]  ;;  %v6403_v63 = vld [vmem:[%s6267_s23 + $0x48] sm:$0xff] }
  0x1c   : > { %898 = vmatprep.subr.mxu0 %v9513_v3  ;;  %5626 = vmatprep.subr.mxu1 %v4887_v17  ;;  %v6400_v62 = vld [vmem:[%s6267_s23 + $0x40] sm:$0xff]  ;;  %v4874_v0 = vld [vmem:[%s9500_s1 + $0x250] sm:$0xff]  ;;  %v6421_v5 = vrot.slane %v6403_v63, 1  ;;  %v4873_v6 = vld [vmem:[%s9500_s1 + $0x248] sm:$0xff] }
  0x1d   : > { %899 = vmatpush1.msra.mxu0 %v4855_v18  ;;  %5627 = vmatpush3.msra.mxu1 %v4887_v17  ;;  %v6414_v1 = vsel %vm464_vm0, %v474_v58, %v6388_v59  ;;  %v699_v2 = vld [vmem:[%s9500_s1 + $0x50] sm:$0xff]  ;;  %v477_v4 = vrot.slane %v6400_v62, 1  ;;  %v698_v7 = vld [vmem:[%s9500_s1 + $0x48] sm:$0xff]  ;;  %v6436_v9 = vld [vmem:[%s6267_s23 + $0x58] sm:$0xff] }
  0x1e   : > { %900 = vmatprep.subr.mxu0 %v9513_v3  ;;  %5628 = vmatprep.subr.mxu1 %v4886_v19  ;;  %v6433_v8 = vld [vmem:[%s6267_s23 + $0x50] sm:$0xff]  ;;  %v4872_v10 = vld [vmem:[%s9500_s1 + $0x240] sm:$0xff]  ;;  %v6454_v14 = vrot.slane %v6436_v9, 1  ;;  %v4871_v15 = vld [vmem:[%s9500_s1 + $0x238] sm:$0xff] }
  0x1f   : > { %901 = vmatpush1.msra.mxu0 %v4854_v20  ;;  %5629 = vmatpush3.msra.mxu1 %v4886_v19  ;;  %v6447_v11 = vsel %vm464_vm0, %v477_v4, %v6421_v5  ;;  %v697_v12 = vld [vmem:[%s9500_s1 + $0x40] sm:$0xff]  ;;  %v480_v13 = vrot.slane %v6433_v8, 1  ;;  %v696_v16 = vld [vmem:[%s9500_s1 + $0x38] sm:$0xff]  ;;  %v6469_v18 = vld [vmem:[%s6267_s23 + $0x68] sm:$0xff]  ;;  %v6585_v4 = vrot.slane %v6281_v27, 7 }
  0x20   : > { %902 = vmatprep.subr.mxu0 %v9513_v3  ;;  %5630 = vmatprep.subr.mxu1 %v4885_v21  ;;  %v6466_v17 = vld [vmem:[%s6267_s23 + $0x60] sm:$0xff]  ;;  %v4870_v19 = vld [vmem:[%s9500_s1 + $0x230] sm:$0xff]  ;;  %v692_v40 = vld [vmem:[%s9500_s1 + $0x18] sm:$0xff] }
  0x21   : > { %903 = vmatpush1.msra.mxu0 %v4853_v22  ;;  %5631 = vmatpush3.msra.mxu1 %v4885_v21  ;;  %v6480_v20 = vsel %vm464_vm0, %v480_v13, %v6454_v14  ;;  %v695_v21 = vld [vmem:[%s9500_s1 + $0x30] sm:$0xff]  ;;  %v483_v22 = vrot.slane %v6466_v17, 1  ;;  %v693_v32 = vld [vmem:[%s9500_s1 + $0x20] sm:$0xff]  ;;  %vm6590_vm2 = vmneg %vm302_vm1 }
  0x22   : > { %904 = vmatprep.subr.mxu0 %v9513_v3  ;;  %5632 = vmatprep.subr.mxu1 %v4884_v23  ;;  %v691_v49 = vld [vmem:[%s9500_s1 + $0x10] sm:$0xff]  ;;  %v6602_v13 = vld [vmem:[%s6267_s23 + $0xa8] sm:$0xff] }
  0x23   : > { %905 = vmatpush1.msra.mxu0 %v4852_v24  ;;  %5633 = vmatpush3.msra.mxu1 %v4884_v23  ;;  %v6487_v23 = vrot.slane %v6469_v18, 1  ;;  %v4869_v24 = vld [vmem:[%s9500_s1 + $0x228] sm:$0xff]  ;;  %v6566_v58 = vld [vmem:[%s6267_s23 + $0x90] sm:$0xff] }
  0x24   : > { %906 = vmatprep.subr.mxu0 %v9513_v3  ;;  %5634 = vmatprep.subr.mxu1 %v4883_v25 }
  0x25   : > { %907 = vmatpush1.msra.mxu0 %v4851_v26  ;;  %5635 = vmatpush3.msra.mxu1 %v4883_v25  ;;  %v694_v25 = vld [vmem:[%s9500_s1 + $0x28] sm:$0xff]  ;;  %v6499_v26 = vld [vmem:[%s6267_s23 + $0x70] sm:$0xff] }
  0x26   : > { %908 = vmatprep.subr.mxu0 %v9513_v3  ;;  %5636 = vmatprep.subr.mxu1 %v4882_v29 }
  0x27   : > { %909 = vmatpush1.msra.mxu0 %v4850_v30  ;;  %5637 = vmatpush3.msra.mxu1 %v4882_v29  ;;  %v6502_v29 = vld [vmem:[%s6267_s23 + $0x78] sm:$0xff]  ;;  %v4868_v30 = vld [vmem:[%s9500_s1 + $0x220] sm:$0xff] }
  0x28   : > { %910 = vmatprep.subr.mxu0 %v9513_v3  ;;  %5638 = vmatprep.subr.mxu1 %v4881_v31 }
  0x29   : > { %911 = vmatpush1.msra.mxu0 %v4849_v34  ;;  %5639 = vmatpush3.msra.mxu1 %v4881_v31  ;;  %v6513_v31 = vsel %vm464_vm0, %v483_v22, %v6487_v23  ;;  %v486_v34 = vrot.slane %v6499_v26, 1  ;;  %v6620_v22 = vrot.slane %v6602_v13, 1 }
  0x2a   : > { %912 = vmatprep.subr.mxu0 %v9513_v3  ;;  %5640 = vmatprep.subr.mxu1 %v4880_v37 }
  0x2b   : > { %913 = vmatpush1.msra.mxu0 %v4848_v38  ;;  %5641 = vmatpush3.msra.mxu1 %v4880_v37  ;;  %v6520_v37 = vrot.slane %v6502_v29, 1  ;;  %v4867_v38 = vld [vmem:[%s9500_s1 + $0x218] sm:$0xff]  ;;  %9635 = vst [vmem:[#allocation8_spill] sm:$0xff] %v6620_v22 }
  0x2c   : > { %5642 = vmatprep.mubr.f32.mxu1 %v6319_v39  ;;  %914 = vmatprep.subr.mxu0 %v9513_v3 }
  0x2d   : > { %5643 = vmatmul.mubr.msk.f32.vlgmr.msra.gmra.mxu1 %vm464_vm0, %v6298_v33  ;;  %1332 = vmatprep.subr.mxu1 %v9513_v3  ;;  %9628 = vst [vmem:[#allocation3_spill] sm:$0xff] %v6520_v37 }
  0x2e   : > { %915 = vmatpush2.msra.mxu0 %v4879_v42  ;;  %1333 = vmatpush1.msra.mxu1 %v704_v43  ;;  %v6533_v42 = vld [vmem:[%s6267_s23 + $0x80] sm:$0xff]  ;;  %v6536_v43 = vld [vmem:[%s6267_s23 + $0x88] sm:$0xff] }
  0x2f   : > { %916 = vmatprep.subr.mxu0 %v9513_v3  ;;  %1334 = vmatprep.subr.mxu1 %v9513_v3 }
  0x30   : > { %917 = vmatpush2.msra.mxu0 %v4878_v46  ;;  %5645 = vmatprep.mubr.f32.mxu1 %v6348_v47  ;;  %v4866_v46 = vld [vmem:[%s9500_s1 + $0x210] sm:$0xff] }
  0x31   : > { %1335 = vmatpush1.msra.mxu1 %v703_v48  ;;  %918 = vmatprep.subr.mxu0 %v9513_v3  ;;  %v6546_v48 = vsel %vm464_vm0, %v486_v34, %v6520_v37  ;;  %v6640_v34 = vld [vmem:[%s6267_s23 + $0xb8] sm:$0xff] }
  0x32   : > { %5646 = vmatmul.mubr.msk.f32.gmra.mxu1 %vm464_vm0, %v6323_v41  ;;  %1336 = vmatprep.subr.mxu1 %v9513_v3  ;;  %9629 = vst [vmem:[#allocation4_spill] sm:$0xff] %v6546_v48 }
  0x33   : > { %919 = vmatpush2.msra.mxu0 %v4877_v51  ;;  %1337 = vmatpush1.msra.mxu1 %v702_v52  ;;  %v489_v51 = vrot.slane %v6533_v42, 1  ;;  %v6555_v52 = vrot.slane %v6536_v43, 1 }
  0x34   : > { %920 = vmatprep.subr.mxu0 %v9513_v3  ;;  %1338 = vmatprep.subr.mxu1 %v9513_v3 }
  0x35   : > { %921 = vmatpush2.msra.mxu0 %v4876_v55  ;;  %5648 = vmatprep.mubr.f32.mxu1 %v6381_v56  ;;  %9630 = vst [vmem:[#allocation5_spill] sm:$0xff] %v6555_v52  ;;  %v4865_v55 = vld [vmem:[%s9500_s1 + $0x208] sm:$0xff] }
  0x36   : > { %1339 = vmatpush1.msra.mxu1 %v701_v57  ;;  %922 = vmatprep.subr.mxu0 %v9513_v3  ;;  %v690_v57 = vld [vmem:[%s9500_s1 + $0x8] sm:$0xff] }
  0x37   : > { %5649 = vmatmul.mubr.msk.f32.gmra.mxu1 %vm464_vm0, %v6355_v50  ;;  %1340 = vmatprep.subr.mxu1 %v9513_v3 }
  0x38   : > { %923 = vmatpush2.msra.mxu0 %v4875_v60  ;;  %1341 = vmatpush1.msra.mxu1 %v700_v61  ;;  %v6569_v60 = vld [vmem:[%s6267_s23 + $0x98] sm:$0xff]  ;;  %v4864_v61 = vld [vmem:[%s9500_s1 + $0x200] sm:$0xff] }
  0x39   : > { %924 = vmatprep.subr.mxu0 %v9513_v3  ;;  %1342 = vmatprep.subr.mxu1 %v9513_v3 }
  0x3a   : > { %925 = vmatpush2.msra.mxu0 %v4874_v0  ;;  %5651 = vmatprep.mubr.f32.mxu1 %v6414_v1  ;;  %v6579_v0 = vsel %vm464_vm0, %v489_v51, %v6555_v52  ;;  %v717_v51 = vld [vmem:[%s9500_s1 + $0xe0] sm:$0xff] }
  0x3b   : > { %1343 = vmatpush1.msra.mxu1 %v699_v2  ;;  %926 = vmatprep.subr.mxu0 %v9513_v3  ;;  %9631 = vst [vmem:[#allocation6_spill] sm:$0xff] %v6579_v0  ;;  %v689_v2 = vld [vmem:[%s9500_s1] sm:$0xff] }
  0x3c   : > { %5652 = vmatmul.mubr.msk.f32.gmra.mxu1 %vm464_vm0, %v6388_v59  ;;  %1344 = vmatprep.subr.mxu1 %v9513_v3 }
  0x3d   : > { %927 = vmatpush2.msra.mxu0 %v4873_v6  ;;  %1345 = vmatpush1.msra.mxu1 %v698_v7  ;;  %v492_v7 = vrot.slane %v6566_v58, 1 }
  0x3e   : > { %928 = vmatprep.subr.mxu0 %v9513_v3  ;;  %1346 = vmatprep.subr.mxu1 %v9513_v3 }
  0x3f   : > { %929 = vmatpush2.msra.mxu0 %v4872_v10  ;;  %5654 = vmatprep.mubr.f32.mxu1 %v6447_v11  ;;  %v6596_v10 = vrot.slane %v6569_v60, 1 }
  0x40   : > { %1347 = vmatpush1.msra.mxu1 %v697_v12  ;;  %930 = vmatprep.subr.mxu0 %v9513_v3  ;;  %v6599_v12 = vld [vmem:[%s6267_s23 + $0xa0] sm:$0xff] }
  0x41   : > { %5655 = vmatmul.mubr.msk.f32.gmra.mxu1 %vm464_vm0, %v6421_v5  ;;  %1348 = vmatprep.subr.mxu1 %v9513_v3  ;;  %9634 = vst [vmem:[#allocation7_spill] sm:$0xff] %v6596_v10 }
  0x42   : > { %931 = vmatpush2.msra.mxu0 %v4871_v15  ;;  %1349 = vmatpush1.msra.mxu1 %v696_v16  ;;  %v736_v15 = vld [vmem:[%s9500_s1 + $0x178] sm:$0xff]  ;;  %v304_v16 = vrot.slane %v6284_v28, 7 }
  0x43   : > { %932 = vmatprep.subr.mxu0 %v9513_v3  ;;  %1350 = vmatprep.subr.mxu1 %v9513_v3 }
  0x44   : > { %933 = vmatpush2.msra.mxu0 %v4870_v19  ;;  %5657 = vmatprep.mubr.f32.mxu1 %v6480_v20  ;;  %v720_v19 = vld [vmem:[%s9500_s1 + $0xf8] sm:$0xff] }
  0x45   : > { %1351 = vmatpush1.msra.mxu1 %v695_v21  ;;  %934 = vmatprep.subr.mxu0 %v9513_v3  ;;  %v495_v21 = vrot.slane %v6599_v12, 1 }
  0x46   : > { %5658 = vmatmul.mubr.msk.f32.gmra.mxu1 %vm464_vm0, %v6454_v14  ;;  %1352 = vmatprep.subr.mxu1 %v9513_v3 }
  0x47   : > { %935 = vmatpush2.msra.mxu0 %v4869_v24  ;;  %1353 = vmatpush1.msra.mxu1 %v694_v25  ;;  %v6625_v24 = vsel %vm464_vm0, %v492_v7, %v6596_v10  ;;  %v719_v25 = vld [vmem:[%s9500_s1 + $0xf0] sm:$0xff]  ;;  %v307_v7 = vrot.slane %v6308_v36, 7 }
  0x48   : > { %936 = vmatprep.subr.mxu0 %v9513_v3  ;;  %1354 = vmatprep.subr.mxu1 %v9513_v3  ;;  %9636 = vst [vmem:[#allocation9_spill] sm:$0xff] %v6625_v24 }
  0x49   : > { %937 = vmatpush2.msra.mxu0 %v4868_v30  ;;  %5660 = vmatprep.mubr.f32.mxu1 %v6513_v31  ;;  %v6632_v30 = vsel %vm302_vm1, %v6585_v4, %v304_v16 }
  0x4a   : > { %1355 = vmatpush1.msra.mxu1 %v693_v32  ;;  %938 = vmatprep.subr.mxu0 %v9513_v3  ;;  %v6637_v32 = vld [vmem:[%s6267_s23 + $0xb0] sm:$0xff] }
  0x4b   : > { %5661 = vmatmul.mubr.msk.f32.gmra.mxu1 %vm464_vm0, %v6487_v23  ;;  %1356 = vmatprep.subr.mxu1 %v9513_v3 }
  0x4c   : > { %939 = vmatpush2.msra.mxu0 %v4867_v38  ;;  %1357 = vmatpush1.msra.mxu1 %v692_v40  ;;  %v718_v38 = vld [vmem:[%s9500_s1 + $0xe8] sm:$0xff]  ;;  %v6648_v40 = vsel %vm464_vm0, %v495_v21, %v6620_v22 }
  0x4d   : > { %940 = vmatprep.subr.mxu0 %v9513_v3  ;;  %1358 = vmatprep.subr.mxu1 %v9513_v3  ;;  %9637 = vst [vmem:[#allocation10_spill] sm:$0xff] %v6648_v40 }
  0x4e   : > { %941 = vmatpush2.msra.mxu0 %v4866_v46  ;;  %5663 = vmatprep.mubr.f32.mxu1 %v6546_v48  ;;  %v6654_v46 = vrot.slane %v6305_v35, 7  ;;  %v708_v48 = vld [vmem:[%s9500_s1 + $0x98] sm:$0xff] }
  0x4f   : > { %1359 = vmatpush1.msra.mxu1 %v691_v49  ;;  %942 = vmatprep.subr.mxu0 %v9513_v3  ;;  %v735_v49 = vld [vmem:[%s9500_s1 + $0x170] sm:$0xff] }
  0x50   : > { %5664 = vmatmul.mubr.msk.f32.gmra.mxu1 %vm464_vm0, %v6520_v37  ;;  %1360 = vmatprep.subr.mxu1 %v9513_v3  ;;  %v6774_v37 = vld [vmem:[%s6267_s23 + $0xf8] sm:$0xff] }
  0x51   : > { %943 = vmatpush2.msra.mxu0 %v4865_v55  ;;  %1361 = vmatpush1.msra.mxu1 %v690_v57  ;;  %v498_v55 = vrot.slane %v6637_v32, 1  ;;  %v6666_v57 = vrot.slane %v6640_v34, 1 }
  0x52   : > { %944 = vmatprep.subr.mxu0 %v9513_v3  ;;  %1362 = vmatprep.subr.mxu1 %v9513_v3 }
  0x53   : > { %945 = vmatpush2.msra.mxu0 %v4864_v61  ;;  %946 = vmatprep.mubr.f32.mxu0 %v6281_v27  ;;  %9638 = vst [vmem:[#allocation11_spill] sm:$0xff] %v6666_v57  ;;  %v6669_v61 = vld [vmem:[%s6267_s23 + $0xc0] sm:$0xff]  ;;  %v6692_v21 = vsel %vm464_vm0, %v498_v55, %v6666_v57  ;;  %v6707_v55 = vld [vmem:[%s6267_s23 + $0xd8] sm:$0xff] }
  0x54   : > { %5666 = vmatprep.mubr.f32.mxu1 %v6579_v0  ;;  %1363 = vmatpush1.msra.mxu1 %v689_v2  ;;  %v6672_v2 = vld [vmem:[%s6267_s23 + $0xc8] sm:$0xff]  ;;  %v501_v16 = vrot.slane %v6669_v61, 1  ;;  %9640 = vst [vmem:[#allocation13_spill] sm:$0xff] %v6692_v21 }
  0x55   : > { %5047 = vmatmul.mubr.msk.f32.vlgmr.msra.gmra.mxu0 %vm6590_vm2, %v6585_v4  ;;  %5667 = vmatmul.mubr.msk.f32.gmra.mxu1 %vm464_vm0, %v6555_v52 }
  0x56   : > { %1364 = vmatprep.subr.mxu1 %v9513_v3  ;;  %5690 = vmatprep.subr.mxu0 %v736_v15 }
  0x57   : > { %1365 = vmatpush2.msra.mxu1 %v720_v19  ;;  %5691 = vmatpush3.msra.mxu0 %v736_v15  ;;  %v716_v15 = vld [vmem:[%s9500_s1 + $0xd8] sm:$0xff]  ;;  %v6685_v19 = vrot.slane %v6672_v2, 1 }
  0x58   : > { %1366 = vmatprep.subr.mxu1 %v9513_v3  ;;  %951 = vmatprep.mubr.f32.mxu0 %v6284_v28 }
  0x59   : > { %5669 = vmatprep.mubr.f32.mxu1 %v6625_v24  ;;  %1367 = vmatpush2.msra.mxu1 %v719_v25  ;;  %9639 = vst [vmem:[#allocation12_spill] sm:$0xff] %v6685_v19  ;;  %v715_v25 = vld [vmem:[%s9500_s1 + $0xd0] sm:$0xff]  ;;  %v712_v24 = vld [vmem:[%s9500_s1 + $0xb8] sm:$0xff] }
  0x5a   : > { %952 = vmatmul.mubr.f32.gmra.mxu0 %v6632_v30  ;;  %5670 = vmatmul.mubr.msk.f32.gmra.mxu1 %vm464_vm0, %v6596_v10  ;;  %v9643_v10 = vmov 0.0  }
  0x5b   : > { %1368 = vmatprep.subr.mxu1 %v9513_v3  ;;  %956 = vmatprep.mubr.f32.mxu0 %v6305_v35 }
  0x5c   : > { %1369 = vmatpush2.msra.mxu1 %v718_v38  ;;  %5672 = vmatprep.mubr.f32.mxu1 %v6648_v40  ;;  %v6699_v38 = vsel %vm302_vm1, %v6654_v46, %v307_v7  ;;  %v6715_v7 = vsel %vm464_vm0, %v501_v16, %v6685_v19  ;;  %v713_v16 = vld [vmem:[%s9500_s1 + $0xc0] sm:$0xff]  ;;  %v6739_v40 = vld [vmem:[%s6267_s23 + $0xe8] sm:$0xff] }
  0x5d   : > { %1370 = vmatprep.subr.mxu1 %v9513_v3  ;;  %5692 = vmatprep.subr.mxu0 %v735_v49  ;;  %9641 = vst [vmem:[#allocation14_spill] sm:$0xff] %v6715_v7 }
  0x5e   : > { %1371 = vmatpush2.msra.mxu1 %v717_v51  ;;  %5049 = vmatmul.mubr.msk.f32.gmra.mxu0 %vm6590_vm2, %v6654_v46  ;;  %v6704_v51 = vld [vmem:[%s6267_s23 + $0xd0] sm:$0xff] }
  0x5f   : > { %5673 = vmatmul.mubr.msk.f32.gmra.mxu1 %vm464_vm0, %v6620_v22  ;;  %1372 = vmatprep.subr.mxu1 %v9513_v3  ;;  %v6733_v22 = vrot.slane %v6707_v55, 1 }
  0x60   : > { %1373 = vmatpush2.msra.mxu1 %v716_v15  ;;  %5693 = vmatpush3.msra.mxu0 %v735_v49  ;;  %v714_v49 = vld [vmem:[%s9500_s1 + $0xc8] sm:$0xff]  ;;  %v6721_v15 = vrot.slane %v6333_v44, 7 }
  0x61   : > { %1374 = vmatprep.subr.mxu1 %v9513_v3  ;;  %961 = vmatprep.mubr.f32.mxu0 %v6308_v36  ;;  %9642 = vst [vmem:[#allocation15_spill] sm:$0xff] %v6733_v22 }
  0x62   : > { %5675 = vmatprep.mubr.f32.mxu1 %v6692_v21  ;;  %1375 = vmatpush2.msra.mxu1 %v715_v25  ;;  %v734_v25 = vld [vmem:[%s9500_s1 + $0x168] sm:$0xff]  ;;  %v504_v21 = vrot.slane %v6704_v51, 1 }
  0x63   : > { %962 = vmatmul.mubr.f32.gmra.mxu0 %v6699_v38  ;;  %5676 = vmatmul.mubr.msk.f32.gmra.mxu1 %vm464_vm0, %v6666_v57  ;;  %v6736_v57 = vld [vmem:[%s6267_s23 + $0xe0] sm:$0xff] }
  0x64   : > { %1376 = vmatprep.subr.mxu1 %v9513_v3  ;;  %966 = vmatprep.mubr.f32.mxu0 %v6333_v44  ;;  %v310_v3 = vrot.slane %v6336_v45, 7  ;;  %v6759_v52 = vsel %vm464_vm0, %v504_v21, %v6733_v22 }
  0x65   : > { %1377 = vmatpush2.msra.mxu1 %v714_v49  ;;  %5678 = vmatprep.mubr.f32.mxu1 %v6715_v7  ;;  %v507_v49 = vrot.slane %v6736_v57, 1  ;;  %v6752_v7 = vrot.slane %v6739_v40, 1  ;;  %9645 = vst [vmem:[#allocation17_spill] sm:$0xff] %v6759_v52 }
  0x66   : > { %1378 = vmatprep.subr.mxu1 %v9643_v10  ;;  %5694 = vmatprep.subr.mxu0 %v734_v25  ;;  %v6766_v0 = vsel %vm302_vm1, %v6721_v15, %v310_v3  ;;  %v6788_v3 = vrot.slane %v6367_v53, 7 }
  0x67   : > { %1379 = vmatpush2.msra.mxu1 %v713_v16  ;;  %5051 = vmatmul.mubr.msk.f32.gmra.mxu0 %vm6590_vm2, %v6721_v15  ;;  %9644 = vst [vmem:[#allocation16_spill] sm:$0xff] %v6752_v7  ;;  %v711_v16 = vld [vmem:[%s9500_s1 + $0xb0] sm:$0xff]  ;;  %v6782_v21 = vsel %vm464_vm0, %v507_v49, %v6752_v7  ;;  %v709_v49 = vld [vmem:[%s9500_s1 + $0xa0] sm:$0xff] }
  0x68   : > { %5679 = vmatmul.mubr.msk.f32.gmra.mxu1 %vm464_vm0, %v6685_v19  ;;  %1380 = vmatprep.subr.mxu1 %v9643_v10  ;;  %v6771_v19 = vld [vmem:[%s6267_s23 + $0xf0] sm:$0xff]  ;;  %9646 = vst [vmem:[#allocation18_spill] sm:$0xff] %v6782_v21 }
  0x69   : > { %1381 = vmatpush2.msra.mxu1 %v712_v24  ;;  %5695 = vmatpush3.msra.mxu0 %v734_v25  ;;  %v710_v24 = vld [vmem:[%s9500_s1 + $0xa8] sm:$0xff]  ;;  %v733_v25 = vld [vmem:[%s9500_s1 + $0x160] sm:$0xff] }
  0x6a   : > { %1382 = vmatprep.subr.mxu1 %v9643_v10  ;;  %971 = vmatprep.mubr.f32.mxu0 %v6336_v45 }
  0x6b   : > { %5681 = vmatprep.mubr.f32.mxu1 %v6759_v52  ;;  %1383 = vmatpush2.msra.mxu1 %v711_v16  ;;  %v510_v16 = vrot.slane %v6771_v19, 1  ;;  %v6800_v52 = vrot.slane %v6774_v37, 1 }
  0x6c   : > { %972 = vmatmul.mubr.f32.gmra.mxu0 %v6766_v0  ;;  %5682 = vmatmul.mubr.msk.f32.gmra.mxu1 %vm464_vm0, %v6733_v22  ;;  %v313_v22 = vrot.slane %v6370_v54, 7 }
  0x6d   : > { %1384 = vmatprep.subr.mxu1 %v9643_v10  ;;  %976 = vmatprep.mubr.f32.mxu0 %v6367_v53  ;;  %9647 = vst [vmem:[#allocation19_spill] sm:$0xff] %v6800_v52 }
  0x6e   : > { %1385 = vmatpush2.msra.mxu1 %v710_v24  ;;  %5684 = vmatprep.mubr.f32.mxu1 %v6782_v21  ;;  %v6816_v24 = vsel %vm464_vm0, %v510_v16, %v6800_v52  ;;  %v707_v21 = vld [vmem:[%s9500_s1 + $0x90] sm:$0xff]  ;;  %v706_v16 = vld [vmem:[%s9500_s1 + $0x88] sm:$0xff] }
  0x6f   : > { %1386 = vmatprep.subr.mxu1 %v9643_v10  ;;  %5696 = vmatprep.subr.mxu0 %v733_v25  ;;  %9648 = vst [vmem:[#allocation20_spill] sm:$0xff] %v6816_v24 }
  0x70   : > { %1387 = vmatpush2.msra.mxu1 %v709_v49  ;;  %5053 = vmatmul.mubr.msk.f32.gmra.mxu0 %vm6590_vm2, %v6788_v3  ;;  %v6823_v49 = vsel %vm302_vm1, %v6788_v3, %v313_v22  ;;  %v732_v22 = vld [vmem:[%s9500_s1 + $0x158] sm:$0xff] }
  0x71   : > { %5685 = vmatmul.mubr.msk.f32.gmra.mxu1 %vm464_vm0, %v6752_v7  ;;  %1388 = vmatprep.subr.mxu1 %v9643_v10  ;;  %v4910_v7 = vld [vmem:[%s9500_s1 + $0x370] sm:$0xff] }
  0x72   : > { %1389 = vmatpush2.msra.mxu1 %v708_v48  ;;  %5697 = vmatpush3.msra.mxu0 %v733_v25  ;;  %v6835_v48 = vrot.slane %v6400_v62, 7  ;;  %v316_v25 = vrot.slane %v6403_v63, 7 }
  0x73   : > { %1390 = vmatprep.subr.mxu1 %v9643_v10  ;;  %981 = vmatprep.mubr.f32.mxu0 %v6370_v54 }
  0x74   : > { %5687 = vmatprep.mubr.f32.mxu1 %v6816_v24  ;;  %1391 = vmatpush2.msra.mxu1 %v707_v21  ;;  %v705_v21 = vld [vmem:[%s9500_s1 + $0x80] sm:$0xff]  ;;  %v4911_v24 = vld [vmem:[%s9500_s1 + $0x378] sm:$0xff] }
  0x75   : > { %982 = vmatmul.mubr.f32.gmra.mxu0 %v6823_v49  ;;  %5688 = vmatmul.mubr.msk.f32.gmra.mxu1 %vm464_vm0, %v6800_v52  ;;  %v731_v52 = vld [vmem:[%s9500_s1 + $0x150] sm:$0xff] }
  0x76   : > { %1392 = vmatprep.subr.mxu1 %v9643_v10  ;;  %986 = vmatprep.mubr.f32.mxu0 %v6400_v62 }
  0x77   : > { %1393 = vmatpush2.msra.mxu1 %v706_v16  ;;  %1396 = vmatprep.mubr.f32.mxu1 %v9643_v10  ;;  %v6857_v16 = vsel %vm302_vm1, %v6835_v48, %v316_v25  ;;  %v319_v25 = vrot.slane %v6436_v9, 7 }
  0x78   : > { %1394 = vmatprep.subr.mxu1 %v9643_v10  ;;  %5698 = vmatprep.subr.mxu0 %v732_v22 }
  0x79   : > { %1395 = vmatpush2.msra.mxu1 %v705_v21  ;;  %5055 = vmatmul.mubr.msk.f32.gmra.mxu0 %vm6590_vm2, %v6835_v48  ;;  %v6867_v21 = vrot.slane %v6433_v8, 7 }
  0x7a   : > { %1397 = vmatmul.mubr.f32.vlgmr.msra.gmra.mxu1 %v9643_v10  ;;  %5699 = vmatpush3.msra.mxu0 %v732_v22  ;;  %v730_v22 = vld [vmem:[%s9500_s1 + $0x148] sm:$0xff] }
  0x7b   : > { %991 = vmatprep.mubr.f32.mxu0 %v6403_v63  ;;  %1401 = vmatprep.mubr.f32.mxu1 %v9643_v10 }
  0x7c   : > { %5700 = vmatprep.subr.mxu0 %v731_v52  ;;  %1928 = vmatprep.subr.mxu1 %v9643_v10 }
  0x7d   : > { %992 = vmatmul.mubr.f32.gmra.mxu0 %v6857_v16  ;;  %1929 = vmatpush1.msra.mxu1 %v4911_v24  ;;  %v729_v24 = vld [vmem:[%s9500_s1 + $0x140] sm:$0xff] }
  0x7e   : > { %1402 = vmatmul.mubr.f32.gmra.mxu1 %v9643_v10  ;;  %996 = vmatprep.mubr.f32.mxu0 %v6433_v8 }
  0x7f   : > { %1406 = vmatprep.mubr.f32.mxu1 %v6281_v27  ;;  %5701 = vmatpush3.msra.mxu0 %v731_v52  ;;  %v6892_v27 = vsel %vm302_vm1, %v6867_v21, %v319_v25  ;;  %v4909_v52 = vld [vmem:[%s9500_s1 + $0x368] sm:$0xff]  ;;  %v4907_v25 = vld [vmem:[%s9500_s1 + $0x358] sm:$0xff] }
  0x80   : > { %5702 = vmatprep.subr.mxu0 %v730_v22  ;;  %1930 = vmatprep.subr.mxu1 %v9643_v10 }
  0x81   : > { %5057 = vmatmul.mubr.msk.f32.gmra.mxu0 %vm6590_vm2, %v6867_v21  ;;  %1931 = vmatpush1.msra.mxu1 %v4910_v7  ;;  %v728_v7 = vld [vmem:[%s9500_s1 + $0x138] sm:$0xff] }
  0x82   : > { %5095 = vmatmul.mubr.msk.f32.gmra.mxu1 %vm6590_vm2, %v6585_v4  ;;  %1001 = vmatprep.mubr.f32.mxu0 %v6436_v9  ;;  %v6901_v4 = vrot.slane %v6466_v17, 7 }
  0x83   : > { %1411 = vmatprep.mubr.f32.mxu1 %v6284_v28  ;;  %5703 = vmatpush3.msra.mxu0 %v730_v22  ;;  %v322_v28 = vrot.slane %v6469_v18, 7  ;;  %v4908_v22 = vld [vmem:[%s9500_s1 + $0x360] sm:$0xff] }
  0x84   : > { %5704 = vmatprep.subr.mxu0 %v729_v24  ;;  %1932 = vmatprep.subr.mxu1 %v9643_v10 }
  0x85   : > { %1002 = vmatmul.mubr.f32.gmra.mxu0 %v6892_v27  ;;  %1933 = vmatpush1.msra.mxu1 %v4909_v52  ;;  %v726_v52 = vld [vmem:[%s9500_s1 + $0x128] sm:$0xff] }
  0x86   : > { %1412 = vmatmul.mubr.f32.gmra.mxu1 %v6632_v30  ;;  %1006 = vmatprep.mubr.f32.mxu0 %v6466_v17  ;;  %v727_v30 = vld [vmem:[%s9500_s1 + $0x130] sm:$0xff] }
  0x87   : > { %1416 = vmatprep.mubr.f32.mxu1 %v6305_v35  ;;  %5705 = vmatpush3.msra.mxu0 %v729_v24  ;;  %v6926_v35 = vsel %vm302_vm1, %v6901_v4, %v322_v28  ;;  %v6935_v24 = vrot.slane %v6499_v26, 7  ;;  %v725_v28 = vld [vmem:[%s9500_s1 + $0x120] sm:$0xff] }
  0x88   : > { %5706 = vmatprep.subr.mxu0 %v728_v7  ;;  %1934 = vmatprep.subr.mxu1 %v9643_v10 }
  0x89   : > { %5059 = vmatmul.mubr.msk.f32.gmra.mxu0 %vm6590_vm2, %v6901_v4  ;;  %1935 = vmatpush1.msra.mxu1 %v4908_v22  ;;  %v4905_v22 = vld [vmem:[%s9500_s1 + $0x348] sm:$0xff] }
  0x8a   : > { %5097 = vmatmul.mubr.msk.f32.gmra.mxu1 %vm6590_vm2, %v6654_v46  ;;  %1011 = vmatprep.mubr.f32.mxu0 %v6469_v18 }
  0x8b   : > { %1421 = vmatprep.mubr.f32.mxu1 %v6308_v36  ;;  %5707 = vmatpush3.msra.mxu0 %v728_v7  ;;  %v325_v36 = vrot.slane %v6502_v29, 7  ;;  %v4906_v7 = vld [vmem:[%s9500_s1 + $0x350] sm:$0xff] }
  0x8c   : > { %5708 = vmatprep.subr.mxu0 %v727_v30  ;;  %1936 = vmatprep.subr.mxu1 %v9643_v10 }
  0x8d   : > { %1012 = vmatmul.mubr.f32.gmra.mxu0 %v6926_v35  ;;  %1937 = vmatpush1.msra.mxu1 %v4907_v25  ;;  %v724_v25 = vld [vmem:[%s9500_s1 + $0x118] sm:$0xff] }
  0x8e   : > { %1422 = vmatmul.mubr.f32.gmra.mxu1 %v6699_v38  ;;  %1016 = vmatprep.mubr.f32.mxu0 %v6499_v26 }
  0x8f   : > { %1426 = vmatprep.mubr.f32.mxu1 %v6333_v44  ;;  %5709 = vmatpush3.msra.mxu0 %v727_v30  ;;  %v6960_v44 = vsel %vm302_vm1, %v6935_v24, %v325_v36  ;;  %v6969_v30 = vrot.slane %v6533_v42, 7  ;;  %v4903_v36 = vld [vmem:[%s9500_s1 + $0x338] sm:$0xff] }
  0x90   : > { %5710 = vmatprep.subr.mxu0 %v726_v52  ;;  %1938 = vmatprep.subr.mxu1 %v9643_v10 }
  0x91   : > { %5061 = vmatmul.mubr.msk.f32.gmra.mxu0 %vm6590_vm2, %v6935_v24  ;;  %1939 = vmatpush1.msra.mxu1 %v4906_v7  ;;  %v4902_v7 = vld [vmem:[%s9500_s1 + $0x330] sm:$0xff] }
  0x92   : > { %5099 = vmatmul.mubr.msk.f32.gmra.mxu1 %vm6590_vm2, %v6721_v15  ;;  %1021 = vmatprep.mubr.f32.mxu0 %v6502_v29 }
  0x93   : > { %1431 = vmatprep.mubr.f32.mxu1 %v6336_v45  ;;  %5711 = vmatpush3.msra.mxu0 %v726_v52  ;;  %v328_v45 = vrot.slane %v6536_v43, 7  ;;  %v4904_v52 = vld [vmem:[%s9500_s1 + $0x340] sm:$0xff] }
  0x94   : > { %1940 = vmatprep.subr.mxu1 %v9643_v10  ;;  %5712 = vmatprep.subr.mxu0 %v725_v28 }
  0x95   : > { %1022 = vmatmul.mubr.f32.gmra.mxu0 %v6960_v44  ;;  %1941 = vmatpush1.msra.mxu1 %v4905_v22  ;;  %v723_v22 = vld [vmem:[%s9500_s1 + $0x110] sm:$0xff] }
  0x96   : > { %1432 = vmatmul.mubr.f32.gmra.mxu1 %v6766_v0  ;;  %1026 = vmatprep.mubr.f32.mxu0 %v6533_v42 }
  0x97   : > { %1436 = vmatprep.mubr.f32.mxu1 %v6367_v53  ;;  %5713 = vmatpush3.msra.mxu0 %v725_v28  ;;  %v6994_v53 = vsel %vm302_vm1, %v6969_v30, %v328_v45  ;;  %v7003_v28 = vrot.slane %v6566_v58, 7  ;;  %v722_v45 = vld [vmem:[%s9500_s1 + $0x108] sm:$0xff] }
  0x98   : > { %1942 = vmatprep.subr.mxu1 %v9643_v10  ;;  %5714 = vmatprep.subr.mxu0 %v724_v25 }
  0x99   : > { %5063 = vmatmul.mubr.msk.f32.gmra.mxu0 %vm6590_vm2, %v6969_v30  ;;  %1943 = vmatpush1.msra.mxu1 %v4904_v52  ;;  %v4900_v52 = vld [vmem:[%s9500_s1 + $0x320] sm:$0xff] }
  0x9a   : > { %5101 = vmatmul.mubr.msk.f32.gmra.mxu1 %vm6590_vm2, %v6788_v3  ;;  %1031 = vmatprep.mubr.f32.mxu0 %v6536_v43 }
  0x9b   : > { %1441 = vmatprep.mubr.f32.mxu1 %v6370_v54  ;;  %1944 = vmatprep.subr.mxu1 %v9643_v10  ;;  %v331_v54 = vrot.slane %v6569_v60, 7 }
  0x9c   : > { %1945 = vmatpush1.msra.mxu1 %v4903_v36  ;;  %5715 = vmatpush3.msra.mxu0 %v724_v25  ;;  %v4901_v25 = vld [vmem:[%s9500_s1 + $0x328] sm:$0xff]  ;;  %v7038_v36 = vrot.slane %v6599_v12, 7 }
  0x9d   : > { %1032 = vmatmul.mubr.f32.gmra.mxu0 %v6994_v53  ;;  %1946 = vmatprep.subr.mxu1 %v9643_v10 }
  0x9e   : > { %1442 = vmatmul.mubr.f32.gmra.mxu1 %v6823_v49  ;;  %1036 = vmatprep.mubr.f32.mxu0 %v6566_v58 }
  0x9f   : > { %1446 = vmatprep.mubr.f32.mxu1 %v6400_v62  ;;  %1947 = vmatpush1.msra.mxu1 %v4902_v7  ;;  %v7029_v62 = vsel %vm302_vm1, %v7003_v28, %v331_v54  ;;  %v4899_v7 = vld [vmem:[%s9500_s1 + $0x318] sm:$0xff]  ;;  %v721_v54 = vld [vmem:[%s9500_s1 + $0x100] sm:$0xff] }
  0xa0   : > { %1948 = vmatprep.subr.mxu1 %v9643_v10  ;;  %5716 = vmatprep.subr.mxu0 %v723_v22 }
  0xa1   : > { %5065 = vmatmul.mubr.msk.f32.gmra.mxu0 %vm6590_vm2, %v7003_v28  ;;  %1949 = vmatpush1.msra.mxu1 %v4901_v25  ;;  %v4897_v25 = vld [vmem:[%s9500_s1 + $0x308] sm:$0xff] }
  0xa2   : > { %5103 = vmatmul.mubr.msk.f32.gmra.mxu1 %vm6590_vm2, %v6835_v48  ;;  %1041 = vmatprep.mubr.f32.mxu0 %v6569_v60 }
  0xa3   : > { %1451 = vmatprep.mubr.f32.mxu1 %v6403_v63  ;;  %5717 = vmatpush3.msra.mxu0 %v723_v22  ;;  %v334_v63 = vrot.slane %v6602_v13, 7  ;;  %v4898_v22 = vld [vmem:[%s9500_s1 + $0x310] sm:$0xff] }
  0xa4   : > { %1950 = vmatprep.subr.mxu1 %v9643_v10  ;;  %5718 = vmatprep.subr.mxu0 %v722_v45 }
  0xa5   : > { %1042 = vmatmul.mubr.f32.gmra.mxu0 %v7029_v62  ;;  %1951 = vmatpush1.msra.mxu1 %v4900_v52  ;;  %v7078_v52 = vld [vmem:[%s9500_s1 + $0x478] sm:$0xff] }
  0xa6   : > { %1452 = vmatmul.mubr.f32.gmra.mxu1 %v6857_v16  ;;  %1046 = vmatprep.mubr.f32.mxu0 %v6599_v12 }
  0xa7   : > { %1456 = vmatprep.mubr.f32.mxu1 %v6433_v8  ;;  %1952 = vmatprep.subr.mxu1 %v9643_v10  ;;  %v7064_v8 = vsel %vm302_vm1, %v7038_v36, %v334_v63  ;;  %v4927_v63 = vld [vmem:[%s9500_s1 + $0x3f8] sm:$0xff] }
  0xa8   : > { %1953 = vmatpush1.msra.mxu1 %v4899_v7  ;;  %5719 = vmatpush3.msra.mxu0 %v722_v45  ;;  %v7073_v45 = vrot.slane %v6637_v32, 7  ;;  %v4896_v7 = vld [vmem:[%s9500_s1 + $0x300] sm:$0xff] }
  0xa9   : > { %5067 = vmatmul.mubr.msk.f32.gmra.mxu0 %vm6590_vm2, %v7038_v36  ;;  %1954 = vmatprep.subr.mxu1 %v9643_v10 }
  0xaa   : > { %5105 = vmatmul.mubr.msk.f32.gmra.mxu1 %vm6590_vm2, %v6867_v21  ;;  %1051 = vmatprep.mubr.f32.mxu0 %v6602_v13 }
  0xab   : > { %1461 = vmatprep.mubr.f32.mxu1 %v6436_v9  ;;  %1955 = vmatpush1.msra.mxu1 %v4898_v22  ;;  %v337_v9 = vrot.slane %v6640_v34, 7  ;;  %v4926_v22 = vld [vmem:[%s9500_s1 + $0x3f0] sm:$0xff] }
  0xac   : > { %1956 = vmatprep.subr.mxu1 %v9643_v10  ;;  %5720 = vmatprep.subr.mxu0 %v721_v54 }
  0xad   : > { %1052 = vmatmul.mubr.f32.gmra.mxu0 %v7064_v8  ;;  %1957 = vmatpush1.msra.mxu1 %v4897_v25  ;;  %v4925_v25 = vld [vmem:[%s9500_s1 + $0x3e8] sm:$0xff] }
  0xae   : > { %1462 = vmatmul.mubr.f32.gmra.mxu1 %v6892_v27  ;;  %1056 = vmatprep.mubr.f32.mxu0 %v6637_v32 }
  0xaf   : > { %1466 = vmatprep.mubr.f32.mxu1 %v6466_v17  ;;  %5721 = vmatpush3.msra.mxu0 %v721_v54  ;;  %v7101_v17 = vsel %vm302_vm1, %v7073_v45, %v337_v9  ;;  %v7110_v54 = vrot.slane %v6669_v61, 7  ;;  %v4924_v9 = vld [vmem:[%s9500_s1 + $0x3e0] sm:$0xff] }
  0xb0   : > { %1958 = vmatprep.subr.mxu1 %v9643_v10  ;;  %5770 = vmatprep.subr.mxu0 %v7078_v52  ;;  %9649 = vst [vmem:[#allocation21_spill] sm:$0xff] %v7101_v17 }
  0xb1   : > { %5069 = vmatmul.mubr.msk.f32.gmra.mxu0 %vm6590_vm2, %v7073_v45  ;;  %1959 = vmatpush1.msra.mxu1 %v4896_v7  ;;  %9650 = vst [vmem:[#allocation22_spill] sm:$0xff] %v7110_v54  ;;  %v4923_v7 = vld [vmem:[%s9500_s1 + $0x3d8] sm:$0xff] }
  0xb2   : > { %5107 = vmatmul.mubr.msk.f32.gmra.mxu1 %vm6590_vm2, %v6901_v4  ;;  %1061 = vmatprep.mubr.f32.mxu0 %v6640_v34 }
  0xb3   : > { %1471 = vmatprep.mubr.f32.mxu1 %v6469_v18  ;;  %1960 = vmatprep.subr.mxu1 %v9643_v10  ;;  %v340_v18 = vrot.slane %v6672_v2, 7 }
  0xb4   : > { %1961 = vmatpush2.msra.mxu1 %v4927_v63  ;;  %v7142_v63 = vrot.slane %v6704_v51, 7 }
  0xb5   : > { %1062 = vmatmul.mubr.f32.gmra.mxu0 %v7101_v17  ;;  %1962 = vmatprep.subr.mxu1 %v9643_v10 }
  0xb6   : > { %1472 = vmatmul.mubr.f32.gmra.mxu1 %v6926_v35  ;;  %1066 = vmatprep.mubr.f32.mxu0 %v6669_v61  ;;  %9652 = vst [vmem:[#allocation24_spill] sm:$0xff] %v7142_v63 }
  0xb7   : > { %1476 = vmatprep.mubr.f32.mxu1 %v6499_v26  ;;  %1963 = vmatpush2.msra.mxu1 %v4926_v22  ;;  %v7133_v26 = vsel %vm302_vm1, %v7110_v54, %v340_v18  ;;  %v4922_v22 = vld [vmem:[%s9500_s1 + $0x3d0] sm:$0xff]  ;;  %v4921_v18 = vld [vmem:[%s9500_s1 + $0x3c8] sm:$0xff] }
  0xb8   : > { %1964 = vmatprep.subr.mxu1 %v9643_v10  ;;  %9651 = vst [vmem:[#allocation23_spill] sm:$0xff] %v7133_v26 }
  0xb9   : > { %5071 = vmatmul.mubr.msk.f32.gmra.mxu0 %vm6590_vm2, %v7110_v54  ;;  %1965 = vmatpush2.msra.mxu1 %v4925_v25  ;;  %v4920_v25 = vld [vmem:[%s9500_s1 + $0x3c0] sm:$0xff] }
  0xba   : > { %5109 = vmatmul.mubr.msk.f32.gmra.mxu1 %vm6590_vm2, %v6935_v24  ;;  %1071 = vmatprep.mubr.f32.mxu0 %v6672_v2 }
  0xbb   : > { %1481 = vmatprep.mubr.f32.mxu1 %v6502_v29  ;;  %1966 = vmatprep.subr.mxu1 %v9643_v10  ;;  %v343_v29 = vrot.slane %v6707_v55, 7 }
  0xbc   : > { %1967 = vmatpush2.msra.mxu1 %v4924_v9  ;;  %v7174_v9 = vrot.slane %v6736_v57, 7 }
  0xbd   : > { %1072 = vmatmul.mubr.f32.gmra.mxu0 %v7133_v26  ;;  %1968 = vmatprep.subr.mxu1 %v9643_v10 }
  0xbe   : > { %1482 = vmatmul.mubr.f32.gmra.mxu1 %v6960_v44  ;;  %1076 = vmatprep.mubr.f32.mxu0 %v6704_v51  ;;  %9654 = vst [vmem:[#allocation26_spill] sm:$0xff] %v7174_v9 }
  0xbf   : > { %1486 = vmatprep.mubr.f32.mxu1 %v6533_v42  ;;  %1969 = vmatpush2.msra.mxu1 %v4923_v7  ;;  %v7165_v42 = vsel %vm302_vm1, %v7142_v63, %v343_v29  ;;  %v4919_v7 = vld [vmem:[%s9500_s1 + $0x3b8] sm:$0xff]  ;;  %v4918_v29 = vld [vmem:[%s9500_s1 + $0x3b0] sm:$0xff] }
  0xc0   : > { %1970 = vmatprep.subr.mxu1 %v9643_v10  ;;  %9653 = vst [vmem:[#allocation25_spill] sm:$0xff] %v7165_v42 }
  0xc1   : > { %5073 = vmatmul.mubr.msk.f32.gmra.mxu0 %vm6590_vm2, %v7142_v63  ;;  %1971 = vmatpush2.msra.mxu1 %v4922_v22  ;;  %v4917_v22 = vld [vmem:[%s9500_s1 + $0x3a8] sm:$0xff] }
  0xc2   : > { %5111 = vmatmul.mubr.msk.f32.gmra.mxu1 %vm6590_vm2, %v6969_v30  ;;  %1081 = vmatprep.mubr.f32.mxu0 %v6707_v55 }
  0xc3   : > { %1491 = vmatprep.mubr.f32.mxu1 %v6536_v43  ;;  %1972 = vmatprep.subr.mxu1 %v9643_v10  ;;  %v346_v43 = vrot.slane %v6739_v40, 7 }
  0xc4   : > { %1973 = vmatpush2.msra.mxu1 %v4921_v18  ;;  %v7206_v18 = vrot.slane %v6771_v19, 7 }
  0xc5   : > { %1082 = vmatmul.mubr.f32.gmra.mxu0 %v7165_v42  ;;  %1974 = vmatprep.subr.mxu1 %v9643_v10 }
  0xc6   : > { %1492 = vmatmul.mubr.f32.gmra.mxu1 %v6994_v53  ;;  %1086 = vmatprep.mubr.f32.mxu0 %v6736_v57  ;;  %9656 = vst [vmem:[#allocation28_spill] sm:$0xff] %v7206_v18 }
  0xc7   : > { %1496 = vmatprep.mubr.f32.mxu1 %v6566_v58  ;;  %1975 = vmatpush2.msra.mxu1 %v4920_v25  ;;  %v7197_v58 = vsel %vm302_vm1, %v7174_v9, %v346_v43  ;;  %v4916_v25 = vld [vmem:[%s9500_s1 + $0x3a0] sm:$0xff]  ;;  %v4914_v43 = vld [vmem:[%s9500_s1 + $0x390] sm:$0xff] }
  0xc8   : > { %1976 = vmatprep.subr.mxu1 %v9643_v10  ;;  %9655 = vst [vmem:[#allocation27_spill] sm:$0xff] %v7197_v58 }
  0xc9   : > { %5075 = vmatmul.mubr.msk.f32.gmra.mxu0 %vm6590_vm2, %v7174_v9  ;;  %1977 = vmatpush2.msra.mxu1 %v4919_v7  ;;  %v4941_v7 = vld [vmem:[%s9500_s1 + $0x468] sm:$0xff] }
  0xca   : > { %5113 = vmatmul.mubr.msk.f32.gmra.mxu1 %vm6590_vm2, %v7003_v28  ;;  %1091 = vmatprep.mubr.f32.mxu0 %v6739_v40 }
  0xcb   : > { %1501 = vmatprep.mubr.f32.mxu1 %v6569_v60  ;;  %1978 = vmatprep.subr.mxu1 %v9643_v10  ;;  %v349_v60 = vrot.slane %v6774_v37, 7 }
  0xcc   : > { %1979 = vmatpush2.msra.mxu1 %v4918_v29  ;;  %v4935_v29 = vld [vmem:[%s9500_s1 + $0x438] sm:$0xff] }
  0xcd   : > { %1092 = vmatmul.mubr.f32.gmra.mxu0 %v7197_v58  ;;  %1980 = vmatprep.subr.mxu1 %v9643_v10 }
  0xce   : > { %1502 = vmatmul.mubr.f32.gmra.mxu1 %v7029_v62  ;;  %1096 = vmatprep.mubr.f32.mxu0 %v6771_v19  ;;  %v4915_v19 = vld [vmem:[%s9500_s1 + $0x398] sm:$0xff] }
  0xcf   : > { %1506 = vmatprep.mubr.f32.mxu1 %v6599_v12  ;;  %1981 = vmatpush2.msra.mxu1 %v4917_v22  ;;  %v7229_v12 = vsel %vm302_vm1, %v7206_v18, %v349_v60  ;;  %v9658_v22 = vld [vmem:[#allocation4_spill] sm:$0xff]  ;;  %v6099_v60 = vld [vmem:[%s6267_s23 + $0x10] sm:$0xff] }
  0xd0   : > { %1982 = vmatprep.subr.mxu1 %v9643_v10  ;;  %9657 = vst [vmem:[#allocation29_spill] sm:$0xff] %v7229_v12 }
  0xd1   : > { %5077 = vmatmul.mubr.msk.f32.gmra.mxu0 %vm6590_vm2, %v7206_v18  ;;  %1983 = vmatpush2.msra.mxu1 %v4916_v25  ;;  %v9659_v25 = vld [vmem:[#allocation3_spill] sm:$0xff] }
  0xd2   : > { %5115 = vmatmul.mubr.msk.f32.gmra.mxu1 %vm6590_vm2, %v7038_v36  ;;  %1101 = vmatprep.mubr.f32.mxu0 %v6774_v37  ;;  %v4913_v37 = vld [vmem:[%s9500_s1 + $0x388] sm:$0xff]  ;;  %v9667_v18 = vld [vmem:[#allocation11_spill] sm:$0xff] }
  0xd3   : > { %1511 = vmatprep.mubr.f32.mxu1 %v6602_v13  ;;  %1984 = vmatprep.subr.mxu1 %v9643_v10  ;;  %v4942_v13 = vld [vmem:[%s9500_s1 + $0x470] sm:$0xff] }
  0xd4   : > { %1985 = vmatpush2.msra.mxu1 %v4915_v19  ;;  %v4934_v19 = vld [vmem:[%s9500_s1 + $0x430] sm:$0xff] }
  0xd5   : > { %1102 = vmatmul.mubr.f32.gmra.mxu0 %v7229_v12  ;;  %1986 = vmatprep.subr.mxu1 %v9643_v10  ;;  %v6103_v12 = vld [vmem:[%s6267_s23 + $0x30] sm:$0xff] }
  0xd6   : > { %1512 = vmatmul.mubr.f32.gmra.mxu1 %v7064_v8  ;;  %5722 = vmatprep.mubr.f32.mxu0 %v9643_v10 }
  0xd7   : > { %1516 = vmatprep.mubr.f32.mxu1 %v6637_v32  ;;  %1987 = vmatpush2.msra.mxu1 %v4914_v43  ;;  %v4912_v32 = vld [vmem:[%s9500_s1 + $0x380] sm:$0xff] }
  0xd8   : > { %1988 = vmatprep.subr.mxu1 %v9643_v10 }
  0xd9   : > { %5723 = vmatmul.mubr.f32.vlgmr.msra.gmra.mxu0 %v9643_v10  ;;  %1989 = vmatpush2.msra.mxu1 %v4913_v37  ;;  %v9660_v37 = vld [vmem:[#allocation6_spill] sm:$0xff] }
  0xda   : > { %5117 = vmatmul.mubr.msk.f32.gmra.mxu1 %vm6590_vm2, %v7073_v45  ;;  %5771 = vmatpush3.msra.mxu0 %v7078_v52 }
  0xdb   : > { %1521 = vmatprep.mubr.f32.mxu1 %v6640_v34  ;;  %5725 = vmatprep.mubr.f32.mxu0 %v6319_v39  ;;  %v4939_v39 = vld [vmem:[%s9500_s1 + $0x458] sm:$0xff]  ;;  %v4938_v34 = vld [vmem:[%s9500_s1 + $0x450] sm:$0xff] }
  0xdc   : > { %5772 = vmatprep.subr.mxu0 %v4942_v13  ;;  %1990 = vmatprep.subr.mxu1 %v9643_v10 }
  0xdd   : > { %5726 = vmatmul.mubr.msk.f32.gmra.mxu0 %vm464_vm0, %v6298_v33  ;;  %1991 = vmatpush2.msra.mxu1 %v4912_v32  ;;  %v4940_v33 = vld [vmem:[%s9500_s1 + $0x460] sm:$0xff] }
  0xde   : > { %1522 = vmatmul.mubr.f32.gmra.mxu1 %v7101_v17  ;;  %5773 = vmatpush3.msra.mxu0 %v4942_v13  ;;  %v6100_v13 = vld [vmem:[%s6267_s23 + $0x18] sm:$0xff] }
  0xdf   : > { %1526 = vmatprep.mubr.f32.mxu1 %v6669_v61  ;;  %5728 = vmatprep.mubr.f32.mxu0 %v6348_v47  ;;  %v4937_v61 = vld [vmem:[%s9500_s1 + $0x448] sm:$0xff] }
  0xe0   : > { %5774 = vmatprep.subr.mxu0 %v4941_v7 }
  0xe1   : > { %5729 = vmatmul.mubr.msk.f32.gmra.mxu0 %vm464_vm0, %v6323_v41 }
  0xe2   : > { %5119 = vmatmul.mubr.msk.f32.gmra.mxu1 %vm6590_vm2, %v7110_v54  ;;  %5775 = vmatpush3.msra.mxu0 %v4941_v7  ;;  %v9661_v7 = vld [vmem:[#allocation5_spill] sm:$0xff] }
  0xe3   : > { %1531 = vmatprep.mubr.f32.mxu1 %v6672_v2  ;;  %5731 = vmatprep.mubr.f32.mxu0 %v6381_v56 }
  0xe4   : > { %5776 = vmatprep.subr.mxu0 %v4940_v33 }
  0xe5   : > { %5732 = vmatmul.mubr.msk.f32.gmra.mxu0 %vm464_vm0, %v6355_v50 }
  0xe6   : > { %1532 = vmatmul.mubr.f32.gmra.mxu1 %v7133_v26  ;;  %5777 = vmatpush3.msra.mxu0 %v4940_v33  ;;  %v4933_v33 = vld [vmem:[%s9500_s1 + $0x428] sm:$0xff]  ;;  %v4928_v26 = vld [vmem:[%s9500_s1 + $0x400] sm:$0xff] }
  0xe7   : > { %1536 = vmatprep.mubr.f32.mxu1 %v6704_v51  ;;  %5734 = vmatprep.mubr.f32.mxu0 %v6414_v1 }
  0xe8   : > { %5778 = vmatprep.subr.mxu0 %v4939_v39 }
  0xe9   : > { %5735 = vmatmul.mubr.msk.f32.gmra.mxu0 %vm464_vm0, %v6388_v59 }
  0xea   : > { %5121 = vmatmul.mubr.msk.f32.gmra.mxu1 %vm6590_vm2, %v7142_v63  ;;  %5779 = vmatpush3.msra.mxu0 %v4939_v39  ;;  %v9662_v39 = vld [vmem:[#allocation9_spill] sm:$0xff] }
  0xeb   : > { %1541 = vmatprep.mubr.f32.mxu1 %v6707_v55  ;;  %5737 = vmatprep.mubr.f32.mxu0 %v6447_v11  ;;  %v4936_v55 = vld [vmem:[%s9500_s1 + $0x440] sm:$0xff] }
  0xec   : > { %5780 = vmatprep.subr.mxu0 %v4938_v34 }
  0xed   : > { %5738 = vmatmul.mubr.msk.f32.gmra.mxu0 %vm464_vm0, %v6421_v5  ;;  %v7300_v2 = vpop.f32.mrf.mxu1 }
  0xee   : > { %1542 = vmatmul.mubr.f32.gmra.mxu1 %v7165_v42  ;;  %5781 = vmatpush3.msra.mxu0 %v4938_v34  ;;  %v6101_v34 = vld [vmem:[%s6267_s23 + $0x20] sm:$0xff]  ;;  %v4929_v42 = vld [vmem:[%s9500_s1 + $0x408] sm:$0xff] }
  0xef   : > { %1546 = vmatprep.mubr.f32.mxu1 %v6736_v57  ;;  %5740 = vmatprep.mubr.f32.mxu0 %v6480_v20  ;;  %v7305_v51 = vpop.f32.mrf.mxu1 }
  0xf0   : > { %5782 = vmatprep.subr.mxu0 %v4937_v61 }
  0xf1   : > { %5741 = vmatmul.mubr.msk.f32.gmra.mxu0 %vm464_vm0, %v6454_v14 }
  0xf2   : > { %5123 = vmatmul.mubr.msk.f32.gmra.mxu1 %vm6590_vm2, %v7174_v9  ;;  %5783 = vmatpush3.msra.mxu0 %v4937_v61  ;;  %v7315_v52 = vpop.f32.mrf.mxu1  ;;  %v9663_v61 = vld [vmem:[#allocation7_spill] sm:$0xff]  ;;  %v9670_v9 = vld [vmem:[#allocation12_spill] sm:$0xff] }
  0xf3   : > { %1551 = vmatprep.mubr.f32.mxu1 %v6739_v40  ;;  %5743 = vmatprep.mubr.f32.mxu0 %v6513_v31 }
  0xf4   : > { %5784 = vmatprep.subr.mxu0 %v4936_v55  ;;  %v7319_v57 = vpop.f32.mrf.mxu1 }
  0xf5   : > { %5744 = vmatmul.mubr.msk.f32.gmra.mxu0 %vm464_vm0, %v6487_v23 }
  0xf6   : > { %1552 = vmatmul.mubr.f32.gmra.mxu1 %v7197_v58  ;;  %5785 = vmatpush3.msra.mxu0 %v4936_v55  ;;  %v4932_v55 = vld [vmem:[%s9500_s1 + $0x420] sm:$0xff]  ;;  %v4930_v58 = vld [vmem:[%s9500_s1 + $0x410] sm:$0xff] }
  0xf7   : > { %5746 = vmatprep.mubr.f32.mxu0 %v9658_v22  ;;  %1992 = vmatprep.mubr.f32.mxu1 %v6099_v60  ;;  %v7329_v40 = vpop.f32.mrf.mxu1  ;;  %v6102_v60 = vld [vmem:[%s6267_s23 + $0x28] sm:$0xff] }
  0xf8   : > { %5786 = vmatprep.subr.mxu0 %v4935_v29 }
  0xf9   : > { %5747 = vmatmul.mubr.msk.f32.gmra.mxu0 %vm464_vm0, %v9659_v25  ;;  %v7336_v43 = vpop.f32.mrf.mxu1 }
  0xfa   : > { %5140 = vmatmul.mubr.msk.f32.vlgmr.msra.gmra.mxu1 %vm6590_vm2, %v6654_v46  ;;  %5787 = vmatpush3.msra.mxu0 %v4935_v29 }
  0xfb   : > { %5749 = vmatprep.mubr.f32.mxu0 %v9660_v37  ;;  %1997 = vmatprep.mubr.f32.mxu1 %v6100_v13  ;;  %v9665_v13 = vld [vmem:[#allocation8_spill] sm:$0xff] }
  0xfc   : > { %5788 = vmatprep.subr.mxu0 %v4934_v19  ;;  %v7343_v32 = vpop.f32.mrf.mxu1 }
  0xfd   : > { %5750 = vmatmul.mubr.msk.f32.gmra.mxu0 %vm464_vm0, %v9661_v7 }
  0xfe   : > { %1998 = vmatmul.mubr.f32.gmra.mxu1 %v6699_v38  ;;  %5789 = vmatpush3.msra.mxu0 %v4934_v19  ;;  %v7351_v46 = vpop.f32.mrf.mxu1  ;;  %v9664_v38 = vld [vmem:[#allocation10_spill] sm:$0xff] }
  0xff   : > { %5752 = vmatprep.mubr.f32.mxu0 %v9662_v39  ;;  %2002 = vmatprep.mubr.f32.mxu1 %v6101_v34  ;;  %v4931_v34 = vld [vmem:[%s9500_s1 + $0x418] sm:$0xff] }
 0x100   : > { %5790 = vmatprep.subr.mxu0 %v4933_v33 }
 0x101   : > { %5753 = vmatmul.mubr.msk.f32.gmra.mxu0 %vm464_vm0, %v9663_v61  ;;  %v7360_v29 = vpop.f32.mrf.mxu1 }
 0x102   : > { %5142 = vmatmul.mubr.msk.f32.gmra.mxu1 %vm6590_vm2, %v6721_v15  ;;  %5791 = vmatpush3.msra.mxu0 %v4933_v33  ;;  %v9666_v33 = vld [vmem:[#allocation13_spill] sm:$0xff] }
 0x103   : > { %5755 = vmatprep.mubr.f32.mxu0 %v9664_v38  ;;  %2007 = vmatprep.mubr.f32.mxu1 %v6102_v60  ;;  %v7367_v19 = vpop.f32.mrf.mxu1 }
 0x104   : > { %5792 = vmatprep.subr.mxu0 %v4932_v55 }
 0x105   : > { %5756 = vmatmul.mubr.msk.f32.gmra.mxu0 %vm464_vm0, %v9665_v13 }
 0x106   : > { %2008 = vmatmul.mubr.f32.gmra.mxu1 %v6766_v0  ;;  %5793 = vmatpush3.msra.mxu0 %v4932_v55  ;;  %v7375_v15 = vpop.f32.mrf.mxu1  ;;  %v9668_v0 = vld [vmem:[#allocation14_spill] sm:$0xff] }
 0x107   : > { %5758 = vmatprep.mubr.f32.mxu0 %v9666_v33  ;;  %2012 = vmatprep.mubr.f32.mxu1 %v6103_v12  ;;  %v6104_v55 = vld [vmem:[%s6267_s23 + $0x38] sm:$0xff] }
 0x108   : > { %5794 = vmatprep.subr.mxu0 %v4931_v34  ;;  %v7379_v60 = vpop.f32.mrf.mxu1 }
 0x109   : > { %5759 = vmatmul.mubr.msk.f32.gmra.mxu0 %vm464_vm0, %v9667_v18 }
 0x10a   : > { %5144 = vmatmul.mubr.msk.f32.gmra.mxu1 %vm6590_vm2, %v6788_v3  ;;  %5795 = vmatpush3.msra.mxu0 %v4931_v34  ;;  %v9671_v3 = vld [vmem:[#allocation17_spill] sm:$0xff]  ;;  %v6105_v34 = vld [vmem:[%s6267_s23 + $0x40] sm:$0xff] }
 0x10b   : > { %5761 = vmatprep.mubr.f32.mxu0 %v9668_v0  ;;  %2017 = vmatprep.mubr.f32.mxu1 %v6104_v55  ;;  %v7391_v12 = vpop.f32.mrf.mxu1 }
 0x10c   : > { %9669 = vst [vmem:[#allocation4_spill] sm:$0xff] %v7391_v12  ;;  %5796 = vmatprep.subr.mxu0 %v4930_v58  ;;  %v9673_v12 = vld [vmem:[#allocation15_spill] sm:$0xff] }
 0x10d   : > { %5762 = vmatmul.mubr.msk.f32.gmra.mxu0 %vm464_vm0, %v9670_v9  ;;  %v7398_v63 = vpop.f32.mrf.mxu1 }
 0x10e   : > { %2018 = vmatmul.mubr.f32.gmra.mxu1 %v6823_v49  ;;  %5797 = vmatpush3.msra.mxu0 %v4930_v58  ;;  %v9675_v58 = vld [vmem:[#allocation18_spill] sm:$0xff] }
 0x10f   : > { %5764 = vmatprep.mubr.f32.mxu0 %v9671_v3  ;;  %2022 = vmatprep.mubr.f32.mxu1 %v6105_v34  ;;  %v6106_v34 = vld [vmem:[%s6267_s23 + $0x48] sm:$0xff] }
 0x110   : > { %5798 = vmatprep.subr.mxu0 %v4929_v42  ;;  %v7403_v55 = vpop.f32.mrf.mxu1 }
 0x111   : > { %9672 = vst [vmem:[#allocation3_spill] sm:$0xff] %v7403_v55  ;;  %5765 = vmatmul.mubr.msk.f32.gmra.mxu0 %vm464_vm0, %v9673_v12  ;;  %v9676_v55 = vld [vmem:[#allocation16_spill] sm:$0xff] }
 0x112   : > { %5146 = vmatmul.mubr.msk.f32.gmra.mxu1 %vm6590_vm2, %v6835_v48  ;;  %5799 = vmatpush3.msra.mxu0 %v4929_v42  ;;  %v7413_v49 = vpop.f32.mrf.mxu1  ;;  %v6107_v42 = vld [vmem:[%s6267_s23 + $0x50] sm:$0xff] }
 0x113   : > { %9674 = vst [vmem:[#allocation6_spill] sm:$0xff] %v7413_v49  ;;  %5767 = vmatprep.mubr.f32.mxu0 %v9675_v58  ;;  %2027 = vmatprep.mubr.f32.mxu1 %v6106_v34 }
 0x114   : > { %5800 = vmatprep.subr.mxu0 %v4928_v26 }
 0x115   : > { %5768 = vmatmul.mubr.msk.f32.gmra.mxu0 %vm464_vm0, %v9676_v55  ;;  %v948_v54 = vpop.f32.mrf.mxu0  ;;  %v7419_v17 = vpop.f32.mrf.mxu1 }
 0x116   : > { %2028 = vmatmul.mubr.f32.gmra.mxu1 %v6857_v16  ;;  %5801 = vmatpush3.msra.mxu0 %v4928_v26  ;;  %v7423_v48 = vadd.f32 %v7305_v51, %v948_v54  ;;  %v6108_v26 = vld [vmem:[%s6267_s23 + $0x58] sm:$0xff] }
 0x117   : > { %2032 = vmatprep.mubr.f32.mxu1 %v6107_v42  ;;  %5802 = vmatprep.mubr.f32.mxu0 %v6348_v47  ;;  %v950_v49 = vpop.f32.mrf.mxu0  ;;  %v7427_v34 = vpop.f32.mrf.mxu1 }
 0x118   : > { %3090 = vmatprep.subr.mxu0 %v9643_v10 }
 0x119   : > { %5803 = vmatmul.mubr.msk.f32.vlgmr.msra.gmra.mxu0 %vm464_vm0, %v6323_v41 }
 0x11a   : > { %5148 = vmatmul.mubr.msk.f32.gmra.mxu1 %vm6590_vm2, %v6867_v21  ;;  %5805 = vmatprep.mubr.f32.mxu0 %v6381_v56  ;;  %v953_v16 = vpop.f32.mrf.mxu0  ;;  %v7436_v54 = vpop.f32.mrf.mxu1  ;;  %v6109_v56 = vld [vmem:[%s6267_s23 + $0x60] sm:$0xff] }
 0x11b   : > { %2037 = vmatprep.mubr.f32.mxu1 %v6108_v26  ;;  %v7440_v47 = vadd.f32 %v7300_v2, %v953_v16 }
 0x11c   : > { %v955_v51 = vpop.f32.mrf.mxu0  ;;  %v7442_v49 = vpop.f32.mrf.mxu1 }
 0x11d   : > { %5806 = vmatmul.mubr.msk.f32.gmra.mxu0 %vm464_vm0, %v6355_v50  ;;  %v6110_v50 = vld [vmem:[%s6267_s23 + $0x68] sm:$0xff] }
 0x11e   : > { %2038 = vmatmul.mubr.f32.gmra.mxu1 %v6892_v27  ;;  %5808 = vmatprep.mubr.f32.mxu0 %v6414_v1  ;;  %v958_v41 = vpop.f32.mrf.mxu0 }
 0x11f   : > { %2042 = vmatprep.mubr.f32.mxu1 %v6109_v56  ;;  %v7450_v21 = vadd.f32 %v7319_v57, %v958_v41  ;;  %v7452_v42 = vpop.f32.mrf.mxu1 }
 0x120   : > { %v960_v2 = vpop.f32.mrf.mxu0 }
 0x121   : > { %5809 = vmatmul.mubr.msk.f32.gmra.mxu0 %vm464_vm0, %v6388_v59  ;;  %v7456_v16 = vpop.f32.mrf.mxu1  ;;  %v4992_v59 = vld [vmem:[%s9502_s3 + $0x2f8] sm:$0xff] }
 0x122   : > { %5150 = vmatmul.mubr.msk.f32.gmra.mxu1 %vm6590_vm2, %v6901_v4  ;;  %5811 = vmatprep.mubr.f32.mxu0 %v6447_v11  ;;  %v6111_v11 = vld [vmem:[%s6267_s23 + $0x70] sm:$0xff] }
 0x123   : > { %2047 = vmatprep.mubr.f32.mxu1 %v6110_v50  ;;  %v963_v1 = vpop.f32.mrf.mxu0  ;;  %v7463_v27 = vpop.f32.mrf.mxu1  ;;  %5850 = vmatprep.subr.mxu1 %v4992_v59  ;;  %v4958_v50 = vld [vmem:[%s9502_s3 + $0x1e8] sm:$0xff] }
 0x124   : > { %v7466_v57 = vadd.f32 %v7315_v52, %v963_v1  ;;  %5851 = vmatpush3.msra.mxu1 %v4992_v59  ;;  %v4960_v52 = vld [vmem:[%s9502_s3 + $0x1f8] sm:$0xff] }
 0x125   : > { %5812 = vmatmul.mubr.msk.f32.gmra.mxu0 %vm464_vm0, %v6421_v5  ;;  %v965_v26 = vpop.f32.mrf.mxu0  ;;  %v7473_v51 = vpop.f32.mrf.mxu1 }
 0x126   : > { %2048 = vmatmul.mubr.f32.gmra.mxu1 %v6926_v35  ;;  %5814 = vmatprep.mubr.f32.mxu0 %v6480_v20  ;;  %v4959_v20 = vld [vmem:[%s9502_s3 + $0x1f0] sm:$0xff]  ;;  %v6113_v26 = vld [vmem:[%s6267_s23 + $0x80] sm:$0xff] }
 0x127   : > { %2052 = vmatprep.mubr.f32.mxu1 %v6111_v11  ;;  %v968_v4 = vpop.f32.mrf.mxu0  ;;  %3091 = vmatpush1.msra.mxu0 %v4960_v52  ;;  %v6114_v52 = vld [vmem:[%s6267_s23 + $0x88] sm:$0xff] }
 0x128   : > { %v7482_v41 = vadd.f32 %v7336_v43, %v968_v4  ;;  %v7484_v5 = vpop.f32.mrf.mxu1  ;;  %3092 = vmatprep.subr.mxu0 %v9643_v10  ;;  %v6112_v43 = vld [vmem:[%s6267_s23 + $0x78] sm:$0xff] }
 0x129   : > { %5815 = vmatmul.mubr.msk.f32.gmra.mxu0 %vm464_vm0, %v6454_v14  ;;  %v970_v35 = vpop.f32.mrf.mxu0 }
 0x12a   : > { %5152 = vmatmul.mubr.msk.f32.gmra.mxu1 %vm6590_vm2, %v6935_v24  ;;  %v7495_v56 = vpop.f32.mrf.mxu1  ;;  %5817 = vmatprep.mubr.f32.mxu0 %v6513_v31  ;;  %v4991_v24 = vld [vmem:[%s9502_s3 + $0x2f0] sm:$0xff] }
 0x12b   : > { %2057 = vmatprep.mubr.f32.mxu1 %v6112_v43  ;;  %3093 = vmatpush1.msra.mxu0 %v4959_v20 }
 0x12c   : > { %v973_v14 = vpop.f32.mrf.mxu0  ;;  %v7499_v2 = vpop.f32.mrf.mxu1  ;;  %3094 = vmatprep.subr.mxu0 %v9643_v10  ;;  %5852 = vmatprep.subr.mxu1 %v4991_v24 }
 0x12d   : > { %v7509_v1 = vadd.f32 %v7329_v40, %v973_v14  ;;  %5818 = vmatmul.mubr.msk.f32.gmra.mxu0 %vm464_vm0, %v6487_v23  ;;  %v4957_v40 = vld [vmem:[%s9502_s3 + $0x1e0] sm:$0xff]  ;;  %5853 = vmatpush3.msra.mxu1 %v4991_v24  ;;  %v6115_v14 = vld [vmem:[%s6267_s23 + $0x90] sm:$0xff] }
 0x12e   : > { %2058 = vmatmul.mubr.f32.gmra.mxu1 %v6960_v44  ;;  %v975_v31 = vpop.f32.mrf.mxu0  ;;  %v7514_v59 = vpop.f32.mrf.mxu1  ;;  %5820 = vmatprep.mubr.f32.mxu0 %v9658_v22 }
 0x12f   : > { %2062 = vmatprep.mubr.f32.mxu1 %v6113_v26  ;;  %3095 = vmatpush1.msra.mxu0 %v4958_v50  ;;  %v6116_v31 = vld [vmem:[%s6267_s23 + $0x98] sm:$0xff] }
 0x130   : > { %v978_v11 = vpop.f32.mrf.mxu0  ;;  %3096 = vmatprep.subr.mxu0 %v9643_v10 }
 0x131   : > { %v7523_v23 = vadd.f32 %v7351_v46, %v978_v11  ;;  %v7525_v44 = vpop.f32.mrf.mxu1  ;;  %5821 = vmatmul.mubr.msk.f32.gmra.mxu0 %vm464_vm0, %v9659_v25  ;;  %v4956_v46 = vld [vmem:[%s9502_s3 + $0x1d8] sm:$0xff]  ;;  %v4990_v25 = vld [vmem:[%s9502_s3 + $0x2e8] sm:$0xff] }
 0x132   : > { %5154 = vmatmul.mubr.msk.f32.gmra.mxu1 %vm6590_vm2, %v6969_v30  ;;  %v980_v22 = vpop.f32.mrf.mxu0  ;;  %5823 = vmatprep.mubr.f32.mxu0 %v9660_v37 }
 0x133   : > { %v7533_v4 = vpop.f32.mrf.mxu1  ;;  %2067 = vmatprep.mubr.f32.mxu1 %v6114_v52  ;;  %3097 = vmatpush1.msra.mxu0 %v4957_v40  ;;  %v6117_v22 = vld [vmem:[%s6267_s23 + $0xa0] sm:$0xff] }
 0x134   : > { %3098 = vmatprep.subr.mxu0 %v9643_v10  ;;  %5854 = vmatprep.subr.mxu1 %v4990_v25 }
 0x135   : > { %v983_v30 = vpop.f32.mrf.mxu0  ;;  %v7543_v35 = vpop.f32.mrf.mxu1  ;;  %5824 = vmatmul.mubr.msk.f32.gmra.mxu0 %vm464_vm0, %v9661_v7  ;;  %v4955_v7 = vld [vmem:[%s9502_s3 + $0x1d0] sm:$0xff]  ;;  %5855 = vmatpush3.msra.mxu1 %v4990_v25  ;;  %v6118_v25 = vld [vmem:[%s6267_s23 + $0xa8] sm:$0xff] }
 0x136   : > { %v7548_v37 = vadd.f32 %v7343_v32, %v983_v30  ;;  %2068 = vmatmul.mubr.f32.gmra.mxu1 %v6994_v53  ;;  %5826 = vmatprep.mubr.f32.mxu0 %v9662_v39 }
 0x137   : > { %v985_v20 = vpop.f32.mrf.mxu0  ;;  %v7552_v43 = vpop.f32.mrf.mxu1  ;;  %2072 = vmatprep.mubr.f32.mxu1 %v6115_v14  ;;  %3099 = vmatpush1.msra.mxu0 %v4956_v46 }
 0x138   : > { %3100 = vmatprep.subr.mxu0 %v9643_v10 }
 0x139   : > { %v988_v32 = vpop.f32.mrf.mxu0  ;;  %5827 = vmatmul.mubr.msk.f32.gmra.mxu0 %vm464_vm0, %v9663_v61  ;;  %v4954_v61 = vld [vmem:[%s9502_s3 + $0x1c8] sm:$0xff] }
 0x13a   : > { %v7562_v53 = vadd.f32 %v7367_v19, %v988_v32  ;;  %v1398_v39 = vpop.f32.mrf.mxu1  ;;  %5156 = vmatmul.mubr.msk.f32.gmra.mxu1 %vm6590_vm2, %v7003_v28  ;;  %5829 = vmatprep.mubr.f32.mxu0 %v9664_v38  ;;  %v4989_v28 = vld [vmem:[%s9502_s3 + $0x2e0] sm:$0xff] }
 0x13b   : > { %v7569_v50 = vadd.f32 %v1398_v39, %v7423_v48  ;;  %v990_v24 = vpop.f32.mrf.mxu0  ;;  %2077 = vmatprep.mubr.f32.mxu1 %v6116_v31  ;;  %3101 = vmatpush1.msra.mxu0 %v4955_v7  ;;  %v6119_v7 = vld [vmem:[%s6267_s23 + $0xb0] sm:$0xff] }
 0x13c   : > { %v1400_v26 = vpop.f32.mrf.mxu1  ;;  %3102 = vmatprep.subr.mxu0 %v9643_v10  ;;  %5856 = vmatprep.subr.mxu1 %v4989_v28  ;;  %v6120_v24 = vld [vmem:[%s6267_s23 + $0xb8] sm:$0xff] }
 0x13d   : > { %v993_v38 = vpop.f32.mrf.mxu0  ;;  %5830 = vmatmul.mubr.msk.f32.gmra.mxu0 %vm464_vm0, %v9665_v13  ;;  %5857 = vmatpush3.msra.mxu1 %v4989_v28  ;;  %v9678_v26 = vld [vmem:[#allocation20_spill] sm:$0xff] }
 0x13e   : > { %v7582_v19 = vadd.f32 %v7360_v29, %v993_v38  ;;  %v1403_v48 = vpop.f32.mrf.mxu1  ;;  %2078 = vmatmul.mubr.f32.gmra.mxu1 %v7029_v62  ;;  %5832 = vmatprep.mubr.f32.mxu0 %v9666_v33  ;;  %v4953_v29 = vld [vmem:[%s9502_s3 + $0x1c0] sm:$0xff] }
 0x13f   : > { %v7587_v11 = vadd.f32 %v1403_v48, %v7440_v47  ;;  %v995_v40 = vpop.f32.mrf.mxu0  ;;  %2082 = vmatprep.mubr.f32.mxu1 %v6117_v22  ;;  %3103 = vmatpush1.msra.mxu0 %v4954_v61  ;;  %v6121_v38 = vld [vmem:[%s6267_s23 + $0xc0] sm:$0xff] }
 0x140   : > { %v1405_v52 = vpop.f32.mrf.mxu1  ;;  %3104 = vmatprep.subr.mxu0 %v9643_v10  ;;  %v9679_v22 = vld [vmem:[#allocation19_spill] sm:$0xff] }
 0x141   : > { %v998_v13 = vpop.f32.mrf.mxu0  ;;  %5833 = vmatmul.mubr.msk.f32.gmra.mxu0 %vm464_vm0, %v9667_v18  ;;  %v4952_v18 = vld [vmem:[%s9502_s3 + $0x1b8] sm:$0xff] }
 0x142   : > { %v7597_v62 = vadd.f32 %v7379_v60, %v998_v13  ;;  %v1408_v33 = vpop.f32.mrf.mxu1  ;;  %5158 = vmatmul.mubr.msk.f32.gmra.mxu1 %vm6590_vm2, %v7038_v36  ;;  %5835 = vmatprep.mubr.f32.mxu0 %v9668_v0  ;;  %v4988_v36 = vld [vmem:[%s9502_s3 + $0x2d8] sm:$0xff] }
 0x143   : > { %v7604_v47 = vadd.f32 %v1408_v33, %v7450_v21  ;;  %v1000_v46 = vpop.f32.mrf.mxu0  ;;  %2087 = vmatprep.mubr.f32.mxu1 %v6118_v25  ;;  %3105 = vmatpush1.msra.mxu0 %v4953_v29  ;;  %v9680_v52 = vld [vmem:[#allocation6_spill] sm:$0xff]  ;;  %v6122_v25 = vld [vmem:[%s6267_s23 + $0xc8] sm:$0xff] }
 0x144   : > { %v1410_v30 = vpop.f32.mrf.mxu1  ;;  %3106 = vmatprep.subr.mxu0 %v9643_v10  ;;  %5858 = vmatprep.subr.mxu1 %v4988_v36  ;;  %v9681_v13 = vld [vmem:[#allocation22_spill] sm:$0xff] }
 0x145   : > { %v1003_v60 = vpop.f32.mrf.mxu0  ;;  %5836 = vmatmul.mubr.msk.f32.gmra.mxu0 %vm464_vm0, %v9670_v9  ;;  %v4951_v9 = vld [vmem:[%s9502_s3 + $0x1b0] sm:$0xff]  ;;  %5859 = vmatpush3.msra.mxu1 %v4988_v36  ;;  %v4948_v30 = vld [vmem:[%s9502_s3 + $0x198] sm:$0xff]  ;;  %v4986_v36 = vld [vmem:[%s9502_s3 + $0x2c8] sm:$0xff] }
 0x146   : > { %v7617_v0 = vadd.f32 %v7375_v15, %v1003_v60  ;;  %v1413_v21 = vpop.f32.mrf.mxu1  ;;  %2088 = vmatmul.mubr.f32.gmra.mxu1 %v7064_v8  ;;  %5838 = vmatprep.mubr.f32.mxu0 %v9671_v3 }
 0x147   : > { %v7622_v20 = vadd.f32 %v1413_v21, %v7466_v57  ;;  %v1005_v14 = vpop.f32.mrf.mxu0  ;;  %2092 = vmatprep.mubr.f32.mxu1 %v6119_v7  ;;  %3107 = vmatpush1.msra.mxu0 %v4952_v18  ;;  %v4985_v7 = vld [vmem:[%s9502_s3 + $0x2c0] sm:$0xff] }
 0x148   : > { %v1415_v32 = vpop.f32.mrf.mxu1  ;;  %3108 = vmatprep.subr.mxu0 %v9643_v10  ;;  %v9682_v14 = vld [vmem:[#allocation23_spill] sm:$0xff] }
 0x149   : > { %v1008_v15 = vpop.f32.mrf.mxu0  ;;  %5839 = vmatmul.mubr.msk.f32.gmra.mxu0 %vm464_vm0, %v9673_v12 }
 0x14a   : > { %v7632_v8 = vadd.f32 %v7398_v63, %v1008_v15  ;;  %v1418_v3 = vpop.f32.mrf.mxu1  ;;  %5160 = vmatmul.mubr.msk.f32.gmra.mxu1 %vm6590_vm2, %v7073_v45  ;;  %5841 = vmatprep.mubr.f32.mxu0 %v9675_v58  ;;  %v4950_v63 = vld [vmem:[%s9502_s3 + $0x1a8] sm:$0xff]  ;;  %v4987_v45 = vld [vmem:[%s9502_s3 + $0x2d0] sm:$0xff] }
 0x14b   : > { %v7639_v57 = vadd.f32 %v1418_v3, %v7482_v41  ;;  %v1010_v39 = vpop.f32.mrf.mxu0  ;;  %2097 = vmatprep.mubr.f32.mxu1 %v6120_v24  ;;  %3109 = vmatpush1.msra.mxu0 %v4951_v9  ;;  %v9677_v41 = vld [vmem:[#allocation21_spill] sm:$0xff]  ;;  %v4946_v3 = vld [vmem:[%s9502_s3 + $0x188] sm:$0xff] }
 0x14c   : > { %v1420_v31 = vpop.f32.mrf.mxu1  ;;  %3110 = vmatprep.subr.mxu0 %v9643_v10  ;;  %5860 = vmatprep.subr.mxu1 %v4987_v45  ;;  %v6123_v15 = vld [vmem:[%s6267_s23 + $0xd0] sm:$0xff] }
 0x14d   : > { %v7649_v12 = vpop.f32.mrf.mxu0  ;;  %5842 = vmatmul.mubr.msk.f32.gmra.mxu0 %vm464_vm0, %v9676_v55  ;;  %v4949_v55 = vld [vmem:[%s9502_s3 + $0x1a0] sm:$0xff]  ;;  %5861 = vmatpush3.msra.mxu1 %v4987_v45  ;;  %v9683_v45 = vld [vmem:[#allocation24_spill] sm:$0xff] }
 0x14e   : > { %v1423_v58 = vpop.f32.mrf.mxu1  ;;  %2098 = vmatmul.mubr.f32.gmra.mxu1 %v9677_v41  ;;  %5844 = vmatprep.mubr.f32.mxu0 %v9678_v26 }
 0x14f   : > { %v7656_v61 = vadd.f32 %v1423_v58, %v7509_v1  ;;  %v1015_v28 = vpop.f32.mrf.mxu0  ;;  %2102 = vmatprep.mubr.f32.mxu1 %v6121_v38  ;;  %3111 = vmatpush1.msra.mxu0 %v4950_v63  ;;  %v4984_v58 = vld [vmem:[%s9502_s3 + $0x2b8] sm:$0xff] }
 0x150   : > { %v1425_v48 = vpop.f32.mrf.mxu1  ;;  %3112 = vmatprep.subr.mxu0 %v9643_v10  ;;  %5862 = vmatprep.subr.mxu1 %v4986_v36  ;;  %v6124_v28 = vld [vmem:[%s6267_s23 + $0xd8] sm:$0xff] }
 0x151   : > { %v1018_v40 = vpop.f32.mrf.mxu0  ;;  %5845 = vmatmul.mubr.msk.f32.gmra.mxu0 %vm464_vm0, %v9679_v22  ;;  %5863 = vmatpush3.msra.mxu1 %v4986_v36  ;;  %v4983_v22 = vld [vmem:[%s9502_s3 + $0x2b0] sm:$0xff]  ;;  %v9685_v36 = vld [vmem:[#allocation26_spill] sm:$0xff] }
 0x152   : > { %v7666_v1 = vadd.f32 %v9680_v52, %v1018_v40  ;;  %v1428_v29 = vpop.f32.mrf.mxu1  ;;  %5162 = vmatmul.mubr.msk.f32.gmra.mxu1 %vm6590_vm2, %v9681_v13  ;;  %5847 = vmatprep.mubr.f32.mxu0 %v9643_v10  ;;  %v9684_v40 = vld [vmem:[#allocation25_spill] sm:$0xff]  ;;  %v6125_v13 = vld [vmem:[%s6267_s23 + $0xe0] sm:$0xff] }
 0x153   : > { %v7673_v33 = vadd.f32 %v1428_v29, %v7523_v23  ;;  %v1020_v46 = vpop.f32.mrf.mxu0  ;;  %2107 = vmatprep.mubr.f32.mxu1 %v6122_v25  ;;  %3113 = vmatpush1.msra.mxu0 %v4949_v55  ;;  %v4947_v23 = vld [vmem:[%s9502_s3 + $0x190] sm:$0xff] }
 0x154   : > { %v1430_v18 = vpop.f32.mrf.mxu1  ;;  %3114 = vmatprep.subr.mxu0 %v9643_v10  ;;  %5864 = vmatprep.subr.mxu1 %v4985_v7  ;;  %v4974_v46 = vld [vmem:[%s9502_s3 + $0x268] sm:$0xff] }
 0x155   : > { %v7683_v60 = vpop.f32.mrf.mxu0  ;;  %5848 = vmatmul.mubr.f32.gmra.mxu0 %v9643_v10  ;;  %5865 = vmatpush3.msra.mxu1 %v4985_v7  ;;  %v6126_v7 = vld [vmem:[%s6267_s23 + $0xe8] sm:$0xff] }
 0x156   : > { %v1433_v21 = vpop.f32.mrf.mxu1  ;;  %2108 = vmatmul.mubr.f32.gmra.mxu1 %v9682_v14  ;;  %3115 = vmatpush1.msra.mxu0 %v4948_v30 }
 0x157   : > { %v7694_v32 = vadd.f32 %v1433_v21, %v7548_v37  ;;  %v1025_v9 = vpop.f32.mrf.mxu0  ;;  %2112 = vmatprep.mubr.f32.mxu1 %v6123_v15  ;;  %3116 = vmatprep.subr.mxu0 %v9643_v10  ;;  %v4945_v37 = vld [vmem:[%s9502_s3 + $0x180] sm:$0xff] }
 0x158   : > { %v1435_v39 = vpop.f32.mrf.mxu1  ;;  %3117 = vmatpush1.msra.mxu0 %v4947_v23  ;;  %5866 = vmatprep.subr.mxu1 %v4984_v58  ;;  %v4982_v23 = vld [vmem:[%s9502_s3 + $0x2a8] sm:$0xff]  ;;  %v4972_v9 = vld [vmem:[%s9502_s3 + $0x258] sm:$0xff] }
 0x159   : > { %v1028_v24 = vpop.f32.mrf.mxu0  ;;  %3118 = vmatprep.subr.mxu0 %v9643_v10  ;;  %5867 = vmatpush3.msra.mxu1 %v4984_v58  ;;  %v6127_v58 = vld [vmem:[%s6267_s23 + $0xf0] sm:$0xff] }
 0x15a   : > { %v7706_v31 = vadd.f32 %v7427_v34, %v1028_v24  ;;  %v1438_v63 = vpop.f32.mrf.mxu1  ;;  %5164 = vmatmul.mubr.msk.f32.gmra.mxu1 %vm6590_vm2, %v9683_v45  ;;  %3119 = vmatpush1.msra.mxu0 %v4946_v3  ;;  %v4976_v34 = vld [vmem:[%s9502_s3 + $0x278] sm:$0xff]  ;;  %v9686_v24 = vld [vmem:[#allocation27_spill] sm:$0xff] }
 0x15b   : > { %v7715_v41 = vadd.f32 %v1438_v63, %v7562_v53  ;;  %v1030_v26 = vpop.f32.mrf.mxu0  ;;  %2117 = vmatprep.mubr.f32.mxu1 %v6124_v28  ;;  %3120 = vmatprep.subr.mxu0 %v9643_v10  ;;  %v4975_v53 = vld [vmem:[%s9502_s3 + $0x270] sm:$0xff] }
 0x15c   : > { %v1440_v38 = vpop.f32.mrf.mxu1  ;;  %3121 = vmatpush1.msra.mxu0 %v4945_v37  ;;  %5868 = vmatprep.subr.mxu1 %v4983_v22  ;;  %v4981_v37 = vld [vmem:[%s9502_s3 + $0x2a0] sm:$0xff]  ;;  %v4970_v26 = vld [vmem:[%s9502_s3 + $0x248] sm:$0xff] }
 0x15d   : > { %v7722_v48 = vpop.f32.mrf.mxu0  ;;  %3122 = vmatprep.subr.mxu0 %v9643_v10  ;;  %5869 = vmatpush3.msra.mxu1 %v4983_v22 }
 0x15e   : > { %v1443_v55 = vpop.f32.mrf.mxu1  ;;  %2118 = vmatmul.mubr.f32.gmra.mxu1 %v9684_v40  ;;  %3123 = vmatpush2.msra.mxu0 %v4976_v34 }
 0x15f   : > { %v7733_v52 = vadd.f32 %v1443_v55, %v7582_v19  ;;  %v1035_v29 = vpop.f32.mrf.mxu0  ;;  %2122 = vmatprep.mubr.f32.mxu1 %v6125_v13  ;;  %3124 = vmatprep.subr.mxu0 %v9643_v10  ;;  %v4973_v19 = vld [vmem:[%s9502_s3 + $0x260] sm:$0xff]  ;;  %v4980_v55 = vld [vmem:[%s9502_s3 + $0x298] sm:$0xff] }
 0x160   : > { %v1445_v25 = vpop.f32.mrf.mxu1  ;;  %3125 = vmatpush2.msra.mxu0 %v4975_v53  ;;  %5870 = vmatprep.subr.mxu1 %v4982_v23  ;;  %v9687_v53 = vld [vmem:[#allocation28_spill] sm:$0xff]  ;;  %v6128_v29 = vld [vmem:[%s6267_s23 + $0xf8] sm:$0xff] }
 0x161   : > { %v7740_v30 = vpop.f32.mrf.mxu0  ;;  %3126 = vmatprep.subr.mxu0 %v9643_v10  ;;  %5871 = vmatpush3.msra.mxu1 %v4982_v23  ;;  %v4968_v13 = vld [vmem:[%s9502_s3 + $0x238] sm:$0xff]  ;;  %v9688_v25 = vld [vmem:[#allocation4_spill] sm:$0xff]  ;;  %v9689_v23 = vld [vmem:[#allocation29_spill] sm:$0xff] }
 0x162   : > { %v1448_v18 = vpop.f32.mrf.mxu1  ;;  %5166 = vmatmul.mubr.msk.f32.gmra.mxu1 %vm6590_vm2, %v9685_v36  ;;  %3127 = vmatpush2.msra.mxu0 %v4974_v46 }
 0x163   : > { %v7753_v21 = vadd.f32 %v1448_v18, %v7597_v62  ;;  %v1040_v14 = vpop.f32.mrf.mxu0  ;;  %2127 = vmatprep.mubr.f32.mxu1 %v6126_v7  ;;  %3128 = vmatprep.subr.mxu0 %v9643_v10  ;;  %v4971_v62 = vld [vmem:[%s9502_s3 + $0x250] sm:$0xff] }
 0x164   : > { %v1450_v15 = vpop.f32.mrf.mxu1  ;;  %3129 = vmatpush2.msra.mxu0 %v4973_v19  ;;  %5872 = vmatprep.subr.mxu1 %v4981_v37  ;;  %v1239_v19 = vadd.f32 %v9688_v25, %v7649_v12  ;;  %v4979_v14 = vld [vmem:[%s9502_s3 + $0x290] sm:$0xff] }
 0x165   : > { %v7760_v3 = vpop.f32.mrf.mxu0  ;;  %3130 = vmatprep.subr.mxu0 %v9643_v10  ;;  %5873 = vmatpush3.msra.mxu1 %v4981_v37  ;;  %v4978_v37 = vld [vmem:[%s9502_s3 + $0x288] sm:$0xff] }
 0x166   : > { %v1453_v39 = vpop.f32.mrf.mxu1  ;;  %2128 = vmatmul.mubr.f32.gmra.mxu1 %v9686_v24  ;;  %3131 = vmatpush2.msra.mxu0 %v4972_v9  ;;  %v4966_v9 = vld [vmem:[%s9502_s3 + $0x228] sm:$0xff] }
 0x167   : > { %v7771_v63 = vadd.f32 %v1453_v39, %v7617_v0  ;;  %v1045_v45 = vpop.f32.mrf.mxu0  ;;  %2132 = vmatprep.mubr.f32.mxu1 %v6127_v58  ;;  %3132 = vmatprep.subr.mxu0 %v9643_v10  ;;  %v4969_v0 = vld [vmem:[%s9502_s3 + $0x240] sm:$0xff] }
 0x168   : > { %v1455_v28 = vpop.f32.mrf.mxu1  ;;  %3133 = vmatpush2.msra.mxu0 %v4971_v62  ;;  %5874 = vmatprep.subr.mxu1 %v4980_v55  ;;  %v4965_v39 = vld [vmem:[%s9502_s3 + $0x220] sm:$0xff] }
 0x169   : > { %v7778_v34 = vpop.f32.mrf.mxu0  ;;  %3134 = vmatprep.subr.mxu0 %v9643_v10  ;;  %5875 = vmatpush3.msra.mxu1 %v4980_v55  ;;  %v4977_v55 = vld [vmem:[%s9502_s3 + $0x280] sm:$0xff] }
 0x16a   : > { %v1458_v38 = vpop.f32.mrf.mxu1  ;;  %5168 = vmatmul.mubr.msk.f32.gmra.mxu1 %vm6590_vm2, %v9687_v53  ;;  %3135 = vmatpush2.msra.mxu0 %v4970_v26  ;;  %v4964_v26 = vld [vmem:[%s9502_s3 + $0x218] sm:$0xff] }
 0x16b   : > { %v7791_v40 = vadd.f32 %v1458_v38, %v7632_v8  ;;  %v1050_v22 = vpop.f32.mrf.mxu0  ;;  %2137 = vmatprep.mubr.f32.mxu1 %v6128_v29  ;;  %3136 = vmatprep.subr.mxu0 %v9643_v10  ;;  %v4967_v8 = vld [vmem:[%s9502_s3 + $0x230] sm:$0xff] }
 0x16c   : > { %v1460_v46 = vpop.f32.mrf.mxu1  ;;  %3137 = vmatpush2.msra.mxu0 %v4969_v0  ;;  %5876 = vmatprep.subr.mxu1 %v4979_v14  ;;  %v9690_v0 = vld [vmem:[#allocation3_spill] sm:$0xff] }
 0x16d   : > { %v7800_v18 = vpop.f32.mrf.mxu0  ;;  %3138 = vmatprep.subr.mxu0 %v9643_v10  ;;  %5877 = vmatpush3.msra.mxu1 %v4979_v14  ;;  %v1249_v38 = vadd.f32 %v9690_v0, %v7683_v60 }
 0x16e   : > { %v1463_v36 = vpop.f32.mrf.mxu1  ;;  %2138 = vmatmul.mubr.f32.gmra.mxu1 %v9689_v23  ;;  %3139 = vmatpush2.msra.mxu0 %v4968_v13  ;;  %v4962_v13 = vld [vmem:[%s9502_s3 + $0x208] sm:$0xff] }
 0x16f   : > { %v7810_v7 = vadd.f32 %v1463_v36, %v1239_v19  ;;  %v1055_v12 = vpop.f32.mrf.mxu0  ;;  %2142 = vmatprep.mubr.f32.mxu1 %v9643_v10  ;;  %3140 = vmatprep.subr.mxu0 %v9643_v10  ;;  %v4961_v19 = vld [vmem:[%s9502_s3 + $0x200] sm:$0xff]  ;;  %v7860_v36 = vld [vmem:[%s9502_s3 + $0x178] sm:$0xff] }
 0x170   : > { %v1465_v15 = vpop.f32.mrf.mxu1  ;;  %3141 = vmatpush2.msra.mxu0 %v4967_v8  ;;  %5878 = vmatprep.subr.mxu1 %v4978_v37 }
 0x171   : > { %v7817_v62 = vpop.f32.mrf.mxu0  ;;  %3142 = vmatprep.subr.mxu0 %v9643_v10  ;;  %5879 = vmatpush3.msra.mxu1 %v4978_v37 }
 0x172   : > { %v1468_v24 = vpop.f32.mrf.mxu1  ;;  %2143 = vmatmul.mubr.f32.gmra.mxu1 %v9643_v10  ;;  %3143 = vmatpush2.msra.mxu0 %v4966_v9  ;;  %v1259_v9 = vadd.f32 %v7419_v17, %v7722_v48  ;;  %v1269_v17 = vadd.f32 %v7436_v54, %v7760_v3 }
 0x173   : > { %v7828_v45 = vadd.f32 %v1468_v24, %v7666_v1  ;;  %v1060_v58 = vpop.f32.mrf.mxu0  ;;  %2147 = vmatprep.mubr.f32.mxu1 %v9643_v10  ;;  %3144 = vmatprep.subr.mxu0 %v9643_v10  ;;  %v4963_v1 = vld [vmem:[%s9502_s3 + $0x210] sm:$0xff] }
 0x174   : > { %v1470_v28 = vpop.f32.mrf.mxu1  ;;  %3145 = vmatpush2.msra.mxu0 %v4965_v39  ;;  %5880 = vmatprep.subr.mxu1 %v4977_v55 }
 0x175   : > { %v7837_v53 = vpop.f32.mrf.mxu0  ;;  %3146 = vmatprep.subr.mxu0 %v9643_v10  ;;  %5881 = vmatpush3.msra.mxu1 %v4977_v55 }
 0x176   : > { %v1473_v22 = vpop.f32.mrf.mxu1  ;;  %2148 = vmatmul.mubr.f32.gmra.mxu1 %v9643_v10  ;;  %3147 = vmatpush2.msra.mxu0 %v4964_v26 }
 0x177   : > { %v7847_v29 = vadd.f32 %v1473_v22, %v1249_v38  ;;  %v1065_v60 = vpop.f32.mrf.mxu0  ;;  %3148 = vmatprep.subr.mxu0 %v9643_v10  ;;  %3540 = vmatprep.subr.mxu1 %v9643_v10 }
 0x178   : > { %v1475_v46 = vpop.f32.mrf.mxu1  ;;  %3149 = vmatpush2.msra.mxu0 %v4963_v1 }
 0x179   : > { %v1068_v25 = vpop.f32.mrf.mxu0  ;;  %3150 = vmatprep.subr.mxu0 %v9643_v10  ;;  %v1274_v46 = vadd.f32 %v7456_v16, %v7778_v34 }
 0x17a   : > { %v1478_v8 = vpop.f32.mrf.mxu1  ;;  %3151 = vmatpush2.msra.mxu0 %v4962_v13 }
 0x17b   : > { %v7864_v23 = vadd.f32 %v1478_v8, %v7706_v31  ;;  %v1070_v14 = vpop.f32.mrf.mxu0  ;;  %3152 = vmatprep.subr.mxu0 %v9643_v10  ;;  %v1264_v31 = vadd.f32 %v7442_v49, %v7740_v30 }
 0x17c   : > { %v1480_v12 = vpop.f32.mrf.mxu1  ;;  %3153 = vmatpush2.msra.mxu0 %v4961_v19 }
 0x17d   : > { %v1073_v15 = vpop.f32.mrf.mxu0  ;;  %5930 = vmatprep.subr.mxu0 %v7860_v36  ;;  %v1279_v12 = vadd.f32 %v7452_v42, %v7800_v18 }
 0x17e   : > { %v1483_v39 = vpop.f32.mrf.mxu1 }
 0x17f   : > { %v7870_v24 = vadd.f32 %v1483_v39, %v1259_v9  ;;  %v1075_v37 = vpop.f32.mrf.mxu0 }
 0x180   : > { %v1485_v58 = vpop.f32.mrf.mxu1 }
 0x181   : > { %v1078_v26 = vpop.f32.mrf.mxu0  ;;  %v1284_v58 = vadd.f32 %v7473_v51, %v7817_v62 }
 0x182   : > { %v1488_v28 = vpop.f32.mrf.mxu1 }
 0x183   : > { %v7874_v0 = vadd.f32 %v1488_v28, %v1264_v31  ;;  %v1080_v38 = vpop.f32.mrf.mxu0 }
 0x184   : > { %v1490_v1 = vpop.f32.mrf.mxu1 }
 0x185   : > { %v1083_v48 = vpop.f32.mrf.mxu0  ;;  %v1289_v1 = vadd.f32 %v7463_v27, %v7837_v53  ;;  %v1299_v27 = vadd.f32 %v7484_v5, %v1073_v15 }
 0x186   : > { %v1493_v55 = vpop.f32.mrf.mxu1 }
 0x187   : > { %v7878_v22 = vadd.f32 %v1493_v55, %v1269_v17  ;;  %v1085_v60 = vpop.f32.mrf.mxu0 }
 0x188   : > { %v1495_v13 = vpop.f32.mrf.mxu1 }
 0x189   : > { %v1088_v19 = vpop.f32.mrf.mxu0  ;;  %v1294_v13 = vadd.f32 %v7495_v56, %v1068_v25 }
 0x18a   : > { %v1498_v49 = vpop.f32.mrf.mxu1 }
 0x18b   : > { %v7882_v30 = vadd.f32 %v1498_v49, %v1274_v46  ;;  %v1090_v8 = vpop.f32.mrf.mxu0 }
 0x18c   : > { %v1500_v14 = vpop.f32.mrf.mxu1 }
 0x18d   : > { %v1093_v9 = vpop.f32.mrf.mxu0 }
 0x18e   : > { %v1503_v54 = vpop.f32.mrf.mxu1 }
 0x18f   : > { %v7886_v3 = vadd.f32 %v1503_v54, %v1279_v12  ;;  %v1095_v39 = vpop.f32.mrf.mxu0 }
 0x190   : > { %v1505_v37 = vpop.f32.mrf.mxu1 }
 0x191   : > { %v1098_v31 = vpop.f32.mrf.mxu0 }
 0x192   : > { %v1508_v16 = vpop.f32.mrf.mxu1 }
 0x193   : > { %v7890_v34 = vadd.f32 %v1508_v16, %v1284_v58  ;;  %v1100_v28 = vpop.f32.mrf.mxu0 }
 0x194   : > { %v1510_v38 = vpop.f32.mrf.mxu1 }
 0x195   : > { %v1103_v17 = vpop.f32.mrf.mxu0 }
 0x196   : > { %v1513_v42 = vpop.f32.mrf.mxu1 }
 0x197   : > { %v7894_v18 = vadd.f32 %v1513_v42, %v1289_v1  ;;  %v1105_v55 = vpop.f32.mrf.mxu0 }
 0x198   : > { %v1515_v60 = vpop.f32.mrf.mxu1 }
 0x199   : > { %v5724_v46 = vpop.f32.mrf.mxu0 }
 0x19a   : > { %v1518_v49 = vpop.f32.mrf.mxu1  ;;  %v7898_v51 = vadd.f32 %v5724_v46, %v7587_v11  ;;  %v1304_v11 = vadd.f32 %v7514_v59, %v1078_v26  ;;  %v1314_v26 = vadd.f32 %v7533_v4, %v1088_v19  ;;  %v1324_v19 = vadd.f32 %v7552_v43, %v1098_v31 }
 0x19b   : > { %v7900_v62 = vadd.f32 %v1518_v49, %v1294_v13  ;;  %v7902_v8 = vpop.f32.mrf.mxu0 }
 0x19c   : > { %v1520_v14 = vpop.f32.mrf.mxu1 }
 0x19d   : > { %9691 = vst [vmem:[#allocation5_spill] sm:$0xff] %v7900_v62  ;;  %v5727_v53 = vpop.f32.mrf.mxu0 }
 0x19e   : > { %v1523_v12 = vpop.f32.mrf.mxu1  ;;  %v7906_v54 = vadd.f32 %v5727_v53, %v7622_v20  ;;  %v1309_v20 = vadd.f32 %v7499_v2, %v1083_v48  ;;  %v1319_v48 = vadd.f32 %v7525_v44, %v1093_v9  ;;  %v1329_v9 = vadd.f32 %v7543_v35, %v1103_v17 }
 0x19f   : > { %v7908_v39 = vadd.f32 %v1523_v12, %v1299_v27  ;;  %v7910_v56 = vpop.f32.mrf.mxu0 }
 0x1a0   : > { %v1525_v25 = vpop.f32.mrf.mxu1 }
 0x1a1   : > { %v5730_v37 = vpop.f32.mrf.mxu0 }
 0x1a2   : > { %v1528_v58 = vpop.f32.mrf.mxu1  ;;  %v7914_v16 = vadd.f32 %v5730_v37, %v7656_v61 }
 0x1a3   : > { %v7916_v28 = vadd.f32 %v1528_v58, %v1304_v11  ;;  %v7918_v5 = vpop.f32.mrf.mxu0 }
 0x1a4   : > { %v1530_v15 = vpop.f32.mrf.mxu1 }
 0x1a5   : > { %9692 = vst [vmem:[#allocation9_spill] sm:$0xff] %v7916_v28  ;;  %v5733_v38 = vpop.f32.mrf.mxu0 }
 0x1a6   : > { %v1533_v1 = vpop.f32.mrf.mxu1  ;;  %v7922_v42 = vadd.f32 %v5733_v38, %v7694_v32 }
 0x1a7   : > { %v1534_v55 = vadd.f32 %v1533_v1, %v1309_v20  ;;  %v7924_v60 = vpop.f32.mrf.mxu0 }
 0x1a8   : > { %v1535_v59 = vpop.f32.mrf.mxu1 }
 0x1a9   : > { %v5736_v61 = vpop.f32.mrf.mxu0 }
 0x1aa   : > { %v1538_v13 = vpop.f32.mrf.mxu1  ;;  %v7928_v46 = vadd.f32 %v5736_v61, %v7733_v52 }
 0x1ab   : > { %v7930_v49 = vadd.f32 %v1538_v13, %v1314_v26  ;;  %v7932_v14 = vpop.f32.mrf.mxu0 }
 0x1ac   : > { %v1540_v2 = vpop.f32.mrf.mxu1 }
 0x1ad   : > { %9693 = vst [vmem:[#allocation7_spill] sm:$0xff] %v7930_v49  ;;  %v5739_v32 = vpop.f32.mrf.mxu0 }
 0x1ae   : > { %v1543_v27 = vpop.f32.mrf.mxu1  ;;  %v7936_v53 = vadd.f32 %v5739_v32, %v7771_v63 }
 0x1af   : > { %v1544_v12 = vadd.f32 %v1543_v27, %v1319_v48  ;;  %v7938_v25 = vpop.f32.mrf.mxu0 }
 0x1b0   : > { %v1545_v4 = vpop.f32.mrf.mxu1 }
 0x1b1   : > { %v5742_v52 = vpop.f32.mrf.mxu0 }
 0x1b2   : > { %v1548_v11 = vpop.f32.mrf.mxu1  ;;  %v7942_v37 = vadd.f32 %v5742_v52, %v7810_v7 }
 0x1b3   : > { %v7944_v58 = vadd.f32 %v1548_v11, %v1324_v19  ;;  %v7946_v15 = vpop.f32.mrf.mxu0 }
 0x1b4   : > { %v1550_v44 = vpop.f32.mrf.mxu1 }
 0x1b5   : > { %9694 = vst [vmem:[#allocation10_spill] sm:$0xff] %v7944_v58  ;;  %v5745_v63 = vpop.f32.mrf.mxu0 }
 0x1b6   : > { %v1553_v20 = vpop.f32.mrf.mxu1  ;;  %v7950_v38 = vadd.f32 %v5745_v63, %v7847_v29 }
 0x1b7   : > { %v1554_v1 = vadd.f32 %v1553_v20, %v1329_v9  ;;  %v7952_v59 = vpop.f32.mrf.mxu0 }
 0x1b8   : > { %v1555_v43 = vpop.f32.mrf.mxu1 }
 0x1b9   : > { %v5748_v31 = vpop.f32.mrf.mxu0 }
 0x1ba   : > { %v7955_v7 = vadd.f32 %v5748_v31, %v7870_v24  ;;  %v1994_v26 = vpop.f32.mrf.mxu1 }
 0x1bb   : > { %v7957_v61 = vpop.f32.mrf.mxu0 }
 0x1bc   : > { %v1996_v13 = vpop.f32.mrf.mxu1 }
 0x1bd   : > { %v5751_v2 = vpop.f32.mrf.mxu0 }
 0x1be   : > { %v7960_v35 = vadd.f32 %v5751_v2, %v7878_v22  ;;  %v1999_v17 = vpop.f32.mrf.mxu1 }
 0x1bf   : > { %v7962_v48 = vpop.f32.mrf.mxu0 }
 0x1c0   : > { %v2001_v29 = vpop.f32.mrf.mxu1 }
 0x1c1   : > { %v5754_v32 = vpop.f32.mrf.mxu0 }
 0x1c2   : > { %v7965_v27 = vadd.f32 %v5754_v32, %v7886_v3  ;;  %v2004_v4 = vpop.f32.mrf.mxu1 }
 0x1c3   : > { %v7967_v19 = vpop.f32.mrf.mxu0 }
 0x1c4   : > { %v2006_v24 = vpop.f32.mrf.mxu1 }
 0x1c5   : > { %v5757_v52 = vpop.f32.mrf.mxu0 }
 0x1c6   : > { %v7970_v11 = vadd.f32 %v5757_v52, %v7894_v18  ;;  %v2009_v44 = vpop.f32.mrf.mxu1 }
 0x1c7   : > { %v7972_v9 = vpop.f32.mrf.mxu0 }
 0x1c8   : > { %v2011_v22 = vpop.f32.mrf.mxu1 }
 0x1c9   : > { %v5760_v63 = vpop.f32.mrf.mxu0 }
 0x1ca   : > { %v7975_v20 = vadd.f32 %v5760_v63, %v7908_v39  ;;  %v2014_v43 = vpop.f32.mrf.mxu1 }
 0x1cb   : > { %v7977_v31 = vpop.f32.mrf.mxu0 }
 0x1cc   : > { %9695 = vst [vmem:[#allocation8_spill] sm:$0xff] %v7975_v20  ;;  %9696 = vst [vmem:[#allocation13_spill] sm:$0xff] %v7977_v31  ;;  %v2016_v3 = vpop.f32.mrf.mxu1 }
 0x1cd   : > { %v5763_v13 = vpop.f32.mrf.mxu0 }
 0x1ce   : > { %v7979_v2 = vadd.f32 %v5763_v13, %v1534_v55  ;;  %v2019_v29 = vpop.f32.mrf.mxu1 }
 0x1cf   : > { %v7981_v32 = vpop.f32.mrf.mxu0 }
 0x1d0   : > { %9697 = vst [vmem:[#allocation11_spill] sm:$0xff] %v7979_v2  ;;  %9698 = vst [vmem:[#allocation14_spill] sm:$0xff] %v7981_v32  ;;  %v2021_v18 = vpop.f32.mrf.mxu1 }
 0x1d1   : > { %v5766_v24 = vpop.f32.mrf.mxu0 }
 0x1d2   : > { %v7983_v52 = vadd.f32 %v5766_v24, %v1544_v12  ;;  %v2024_v58 = vpop.f32.mrf.mxu1  ;;  %v7996_v12 = vld [vmem:[%s9501_s2] ss:$0 sm:$0xff] }
 0x1d3   : > { %v7985_v22 = vpop.f32.mrf.mxu0 }
 0x1d4   : > { %9699 = vst [vmem:[#allocation12_spill] sm:$0xff] %v7983_v52  ;;  %9700 = vst [vmem:[#allocation17_spill] sm:$0xff] %v7985_v22  ;;  %v2026_v49 = vpop.f32.mrf.mxu1 }
 0x1d5   : > { %v5769_v39 = vpop.f32.mrf.mxu0  ;;  %v1624_v49 = vadd.f32 %v7902_v8, %v7569_v50 }
 0x1d6   : > { %v7987_v63 = vadd.f32 %v5769_v39, %v1554_v1  ;;  %v2029_v28 = vpop.f32.mrf.mxu1 }
 0x1d7   : > { %v7989_v20 = vpop.f32.mrf.mxu0 }
 0x1d8   : > { %9701 = vst [vmem:[#allocation15_spill] sm:$0xff] %v7987_v63  ;;  %9702 = vst [vmem:[#allocation18_spill] sm:$0xff] %v7989_v20  ;;  %v2031_v3 = vpop.f32.mrf.mxu1 }
 0x1d9   : > { %v5804_v55 = vpop.f32.mrf.mxu0 }
 0x1da   : > { %v7991_v13 = vpop.f32.mrf.mxu1  ;;  %v2225_v2 = vadd.f32 %v5804_v55, %v1999_v17  ;;  %v1634_v55 = vadd.f32 %v7910_v56, %v7604_v47 }
 0x1db   : > { %v2219_v18 = vpop.f32.mrf.mxu0 }
 0x1dc   : > { %v2379_v1 = vadd.f32 %v2225_v2, %v7898_v51  ;;  %v2036_v24 = vpop.f32.mrf.mxu1  ;;  %v2220_v39 = vadd.f32 %v2219_v18, %v1994_v26 }
 0x1dd   : > { %v5807_v63 = vpop.f32.mrf.mxu0 }
 0x1de   : > { %v2418_v3 = vadd.f32 %v7996_v12, %v2379_v1  ;;  %v2378_v20 = vadd.f32 %v2220_v39, %v1624_v49  ;;  %v2039_v52 = vpop.f32.mrf.mxu1  ;;  %v2235_v22 = vadd.f32 %v5807_v63, %v2009_v44  ;;  %v2943_v1 = vld [vmem:[%s9502_s3 + $0x170] sm:$0xff] }
 0x1df   : > { %v2229_v17 = vpop.f32.mrf.mxu0 }
 0x1e0   : > { %v2417_v32 = vadd.f32 %v7996_v12, %v2378_v20  ;;  %v2381_v31 = vadd.f32 %v2235_v22, %v7906_v54  ;;  %v2041_v62 = vpop.f32.mrf.mxu1  ;;  %v2230_v50 = vadd.f32 %v2229_v17, %v2004_v4  ;;  %v8006_v8 = vmax.f32 %v2418_v3, 0.0 }
 0x1e1   : > { %v5810_v51 = vpop.f32.mrf.mxu0  ;;  %v1644_v20 = vadd.f32 %v7918_v5, %v7639_v57  ;;  %v1654_v57 = vadd.f32 %v7924_v60, %v7673_v33 }
 0x1e2   : > { %v8008_v26 = vmax.f32 %v2417_v32, 0.0  ;;  %v2420_v2 = vadd.f32 %v7996_v12, %v2381_v31  ;;  %v2380_v18 = vadd.f32 %v2230_v50, %v1634_v55  ;;  %v8011_v49 = vpop.f32.mrf.mxu1  ;;  %v2245_v44 = vadd.f32 %v5810_v51, %v2019_v29 }
 0x1e3   : > { %v2239_v63 = vpop.f32.mrf.mxu0  ;;  %v8025_v22 = vrot.slane %v8006_v8, 1  ;;  %v2514_v55 = vrot.slane %v8006_v8, 7 }
 0x1e4   : > { %v8014_v47 = vrot.slane %v8008_v26, 7  ;;  %v8016_v56 = vmax.f32 %v2420_v2, 0.0  ;;  %v2419_v62 = vadd.f32 %v7996_v12, %v2380_v18  ;;  %v2383_v54 = vadd.f32 %v2245_v44, %v7914_v16  ;;  %v2046_v4 = vpop.f32.mrf.mxu1  ;;  %3154 = vmatprep.mubr.f32.mxu0 %v8008_v26  ;;  %v2912_v44 = vld [vmem:[%s9502_s3 + $0x78] sm:$0xff] }
 0x1e5   : > { %v2240_v31 = vadd.f32 %v2239_v63, %v2014_v43  ;;  %v5813_v32 = vpop.f32.mrf.mxu0  ;;  %v2673_v29 = vrot.slane %v8008_v26, 1 }
 0x1e6   : > { %v8030_v24 = vmax.f32 %v2419_v62, 0.0  ;;  %v2422_v16 = vadd.f32 %v7996_v12, %v2383_v54  ;;  %v2049_v39 = vpop.f32.mrf.mxu1  ;;  %v2255_v3 = vadd.f32 %v5813_v32, %v2029_v28  ;;  %5185 = vmatmul.mubr.msk.f32.vlgmr.msra.gmra.mxu0 %vm6590_vm2, %v8014_v47  ;;  %v8049_v60 = vrot.slane %v8016_v56, 1 }
 0x1e7   : > { %v2382_v5 = vadd.f32 %v2240_v31, %v1644_v20  ;;  %v2249_v43 = vpop.f32.mrf.mxu0  ;;  %3159 = vmatprep.mubr.f32.mxu0 %v8006_v8  ;;  %v8041_v17 = vsel %vm464_vm0, %v2673_v29, %v8025_v22  ;;  %5931 = vmatpush3.msra.mxu0 %v7860_v36  ;;  %v1664_v31 = vadd.f32 %v7932_v14, %v7715_v41 }
 0x1e8   : > { %v2385_v28 = vadd.f32 %v2255_v3, %v7922_v42  ;;  %v2051_v50 = vpop.f32.mrf.mxu1  ;;  %v2250_v51 = vadd.f32 %v2249_v43, %v2024_v58  ;;  %5882 = vmatprep.mubr.f32.mxu1 %v8041_v17  ;;  %v2676_v33 = vrot.slane %v8030_v24, 1  ;;  %5932 = vmatprep.subr.mxu0 %v2943_v1  ;;  %v8051_v2 = vmax.f32 %v2422_v16, 0.0  ;;  %v2942_v58 = vld [vmem:[%s9502_s3 + $0x168] sm:$0xff] }
 0x1e9   : > { %v2421_v18 = vadd.f32 %v7996_v12, %v2382_v5  ;;  %5883 = vmatmul.mubr.msk.f32.vlgmr.msra.gmra.mxu1 %vm464_vm0, %v8025_v22  ;;  %v5816_v36 = vpop.f32.mrf.mxu0  ;;  %v8058_v42 = vsel %vm302_vm1, %v8014_v47, %v2514_v55  ;;  %5933 = vmatpush3.msra.mxu0 %v2943_v1  ;;  %v8087_v41 = vrot.slane %v8030_v24, 7 }
 0x1ea   : > { %v2424_v63 = vadd.f32 %v7996_v12, %v2385_v28  ;;  %v2384_v62 = vadd.f32 %v2250_v51, %v1654_v57  ;;  %v8067_v54 = vpop.f32.mrf.mxu1  ;;  %v2265_v4 = vadd.f32 %v5816_v36, %v2039_v52  ;;  %3160 = vmatmul.mubr.f32.gmra.mxu0 %v8058_v42  ;;  %v8072_v20 = vsel %vm464_vm0, %v2676_v33, %v8049_v60  ;;  %v2941_v52 = vld [vmem:[%s9502_s3 + $0x160] sm:$0xff] }
 0x1eb   : > { %v8076_v32 = vmax.f32 %v2421_v18, 0.0  ;;  %v2259_v29 = vpop.f32.mrf.mxu0  ;;  %3164 = vmatprep.mubr.f32.mxu0 %v8030_v24  ;;  %5885 = vmatprep.mubr.f32.mxu1 %v8072_v20  ;;  %v8095_v55 = vrot.slane %v8051_v2, 1  ;;  %v1674_v18 = vadd.f32 %v7938_v25, %v7753_v21  ;;  %v2911_v21 = vld [vmem:[%s9502_s3 + $0x70] sm:$0xff] }
 0x1ec   : > { %v2423_v1 = vadd.f32 %v7996_v12, %v2384_v62  ;;  %v2387_v16 = vadd.f32 %v2265_v4, %v7928_v46  ;;  %v2056_v3 = vpop.f32.mrf.mxu1  ;;  %v2260_v57 = vadd.f32 %v2259_v29, %v7991_v13  ;;  %5934 = vmatprep.subr.mxu0 %v2942_v58  ;;  %3541 = vmatpush1.msra.mxu1 %v2912_v44  ;;  %v8089_v14 = vmax.f32 %v2424_v63, 0.0  ;;  %v2940_v46 = vld [vmem:[%s9502_s3 + $0x158] sm:$0xff] }
 0x1ed   : > { %5886 = vmatmul.mubr.msk.f32.gmra.mxu1 %vm464_vm0, %v8049_v60  ;;  %v5819_v5 = vpop.f32.mrf.mxu0  ;;  %v2679_v43 = vrot.slane %v8076_v32, 1  ;;  %5935 = vmatpush3.msra.mxu0 %v2942_v58  ;;  %v2517_v44 = vrot.slane %v8016_v56, 7 }
 0x1ee   : > { %v8100_v13 = vmax.f32 %v2423_v1, 0.0  ;;  %v2426_v28 = vadd.f32 %v7996_v12, %v2387_v16  ;;  %v2386_v50 = vadd.f32 %v2260_v57, %v1664_v31  ;;  %v2059_v51 = vpop.f32.mrf.mxu1  ;;  %v2275_v33 = vadd.f32 %v5819_v5, %v2049_v39  ;;  %5187 = vmatmul.mubr.msk.f32.gmra.mxu0 %vm6590_vm2, %v8087_v41  ;;  %5936 = vmatprep.subr.mxu0 %v2941_v52  ;;  %v8141_v5 = vld [vmem:[%s9502_s3 + $0x150] sm:$0xff] }
 0x1ef   : > { %v2269_v36 = vpop.f32.mrf.mxu0  ;;  %3169 = vmatprep.mubr.f32.mxu0 %v8016_v56  ;;  %v8111_v58 = vsel %vm464_vm0, %v2679_v43, %v8095_v55  ;;  %5937 = vmatpush3.msra.mxu0 %v2941_v52  ;;  %v8127_v29 = vsel %vm302_vm1, %v8087_v41, %v2517_v44  ;;  %v1684_v43 = vadd.f32 %v7946_v15, %v7791_v40 }
 0x1f0   : > { %v2425_v39 = vadd.f32 %v7996_v12, %v2386_v50  ;;  %v2389_v63 = vadd.f32 %v2275_v33, %v7936_v53  ;;  %v2061_v62 = vpop.f32.mrf.mxu1  ;;  %v2270_v4 = vadd.f32 %v2269_v36, %v8011_v49  ;;  %5888 = vmatprep.mubr.f32.mxu1 %v8111_v58  ;;  %5938 = vmatprep.subr.mxu0 %v2940_v46  ;;  %v8121_v25 = vmax.f32 %v2426_v28, 0.0 }
 0x1f1   : > { %5889 = vmatmul.mubr.msk.f32.gmra.mxu1 %vm464_vm0, %v8095_v55  ;;  %v5822_v31 = vpop.f32.mrf.mxu0  ;;  %v2682_v53 = vrot.slane %v8100_v13, 1  ;;  %v8131_v49 = vrot.slane %v8089_v14, 1  ;;  %5939 = vmatpush3.msra.mxu0 %v2940_v46  ;;  %v8151_v50 = vrot.slane %v8076_v32, 7 }
 0x1f2   : > { %v8133_v52 = vmax.f32 %v2425_v39, 0.0  ;;  %v2428_v1 = vadd.f32 %v7996_v12, %v2389_v63  ;;  %v2388_v16 = vadd.f32 %v2270_v4, %v1674_v18  ;;  %v2064_v3 = vpop.f32.mrf.mxu1  ;;  %v2285_v57 = vadd.f32 %v5822_v31, %v2059_v51  ;;  %3170 = vmatmul.mubr.f32.gmra.mxu0 %v8127_v29  ;;  %3542 = vmatprep.subr.mxu1 %v9643_v10  ;;  %v2910_v51 = vld [vmem:[%s9502_s3 + $0x68] sm:$0xff] }
 0x1f3   : > { %v2279_v46 = vpop.f32.mrf.mxu0  ;;  %3174 = vmatprep.mubr.f32.mxu0 %v8076_v32  ;;  %v8148_v28 = vsel %vm464_vm0, %v2682_v53, %v8131_v49  ;;  %3543 = vmatpush1.msra.mxu1 %v2911_v21  ;;  %v8167_v63 = vrot.slane %v8121_v25, 1 }
 0x1f4   : > { %v8156_v33 = vmax.f32 %v2428_v1, 0.0  ;;  %v2427_v18 = vadd.f32 %v7996_v12, %v2388_v16  ;;  %v2391_v40 = vadd.f32 %v2285_v57, %v7942_v37  ;;  %v2066_v15 = vpop.f32.mrf.mxu1  ;;  %v2280_v36 = vadd.f32 %v2279_v46, %v8067_v54  ;;  %5891 = vmatprep.mubr.f32.mxu1 %v8148_v28  ;;  %3544 = vmatprep.subr.mxu1 %v9643_v10  ;;  %v2909_v37 = vld [vmem:[%s9502_s3 + $0x60] sm:$0xff]  ;;  %v2908_v57 = vld [vmem:[%s9502_s3 + $0x58] sm:$0xff] }
 0x1f5   : > { %5892 = vmatmul.mubr.msk.f32.gmra.mxu1 %vm464_vm0, %v8131_v49  ;;  %v5825_v44 = vpop.f32.mrf.mxu0  ;;  %v2685_v39 = vrot.slane %v8133_v52, 1  ;;  %9703 = vst [vmem:[#allocation16_spill] sm:$0xff] %v8167_v63  ;;  %5940 = vmatprep.subr.mxu0 %v8141_v5  ;;  %v1694_v54 = vadd.f32 %v7952_v59, %v7828_v45  ;;  %v2520_v45 = vrot.slane %v8051_v2, 7 }
 0x1f6   : > { %v8175_v62 = vmax.f32 %v2427_v18, 0.0  ;;  %v2430_v4 = vadd.f32 %v7996_v12, %v2391_v40  ;;  %v2390_v21 = vadd.f32 %v2280_v36, %v1684_v43  ;;  %v2069_v31 = vpop.f32.mrf.mxu1  ;;  %5189 = vmatmul.mubr.msk.f32.gmra.mxu0 %vm6590_vm2, %v8151_v50  ;;  %3545 = vmatpush1.msra.mxu1 %v2910_v51  ;;  %v8188_v59 = vrot.slane %v8156_v33, 1 }
 0x1f7   : > { %v2295_v53 = vadd.f32 %v5825_v44, %v2069_v31  ;;  %v2289_v1 = vpop.f32.mrf.mxu0  ;;  %3179 = vmatprep.mubr.f32.mxu0 %v8051_v2  ;;  %v8184_v16 = vsel %vm464_vm0, %v2685_v39, %v8167_v63  ;;  %3546 = vmatprep.subr.mxu1 %v9643_v10  ;;  %v8204_v44 = vsel %vm302_vm1, %v8151_v50, %v2520_v45 }
 0x1f8   : > { %9704 = vst [vmem:[#allocation21_spill] sm:$0xff] %v8188_v59  ;;  %v8194_v43 = vmax.f32 %v2430_v4, 0.0  ;;  %v2429_v46 = vadd.f32 %v7996_v12, %v2390_v21  ;;  %v2071_v51 = vpop.f32.mrf.mxu1  ;;  %v2290_v18 = vadd.f32 %v2289_v1, %v2064_v3  ;;  %5894 = vmatprep.mubr.f32.mxu1 %v8184_v16  ;;  %v2688_v40 = vrot.slane %v8175_v62, 1  ;;  %3547 = vmatpush1.msra.mxu1 %v2909_v37  ;;  %v2907_v1 = vld [vmem:[%s9502_s3 + $0x50] sm:$0xff] }
 0x1f9   : > { %v2393_v15 = vadd.f32 %v2295_v53, %v7950_v38  ;;  %5895 = vmatmul.mubr.msk.f32.gmra.mxu1 %vm464_vm0, %v8167_v63  ;;  %v5828_v36 = vpop.f32.mrf.mxu0  ;;  %3548 = vmatprep.subr.mxu1 %v9643_v10  ;;  %v2938_v38 = vld [vmem:[%s9502_s3 + $0x148] sm:$0xff]  ;;  %v1704_v21 = vadd.f32 %v7957_v61, %v7864_v23 }
 0x1fa   : > { %9705 = vst [vmem:[#allocation20_spill] sm:$0xff] %v8194_v43  ;;  %v8207_v39 = vmax.f32 %v2429_v46, 0.0  ;;  %v2392_v3 = vadd.f32 %v2290_v18, %v1694_v54  ;;  %v2074_v4 = vpop.f32.mrf.mxu1  ;;  %3180 = vmatmul.mubr.f32.gmra.mxu0 %v8204_v44  ;;  %v8212_v37 = vsel %vm464_vm0, %v2688_v40, %v8188_v59  ;;  %3549 = vmatpush1.msra.mxu1 %v2908_v57  ;;  %v8223_v54 = vrot.slane %v8100_v13, 7 }
 0x1fb   : > { %9706 = vst [vmem:[#allocation19_spill] sm:$0xff] %v8212_v37  ;;  %v2432_v31 = vadd.f32 %v7996_v12, %v2393_v15  ;;  %v2299_v53 = vpop.f32.mrf.mxu0  ;;  %3184 = vmatprep.mubr.f32.mxu0 %v8100_v13  ;;  %5897 = vmatprep.mubr.f32.mxu1 %v8212_v37  ;;  %v8231_v61 = vrot.slane %v8194_v43, 1 }
 0x1fc   : > { %v2431_v45 = vadd.f32 %v7996_v12, %v2392_v3  ;;  %v2076_v57 = vpop.f32.mrf.mxu1  ;;  %v2300_v46 = vadd.f32 %v2299_v53, %v2074_v4  ;;  %v2691_v23 = vrot.slane %v8207_v39, 1  ;;  %5941 = vmatpush3.msra.mxu0 %v8141_v5  ;;  %3550 = vmatprep.subr.mxu1 %v9643_v10  ;;  %v2937_v4 = vld [vmem:[%s9502_s3 + $0x140] sm:$0xff]  ;;  %v2906_v53 = vld [vmem:[%s9502_s3 + $0x48] sm:$0xff] }
 0x1fd   : > { %9707 = vst [vmem:[#allocation6_spill] sm:$0xff] %v8231_v61  ;;  %v8235_v51 = vmax.f32 %v2432_v31, 0.0  ;;  %5898 = vmatmul.mubr.msk.f32.gmra.mxu1 %vm464_vm0, %v8188_v59  ;;  %v5831_v18 = vpop.f32.mrf.mxu0  ;;  %5942 = vmatprep.subr.mxu0 %v2938_v38 }
 0x1fe   : > { %v8239_v40 = vmax.f32 %v2431_v45, 0.0  ;;  %v2394_v15 = vadd.f32 %v2300_v46, %v1704_v21  ;;  %v2079_v3 = vpop.f32.mrf.mxu1  ;;  %5191 = vmatmul.mubr.msk.f32.gmra.mxu0 %vm6590_vm2, %v8223_v54  ;;  %v8246_v5 = vsel %vm464_vm0, %v2691_v23, %v8231_v61  ;;  %3551 = vmatpush1.msra.mxu1 %v2907_v1  ;;  %v2523_v21 = vrot.slane %v8089_v14, 7 }
 0x1ff   : > { %9708 = vst [vmem:[#allocation22_spill] sm:$0xff] %v8235_v51  ;;  %9710 = vst [vmem:[#allocation24_spill] sm:$0xff] %v8246_v5  ;;  %v2305_v31 = vadd.f32 %v5828_v36, %v2079_v3  ;;  %3189 = vmatprep.mubr.f32.mxu0 %v8089_v14  ;;  %5900 = vmatprep.mubr.f32.mxu1 %v8246_v5  ;;  %v2309_v46 = vpop.f32.mrf.mxu0  ;;  %v8260_v23 = vrot.slane %v8235_v51, 1  ;;  %v8289_v5 = vrot.slane %v8133_v52, 7 }
 0x200   : > { %9709 = vst [vmem:[#allocation23_spill] sm:$0xff] %v8239_v40  ;;  %v2433_v45 = vadd.f32 %v7996_v12, %v2394_v15  ;;  %v2081_v57 = vpop.f32.mrf.mxu1  ;;  %v2694_v1 = vrot.slane %v8239_v40, 1  ;;  %3552 = vmatprep.subr.mxu1 %v9643_v10  ;;  %5943 = vmatpush3.msra.mxu0 %v2938_v38  ;;  %v8268_v3 = vsel %vm302_vm1, %v8223_v54, %v2523_v21 }
 0x201   : > { %9711 = vst [vmem:[#allocation25_spill] sm:$0xff] %v8260_v23  ;;  %v2395_v36 = vadd.f32 %v2305_v31, %v7955_v7  ;;  %5901 = vmatmul.mubr.msk.f32.gmra.mxu1 %vm464_vm0, %v8231_v61  ;;  %5944 = vmatprep.subr.mxu0 %v2937_v4  ;;  %v2936_v7 = vld [vmem:[%s9502_s3 + $0x138] sm:$0xff]  ;;  %v1714_v38 = vadd.f32 %v7962_v48, %v7874_v0  ;;  %v5834_v59 = vpop.f32.mrf.mxu0 }
 0x202   : > { %v2084_v15 = vpop.f32.mrf.mxu1  ;;  %3190 = vmatmul.mubr.f32.gmra.mxu0 %v8268_v3  ;;  %v8273_v57 = vsel %vm464_vm0, %v2694_v1, %v8260_v23  ;;  %3553 = vmatpush1.msra.mxu1 %v2906_v53  ;;  %v8280_v31 = vmax.f32 %v2433_v45, 0.0  ;;  %v2905_v53 = vld [vmem:[%s9502_s3 + $0x40] sm:$0xff]  ;;  %v2904_v45 = vld [vmem:[%s9502_s3 + $0x38] sm:$0xff] }
 0x203   : > { %9712 = vst [vmem:[#allocation26_spill] sm:$0xff] %v8273_v57  ;;  %v2434_v21 = vadd.f32 %v7996_v12, %v2395_v36  ;;  %v2310_v61 = vadd.f32 %v2309_v46, %v2084_v15  ;;  %3194 = vmatprep.mubr.f32.mxu0 %v8133_v52  ;;  %5903 = vmatprep.mubr.f32.mxu1 %v8273_v57  ;;  %v2526_v36 = vrot.slane %v8121_v25, 7 }
 0x204   : > { %9713 = vst [vmem:[#allocation27_spill] sm:$0xff] %v8280_v31  ;;  %v2086_v1 = vpop.f32.mrf.mxu1  ;;  %3554 = vmatprep.subr.mxu1 %v9643_v10  ;;  %5945 = vmatpush3.msra.mxu0 %v2937_v4 }
 0x205   : > { %v8292_v0 = vmax.f32 %v2434_v21, 0.0  ;;  %v2396_v48 = vadd.f32 %v2310_v61, %v1714_v38  ;;  %5904 = vmatmul.mubr.msk.f32.gmra.mxu1 %vm464_vm0, %v8260_v23  ;;  %5946 = vmatprep.subr.mxu0 %v2936_v7  ;;  %v2935_v61 = vld [vmem:[%s9502_s3 + $0x130] sm:$0xff]  ;;  %v2697_v38 = vrot.slane %v8280_v31, 1  ;;  %v2319_v23 = vpop.f32.mrf.mxu0 }
 0x206   : > { %v2089_v46 = vpop.f32.mrf.mxu1  ;;  %5193 = vmatmul.mubr.msk.f32.gmra.mxu0 %vm6590_vm2, %v8289_v5  ;;  %3555 = vmatpush1.msra.mxu1 %v2905_v53 }
 0x207   : > { %9714 = vst [vmem:[#allocation28_spill] sm:$0xff] %v8292_v0  ;;  %v2435_v4 = vadd.f32 %v7996_v12, %v2396_v48  ;;  %v2315_v15 = vadd.f32 %v5831_v18, %v2089_v46  ;;  %3199 = vmatprep.mubr.f32.mxu0 %v8121_v25  ;;  %v8310_v21 = vrot.slane %v8292_v0, 1  ;;  %3556 = vmatprep.subr.mxu1 %v9643_v10  ;;  %v2903_v48 = vld [vmem:[%s9502_s3 + $0x30] sm:$0xff]  ;;  %v5837_v37 = vpop.f32.mrf.mxu0 }
 0x208   : > { %v2091_v1 = vpop.f32.mrf.mxu1  ;;  %3557 = vmatpush1.msra.mxu1 %v2904_v45  ;;  %5947 = vmatpush3.msra.mxu0 %v2936_v7  ;;  %v8320_v18 = vsel %vm302_vm1, %v8289_v5, %v2526_v36  ;;  %v1724_v7 = vadd.f32 %v7967_v19, %v7882_v30 }
 0x209   : > { %9715 = vst [vmem:[#allocation4_spill] sm:$0xff] %v8310_v21  ;;  %v2397_v53 = vadd.f32 %v2315_v15, %v7960_v35  ;;  %v8316_v57 = vsel %vm464_vm0, %v2697_v38, %v8310_v21  ;;  %3558 = vmatprep.subr.mxu1 %v9643_v10  ;;  %5948 = vmatprep.subr.mxu0 %v2935_v61  ;;  %v2934_v35 = vld [vmem:[%s9502_s3 + $0x128] sm:$0xff]  ;;  %v8333_v45 = vmax.f32 %v2435_v4, 0.0 }
 0x20a   : > { %9716 = vst [vmem:[#allocation29_spill] sm:$0xff] %v8316_v57  ;;  %v2094_v46 = vpop.f32.mrf.mxu1  ;;  %5906 = vmatprep.mubr.f32.mxu1 %v8316_v57  ;;  %3200 = vmatmul.mubr.f32.gmra.mxu0 %v8320_v18  ;;  %v2902_v38 = vld [vmem:[%s9502_s3 + $0x28] sm:$0xff]  ;;  %v8343_v57 = vrot.slane %v8175_v62, 7 }
 0x20b   : > { %9717 = vst [vmem:[#allocation3_spill] sm:$0xff] %v8333_v45  ;;  %v2436_v36 = vadd.f32 %v7996_v12, %v2397_v53  ;;  %v2320_v15 = vadd.f32 %v2319_v23, %v2094_v46  ;;  %5907 = vmatmul.mubr.msk.f32.gmra.mxu1 %vm464_vm0, %v8310_v21  ;;  %3204 = vmatprep.mubr.f32.mxu0 %v8175_v62  ;;  %v2901_v23 = vld [vmem:[%s9502_s3 + $0x20] sm:$0xff]  ;;  %v2529_v53 = vrot.slane %v8156_v33, 7 }
 0x20c   : > { %v2096_v1 = vpop.f32.mrf.mxu1  ;;  %3559 = vmatpush1.msra.mxu1 %v2903_v48  ;;  %5949 = vmatpush3.msra.mxu0 %v2935_v61  ;;  %v2933_v61 = vld [vmem:[%s9502_s3 + $0x120] sm:$0xff] }
 0x20d   : > { %v8345_v30 = vmax.f32 %v2436_v36, 0.0  ;;  %v2398_v19 = vadd.f32 %v2320_v15, %v1724_v7  ;;  %3560 = vmatprep.subr.mxu1 %v9643_v10  ;;  %5950 = vmatprep.subr.mxu0 %v2934_v35  ;;  %v2700_v7 = vrot.slane %v8333_v45, 1  ;;  %v2329_v1 = vpop.f32.mrf.mxu0 }
 0x20e   : > { %v2099_v4 = vpop.f32.mrf.mxu1  ;;  %5195 = vmatmul.mubr.msk.f32.gmra.mxu0 %vm6590_vm2, %v8343_v57  ;;  %3561 = vmatpush1.msra.mxu1 %v2902_v38 }
 0x20f   : > { %9718 = vst [vmem:[#allocation30_spill] sm:$0xff] %v8345_v30  ;;  %v2437_v48 = vadd.f32 %v7996_v12, %v2398_v19  ;;  %v2325_v46 = vadd.f32 %v5834_v59, %v2099_v4  ;;  %3209 = vmatprep.mubr.f32.mxu0 %v8156_v33  ;;  %v8362_v36 = vrot.slane %v8345_v30, 1  ;;  %3562 = vmatprep.subr.mxu1 %v9643_v10  ;;  %v2900_v19 = vld [vmem:[%s9502_s3 + $0x18] sm:$0xff]  ;;  %v5840_v63 = vpop.f32.mrf.mxu0 }
 0x210   : > { %v2101_v15 = vpop.f32.mrf.mxu1  ;;  %3563 = vmatpush1.msra.mxu1 %v2901_v23  ;;  %5951 = vmatpush3.msra.mxu0 %v2934_v35  ;;  %v8372_v59 = vsel %vm302_vm1, %v8343_v57, %v2529_v53  ;;  %v1734_v35 = vadd.f32 %v7972_v9, %v7890_v34 }
 0x211   : > { %9719 = vst [vmem:[#allocation31_spill] sm:$0xff] %v8362_v36  ;;  %v2399_v38 = vadd.f32 %v2325_v46, %v7965_v27  ;;  %v8368_v21 = vsel %vm464_vm0, %v2700_v7, %v8362_v36  ;;  %3564 = vmatprep.subr.mxu1 %v9643_v10  ;;  %5952 = vmatprep.subr.mxu0 %v2933_v61  ;;  %v2932_v27 = vld [vmem:[%s9502_s3 + $0x118] sm:$0xff]  ;;  %v8385_v23 = vmax.f32 %v2437_v48, 0.0  ;;  %v2899_v7 = vld [vmem:[%s9502_s3 + $0x10] sm:$0xff]  ;;  %v2898_v48 = vld [vmem:[%s9502_s3 + $0x8] sm:$0xff] }
 0x212   : > { %9720 = vst [vmem:[#allocation32_spill] sm:$0xff] %v8368_v21  ;;  %v2104_v4 = vpop.f32.mrf.mxu1  ;;  %5909 = vmatprep.mubr.f32.mxu1 %v8368_v21  ;;  %3210 = vmatmul.mubr.f32.gmra.mxu0 %v8372_v59  ;;  %v8395_v21 = vrot.slane %v8207_v39, 7 }
 0x213   : > { %9721 = vst [vmem:[#allocation33_spill] sm:$0xff] %v8385_v23  ;;  %v2438_v53 = vadd.f32 %v7996_v12, %v2399_v38  ;;  %v2330_v46 = vadd.f32 %v2329_v1, %v2104_v4  ;;  %5910 = vmatmul.mubr.msk.f32.gmra.mxu1 %vm464_vm0, %v8362_v36  ;;  %3214 = vmatprep.mubr.f32.mxu0 %v8207_v39  ;;  %v2532_v38 = vrot.slane %v8194_v43, 7 }
 0x214   : > { %v2106_v15 = vpop.f32.mrf.mxu1  ;;  %9722 = vst [vmem:[#allocation34_spill] sm:$0xff] %v8395_v21  ;;  %3565 = vmatpush1.msra.mxu1 %v2900_v19  ;;  %5953 = vmatpush3.msra.mxu0 %v2933_v61  ;;  %v2931_v61 = vld [vmem:[%s9502_s3 + $0x110] sm:$0xff] }
 0x215   : > { %v8397_v34 = vmax.f32 %v2438_v53, 0.0  ;;  %v2400_v9 = vadd.f32 %v2330_v46, %v1734_v35  ;;  %3566 = vmatprep.subr.mxu1 %v9643_v10  ;;  %5954 = vmatprep.subr.mxu0 %v2932_v27  ;;  %v2703_v35 = vrot.slane %v8385_v23, 1  ;;  %v2339_v15 = vpop.f32.mrf.mxu0 }
 0x216   : > { %v2109_v1 = vpop.f32.mrf.mxu1  ;;  %5197 = vmatmul.mubr.msk.f32.gmra.mxu0 %vm6590_vm2, %v8395_v21  ;;  %3567 = vmatpush1.msra.mxu1 %v2899_v7 }
 0x217   : > { %v2439_v19 = vadd.f32 %v7996_v12, %v2400_v9  ;;  %v2335_v4 = vadd.f32 %v5837_v37, %v2109_v1  ;;  %3219 = vmatprep.mubr.f32.mxu0 %v8194_v43  ;;  %v8414_v53 = vrot.slane %v8397_v34, 1  ;;  %3568 = vmatprep.subr.mxu1 %v9643_v10  ;;  %v8424_v37 = vsel %vm302_vm1, %v8395_v21, %v2532_v38  ;;  %v2897_v9 = vld [vmem:[%s9502_s3] sm:$0xff]  ;;  %v5843_v21 = vpop.f32.mrf.mxu0 }
 0x218   : > { %v2111_v46 = vpop.f32.mrf.mxu1  ;;  %3569 = vmatpush1.msra.mxu1 %v2898_v48  ;;  %5955 = vmatpush3.msra.mxu0 %v2932_v27  ;;  %9725 = vst [vmem:[#allocation37_spill] sm:$0xff] %v8424_v37  ;;  %v9726_v27 = vld [vmem:[#allocation5_spill] sm:$0xff]  ;;  %v8447_v43 = vrot.slane %v8239_v40, 7 }
 0x219   : > { %9723 = vst [vmem:[#allocation35_spill] sm:$0xff] %v8414_v53  ;;  %v2401_v7 = vadd.f32 %v2335_v4, %v7970_v11  ;;  %v8420_v36 = vsel %vm464_vm0, %v2703_v35, %v8414_v53  ;;  %3570 = vmatprep.subr.mxu1 %v9643_v10  ;;  %5956 = vmatprep.subr.mxu0 %v2931_v61  ;;  %v2930_v11 = vld [vmem:[%s9502_s3 + $0x108] sm:$0xff]  ;;  %v9727_v48 = vld [vmem:[#allocation13_spill] sm:$0xff]  ;;  %v8437_v4 = vmax.f32 %v2439_v19, 0.0 }
 0x21a   : > { %9724 = vst [vmem:[#allocation36_spill] sm:$0xff] %v8420_v36  ;;  %v2114_v1 = vpop.f32.mrf.mxu1  ;;  %5912 = vmatprep.mubr.f32.mxu1 %v8420_v36  ;;  %3220 = vmatmul.mubr.f32.gmra.mxu0 %v8424_v37  ;;  %v1744_v38 = vadd.f32 %v9727_v48, %v9726_v27  ;;  %v2928_v36 = vld [vmem:[%s9502_s3 + $0xf8] sm:$0xff]  ;;  %9728 = vst [vmem:[#allocation5_spill] sm:$0xff] %v8447_v43 }
 0x21b   : > { %v2440_v35 = vadd.f32 %v7996_v12, %v2401_v7  ;;  %v2340_v46 = vadd.f32 %v2339_v15, %v2114_v1  ;;  %5913 = vmatmul.mubr.msk.f32.gmra.mxu1 %vm464_vm0, %v8414_v53  ;;  %3224 = vmatprep.mubr.f32.mxu0 %v8239_v40  ;;  %v2927_v15 = vld [vmem:[%s9502_s3 + $0xf0] sm:$0xff]  ;;  %v2706_v48 = vrot.slane %v8437_v4, 1 }
 0x21c   : > { %v2116_v37 = vpop.f32.mrf.mxu1  ;;  %3571 = vmatpush1.msra.mxu1 %v2897_v9  ;;  %5957 = vmatpush3.msra.mxu0 %v2931_v61  ;;  %v2929_v61 = vld [vmem:[%s9502_s3 + $0x100] sm:$0xff] }
 0x21d   : > { %v8449_v19 = vmax.f32 %v2440_v35, 0.0  ;;  %v2402_v7 = vadd.f32 %v2340_v46, %v1744_v38  ;;  %3572 = vmatprep.subr.mxu1 %v9643_v10  ;;  %5958 = vmatprep.subr.mxu0 %v2930_v11  ;;  %v2535_v37 = vrot.slane %v8235_v51, 7  ;;  %v2349_v46 = vpop.f32.mrf.mxu0 }
 0x21e   : > { %v2119_v1 = vpop.f32.mrf.mxu1  ;;  %5199 = vmatmul.mubr.msk.f32.gmra.mxu0 %vm6590_vm2, %v8447_v43  ;;  %3573 = vmatpush2.msra.mxu1 %v2928_v36  ;;  %v9731_v36 = vld [vmem:[#allocation8_spill] sm:$0xff] }
 0x21f   : > { %9729 = vst [vmem:[#allocation13_spill] sm:$0xff] %v8449_v19  ;;  %v2441_v9 = vadd.f32 %v7996_v12, %v2402_v7  ;;  %v2345_v27 = vadd.f32 %v5840_v63, %v2119_v1  ;;  %3229 = vmatprep.mubr.f32.mxu0 %v8235_v51  ;;  %v8466_v38 = vrot.slane %v8449_v19, 1  ;;  %3574 = vmatprep.subr.mxu1 %v9643_v10  ;;  %v2926_v7 = vld [vmem:[%s9502_s3 + $0xe8] sm:$0xff]  ;;  %v5846_v51 = vpop.f32.mrf.mxu0 }
 0x220   : > { %v2121_v35 = vpop.f32.mrf.mxu1  ;;  %3575 = vmatpush2.msra.mxu1 %v2927_v15  ;;  %5959 = vmatpush3.msra.mxu0 %v2930_v11  ;;  %v8476_v63 = vsel %vm302_vm1, %v8447_v43, %v2535_v37  ;;  %v9734_v11 = vld [vmem:[#allocation9_spill] sm:$0xff]  ;;  %v9735_v15 = vld [vmem:[#allocation14_spill] sm:$0xff] }
 0x221   : > { %9730 = vst [vmem:[#allocation38_spill] sm:$0xff] %v8466_v38  ;;  %v2403_v53 = vadd.f32 %v2345_v27, %v9731_v36  ;;  %v8472_v40 = vsel %vm464_vm0, %v2706_v48, %v8466_v38  ;;  %9733 = vst [vmem:[#allocation39_spill] sm:$0xff] %v8476_v63  ;;  %3576 = vmatprep.subr.mxu1 %v9643_v10  ;;  %5960 = vmatprep.subr.mxu0 %v2929_v61  ;;  %v8486_v48 = vmax.f32 %v2441_v9, 0.0  ;;  %v2925_v36 = vld [vmem:[%s9502_s3 + $0xe0] sm:$0xff] }
 0x222   : > { %9732 = vst [vmem:[#allocation8_spill] sm:$0xff] %v8472_v40  ;;  %v2124_v1 = vpop.f32.mrf.mxu1  ;;  %5915 = vmatprep.mubr.f32.mxu1 %v8472_v40  ;;  %3230 = vmatmul.mubr.f32.gmra.mxu0 %v8476_v63  ;;  %v1754_v27 = vadd.f32 %v9735_v15, %v9734_v11  ;;  %v8496_v63 = vrot.slane %v8280_v31, 7 }
 0x223   : > { %v2442_v37 = vadd.f32 %v7996_v12, %v2403_v53  ;;  %v2350_v35 = vadd.f32 %v2349_v46, %v2124_v1  ;;  %5916 = vmatmul.mubr.msk.f32.gmra.mxu1 %vm464_vm0, %v8466_v38  ;;  %3234 = vmatprep.mubr.f32.mxu0 %v8280_v31  ;;  %v2538_v46 = vrot.slane %v8292_v0, 7  ;;  %v2924_v1 = vld [vmem:[%s9502_s3 + $0xd8] sm:$0xff]  ;;  %v2709_v11 = vrot.slane %v8486_v48, 1 }
 0x224   : > { %v2126_v40 = vpop.f32.mrf.mxu1  ;;  %9736 = vst [vmem:[#allocation9_spill] sm:$0xff] %v8496_v63  ;;  %3577 = vmatpush2.msra.mxu1 %v2926_v7  ;;  %5961 = vmatpush3.msra.mxu0 %v2929_v61 }
 0x225   : > { %v8498_v9 = vmax.f32 %v2442_v37, 0.0  ;;  %v2404_v53 = vadd.f32 %v2350_v35, %v1754_v27  ;;  %3578 = vmatprep.subr.mxu1 %v9643_v10  ;;  %4135 = vmatprep.subr.mxu0 %v9643_v10  ;;  %v2359_v37 = vpop.f32.mrf.mxu0  ;;  %v9738_v35 = vld [vmem:[#allocation11_spill] sm:$0xff] }
 0x226   : > { %v2129_v40 = vpop.f32.mrf.mxu1  ;;  %5201 = vmatmul.mubr.msk.f32.gmra.mxu0 %vm6590_vm2, %v8496_v63  ;;  %3579 = vmatpush2.msra.mxu1 %v2925_v36 }
 0x227   : > { %v2443_v61 = vadd.f32 %v7996_v12, %v2404_v53  ;;  %v2355_v7 = vadd.f32 %v5843_v21, %v2129_v40  ;;  %3239 = vmatprep.mubr.f32.mxu0 %v8292_v0  ;;  %v8513_v15 = vrot.slane %v8498_v9, 1  ;;  %3580 = vmatprep.subr.mxu1 %v9643_v10  ;;  %v8523_v21 = vsel %vm302_vm1, %v8496_v63, %v2538_v46  ;;  %v2923_v53 = vld [vmem:[%s9502_s3 + $0xd0] sm:$0xff]  ;;  %v2922_v0 = vld [vmem:[%s9502_s3 + $0xc8] sm:$0xff]  ;;  %v5849_v63 = vpop.f32.mrf.mxu0 }
 0x228   : > { %v2131_v27 = vpop.f32.mrf.mxu1  ;;  %3581 = vmatpush2.msra.mxu1 %v2924_v1  ;;  %9740 = vst [vmem:[#allocation40_spill] sm:$0xff] %v8523_v21  ;;  %v9741_v1 = vld [vmem:[#allocation7_spill] sm:$0xff] }
 0x229   : > { %9737 = vst [vmem:[#allocation14_spill] sm:$0xff] %v8513_v15  ;;  %v2405_v38 = vadd.f32 %v2355_v7, %v9738_v35  ;;  %v8519_v36 = vsel %vm464_vm0, %v2709_v11, %v8513_v15  ;;  %3582 = vmatprep.subr.mxu1 %v9643_v10  ;;  %v9742_v7 = vld [vmem:[#allocation17_spill] sm:$0xff]  ;;  %v8533_v11 = vmax.f32 %v2443_v61, 0.0 }
 0x22a   : > { %9739 = vst [vmem:[#allocation11_spill] sm:$0xff] %v8519_v36  ;;  %v2134_v40 = vpop.f32.mrf.mxu1  ;;  %5918 = vmatprep.mubr.f32.mxu1 %v8519_v36  ;;  %3240 = vmatmul.mubr.f32.gmra.mxu0 %v8523_v21  ;;  %v1764_v27 = vadd.f32 %v9742_v7, %v9741_v1  ;;  %v8543_v21 = vrot.slane %v8333_v45, 7 }
 0x22b   : > { %v2444_v35 = vadd.f32 %v7996_v12, %v2405_v38  ;;  %v2360_v46 = vadd.f32 %v2359_v37, %v2134_v40  ;;  %5919 = vmatmul.mubr.msk.f32.gmra.mxu1 %vm464_vm0, %v8513_v15  ;;  %3244 = vmatprep.mubr.f32.mxu0 %v8333_v45  ;;  %v2541_v38 = vrot.slane %v8345_v30, 7  ;;  %v2921_v37 = vld [vmem:[%s9502_s3 + $0xc0] sm:$0xff]  ;;  %v2712_v7 = vrot.slane %v8533_v11, 1  ;;  %v9745_v15 = vld [vmem:[#allocation12_spill] sm:$0xff] }
 0x22c   : > { %v2136_v36 = vpop.f32.mrf.mxu1  ;;  %9743 = vst [vmem:[#allocation7_spill] sm:$0xff] %v8543_v21  ;;  %3583 = vmatpush2.msra.mxu1 %v2923_v53 }
 0x22d   : > { %v8545_v61 = vmax.f32 %v2444_v35, 0.0  ;;  %v2406_v1 = vadd.f32 %v2360_v46, %v1764_v27  ;;  %3584 = vmatprep.subr.mxu1 %v9643_v10  ;;  %v2369_v46 = vpop.f32.mrf.mxu0 }
 0x22e   : > { %v2139_v40 = vpop.f32.mrf.mxu1  ;;  %5203 = vmatmul.mubr.msk.f32.gmra.mxu0 %vm6590_vm2, %v8543_v21  ;;  %3585 = vmatpush2.msra.mxu1 %v2922_v0 }
 0x22f   : > { %v2445_v36 = vadd.f32 %v7996_v12, %v2406_v1  ;;  %v2365_v53 = vadd.f32 %v5846_v51, %v2139_v40  ;;  %3249 = vmatprep.mubr.f32.mxu0 %v8345_v30  ;;  %v8559_v27 = vrot.slane %v8545_v61, 1  ;;  %3586 = vmatprep.subr.mxu1 %v9643_v10  ;;  %v8569_v51 = vsel %vm302_vm1, %v8543_v21, %v2541_v38  ;;  %v2920_v1 = vld [vmem:[%s9502_s3 + $0xb8] sm:$0xff]  ;;  %v2919_v30 = vld [vmem:[%s9502_s3 + $0xb0] sm:$0xff] }
 0x230   : > { %v2141_v35 = vpop.f32.mrf.mxu1  ;;  %3587 = vmatpush2.msra.mxu1 %v2921_v37  ;;  %9747 = vst [vmem:[#allocation41_spill] sm:$0xff] %v8569_v51  ;;  %v9749_v37 = vld [vmem:[#allocation18_spill] sm:$0xff] }
 0x231   : > { %9744 = vst [vmem:[#allocation17_spill] sm:$0xff] %v8559_v27  ;;  %v2407_v45 = vadd.f32 %v2365_v53, %v9745_v15  ;;  %v8565_v0 = vsel %vm464_vm0, %v2712_v7, %v8559_v27  ;;  %3588 = vmatprep.subr.mxu1 %v9643_v10  ;;  %v9748_v15 = vld [vmem:[#allocation10_spill] sm:$0xff]  ;;  %v8579_v7 = vmax.f32 %v2445_v36, 0.0 }
 0x232   : > { %9746 = vst [vmem:[#allocation12_spill] sm:$0xff] %v8565_v0  ;;  %v2144_v40 = vpop.f32.mrf.mxu1  ;;  %5921 = vmatprep.mubr.f32.mxu1 %v8565_v0  ;;  %3250 = vmatmul.mubr.f32.gmra.mxu0 %v8569_v51  ;;  %v1774_v53 = vadd.f32 %v9749_v37, %v9748_v15  ;;  %v8589_v51 = vrot.slane %v8385_v23, 7 }
 0x233   : > { %v2446_v35 = vadd.f32 %v7996_v12, %v2407_v45  ;;  %v2370_v38 = vadd.f32 %v2369_v46, %v2144_v40  ;;  %5922 = vmatmul.mubr.msk.f32.gmra.mxu1 %vm464_vm0, %v8559_v27  ;;  %3254 = vmatprep.mubr.f32.mxu0 %v8385_v23  ;;  %v2544_v45 = vrot.slane %v8397_v34, 7  ;;  %v2918_v46 = vld [vmem:[%s9502_s3 + $0xa8] sm:$0xff]  ;;  %v2715_v37 = vrot.slane %v8579_v7, 1 }
 0x234   : > { %v2146_v0 = vpop.f32.mrf.mxu1  ;;  %3589 = vmatpush2.msra.mxu1 %v2920_v1 }
 0x235   : > { %v8591_v15 = vmax.f32 %v2446_v35, 0.0  ;;  %v2408_v36 = vadd.f32 %v2370_v38, %v1774_v53  ;;  %3590 = vmatprep.subr.mxu1 %v9643_v10  ;;  %v9751_v38 = vld [vmem:[#allocation15_spill] sm:$0xff] }
 0x236   : > { %v2149_v40 = vpop.f32.mrf.mxu1  ;;  %5205 = vmatmul.mubr.msk.f32.gmra.mxu0 %vm6590_vm2, %v8589_v51  ;;  %3591 = vmatpush2.msra.mxu1 %v2919_v30  ;;  %v8615_v30 = vsel %vm302_vm1, %v8589_v51, %v2544_v45  ;;  %v2916_v45 = vld [vmem:[%s9502_s3 + $0x98] sm:$0xff] }
 0x237   : > { %v2447_v0 = vadd.f32 %v7996_v12, %v2408_v36  ;;  %v2375_v1 = vadd.f32 %v5849_v63, %v2149_v40  ;;  %3259 = vmatprep.mubr.f32.mxu0 %v8397_v34  ;;  %v8605_v53 = vrot.slane %v8591_v15, 1  ;;  %3592 = vmatprep.subr.mxu1 %v9643_v10  ;;  %v2917_v63 = vld [vmem:[%s9502_s3 + $0xa0] sm:$0xff]  ;;  %v8633_v40 = vrot.slane %v8437_v4, 7 }
 0x238   : > { %3593 = vmatpush2.msra.mxu1 %v2918_v46  ;;  %v2151_v35 = vpop.f32.mrf.mxu1 }
 0x239   : > { %9750 = vst [vmem:[#allocation10_spill] sm:$0xff] %v8605_v53  ;;  %v2409_v27 = vadd.f32 %v2375_v1, %v9751_v38  ;;  %v8611_v23 = vsel %vm464_vm0, %v2715_v37, %v8605_v53  ;;  %3594 = vmatprep.subr.mxu1 %v9643_v10  ;;  %v8623_v36 = vmax.f32 %v2447_v0, 0.0  ;;  %9754 = vst [vmem:[#allocation42_spill] sm:$0xff] %v8633_v40 }
 0x23a   : > { %9752 = vst [vmem:[#allocation18_spill] sm:$0xff] %v8611_v23  ;;  %5924 = vmatprep.mubr.f32.mxu1 %v8611_v23  ;;  %3260 = vmatmul.mubr.f32.gmra.mxu0 %v8615_v30 }
 0x23b   : > { %9753 = vst [vmem:[#allocation15_spill] sm:$0xff] %v8623_v36  ;;  %v2448_v46 = vadd.f32 %v7996_v12, %v2409_v27  ;;  %5925 = vmatmul.mubr.msk.f32.gmra.mxu1 %vm464_vm0, %v8605_v53  ;;  %3264 = vmatprep.mubr.f32.mxu0 %v8437_v4  ;;  %v2915_v12 = vld [vmem:[%s9502_s3 + $0x90] sm:$0xff]  ;;  %v2547_v27 = vrot.slane %v8449_v19, 7  ;;  %v2718_v0 = vrot.slane %v8623_v36, 1 }
 0x23c   : > { %3595 = vmatpush2.msra.mxu1 %v2917_v63  ;;  %v2914_v63 = vld [vmem:[%s9502_s3 + $0x88] sm:$0xff] }
 0x23d   : > { %v8635_v1 = vmax.f32 %v2448_v46, 0.0  ;;  %3596 = vmatprep.subr.mxu1 %v9643_v10  ;;  %v8657_v38 = vsel %vm302_vm1, %v8633_v40, %v2547_v27  ;;  %v2913_v46 = vld [vmem:[%s9502_s3 + $0x80] sm:$0xff]  ;;  %v5040_v27 = vld [vmem:[%s9502_s3 + $0x478] sm:$0xff] }
 0x23e   : > { %5207 = vmatmul.mubr.msk.f32.gmra.mxu0 %vm6590_vm2, %v8633_v40  ;;  %3597 = vmatpush2.msra.mxu1 %v2916_v45  ;;  %v8673_v45 = vrot.slane %v8486_v48, 7 }
 0x23f   : > { %9755 = vst [vmem:[#allocation43_spill] sm:$0xff] %v8635_v1  ;;  %3269 = vmatprep.mubr.f32.mxu0 %v8449_v19  ;;  %3598 = vmatprep.subr.mxu1 %v9643_v10  ;;  %v8649_v37 = vrot.slane %v8635_v1, 1 }
 0x240   : > { %3599 = vmatpush2.msra.mxu1 %v2915_v12  ;;  %v2550_v12 = vrot.slane %v8498_v9, 7 }
 0x241   : > { %9756 = vst [vmem:[#allocation44_spill] sm:$0xff] %v8649_v37  ;;  %v8653_v35 = vsel %vm464_vm0, %v2718_v0, %v8649_v37  ;;  %3600 = vmatprep.subr.mxu1 %v9643_v10  ;;  %v5039_v0 = vld [vmem:[%s9502_s3 + $0x470] sm:$0xff] }
 0x242   : > { %9757 = vst [vmem:[#allocation45_spill] sm:$0xff] %v8653_v35  ;;  %5927 = vmatprep.mubr.f32.mxu1 %v8653_v35  ;;  %3270 = vmatmul.mubr.f32.gmra.mxu0 %v8657_v38  ;;  %v9766_v35 = vld [vmem:[#allocation37_spill] sm:$0xff] }
 0x243   : > { %5928 = vmatmul.mubr.msk.f32.gmra.mxu1 %vm464_vm0, %v8649_v37  ;;  %3274 = vmatprep.mubr.f32.mxu0 %v8486_v48  ;;  %v8701_v37 = vrot.slane %v8533_v11, 7 }
 0x244   : > { %3601 = vmatpush2.msra.mxu1 %v2914_v63  ;;  %3604 = vmatprep.mubr.f32.mxu1 %v9643_v10  ;;  %v8691_v63 = vsel %vm302_vm1, %v8673_v45, %v2550_v12  ;;  %v2553_v12 = vrot.slane %v8545_v61, 7 }
 0x245   : > { %3602 = vmatprep.subr.mxu1 %v9643_v10 }
 0x246   : > { %3603 = vmatpush2.msra.mxu1 %v2913_v46  ;;  %5209 = vmatmul.mubr.msk.f32.gmra.mxu0 %vm6590_vm2, %v8673_v45  ;;  %v5038_v46 = vld [vmem:[%s9502_s3 + $0x468] sm:$0xff] }
 0x247   : > { %3605 = vmatmul.mubr.f32.vlgmr.msra.gmra.mxu1 %v9643_v10  ;;  %3279 = vmatprep.mubr.f32.mxu0 %v8498_v9 }
 0x248   : > { %3609 = vmatprep.mubr.f32.mxu1 %v9643_v10  ;;  %6010 = vmatprep.subr.mxu1 %v5040_v27 }
 0x249   : > { %6011 = vmatpush3.msra.mxu1 %v5040_v27  ;;  %v5037_v27 = vld [vmem:[%s9502_s3 + $0x460] sm:$0xff] }
 0x24a   : > { %3280 = vmatmul.mubr.f32.gmra.mxu0 %v8691_v63  ;;  %6012 = vmatprep.subr.mxu1 %v5039_v0 }
 0x24b   : > { %3610 = vmatmul.mubr.f32.gmra.mxu1 %v9643_v10  ;;  %3284 = vmatprep.mubr.f32.mxu0 %v8533_v11 }
 0x24c   : > { %3614 = vmatprep.mubr.f32.mxu1 %v8008_v26  ;;  %6013 = vmatpush3.msra.mxu1 %v5039_v0  ;;  %v5036_v26 = vld [vmem:[%s9502_s3 + $0x458] sm:$0xff]  ;;  %v8720_v0 = vsel %vm302_vm1, %v8701_v37, %v2553_v12  ;;  %v5034_v12 = vld [vmem:[%s9502_s3 + $0x448] sm:$0xff] }
 0x24d   : > { %6014 = vmatprep.subr.mxu1 %v5038_v46 }
 0x24e   : > { %5211 = vmatmul.mubr.msk.f32.gmra.mxu0 %vm6590_vm2, %v8701_v37  ;;  %6015 = vmatpush3.msra.mxu1 %v5038_v46  ;;  %v2556_v46 = vrot.slane %v8591_v15, 7 }
 0x24f   : > { %5233 = vmatmul.mubr.msk.f32.gmra.mxu1 %vm6590_vm2, %v8014_v47  ;;  %3289 = vmatprep.mubr.f32.mxu0 %v8545_v61  ;;  %v5035_v47 = vld [vmem:[%s9502_s3 + $0x450] sm:$0xff] }
 0x250   : > { %3619 = vmatprep.mubr.f32.mxu1 %v8006_v8  ;;  %6016 = vmatprep.subr.mxu1 %v5037_v27  ;;  %v8730_v8 = vrot.slane %v8579_v7, 7 }
 0x251   : > { %6017 = vmatpush3.msra.mxu1 %v5037_v27 }
 0x252   : > { %3290 = vmatmul.mubr.f32.gmra.mxu0 %v8720_v0  ;;  %6018 = vmatprep.subr.mxu1 %v5036_v26  ;;  %v8749_v27 = vsel %vm302_vm1, %v8730_v8, %v2556_v46  ;;  %v2559_v46 = vrot.slane %v8635_v1, 7 }
 0x253   : > { %3620 = vmatmul.mubr.f32.gmra.mxu1 %v8058_v42  ;;  %3294 = vmatprep.mubr.f32.mxu0 %v8579_v7  ;;  %v5033_v42 = vld [vmem:[%s9502_s3 + $0x440] sm:$0xff] }
 0x254   : > { %3624 = vmatprep.mubr.f32.mxu1 %v8030_v24  ;;  %6019 = vmatpush3.msra.mxu1 %v5036_v26  ;;  %v5032_v26 = vld [vmem:[%s9502_s3 + $0x438] sm:$0xff] }
 0x255   : > { %6020 = vmatprep.subr.mxu1 %v5035_v47 }
 0x256   : > { %5213 = vmatmul.mubr.msk.f32.gmra.mxu0 %vm6590_vm2, %v8730_v8  ;;  %6021 = vmatpush3.msra.mxu1 %v5035_v47  ;;  %v8759_v47 = vrot.slane %v8623_v36, 7 }
 0x257   : > { %5235 = vmatmul.mubr.msk.f32.gmra.mxu1 %vm6590_vm2, %v8087_v41  ;;  %3299 = vmatprep.mubr.f32.mxu0 %v8591_v15 }
 0x258   : > { %3629 = vmatprep.mubr.f32.mxu1 %v8016_v56  ;;  %6022 = vmatprep.subr.mxu1 %v5034_v12  ;;  %9758 = vst [vmem:[#allocation46_spill] sm:$0xff] %v8759_v47 }
 0x259   : > { %6023 = vmatpush3.msra.mxu1 %v5034_v12  ;;  %v5031_v12 = vld [vmem:[%s9502_s3 + $0x430] sm:$0xff] }
 0x25a   : > { %3300 = vmatmul.mubr.f32.gmra.mxu0 %v8749_v27  ;;  %6024 = vmatprep.subr.mxu1 %v5033_v42 }
 0x25b   : > { %3630 = vmatmul.mubr.f32.gmra.mxu1 %v8127_v29  ;;  %3304 = vmatprep.mubr.f32.mxu0 %v8623_v36  ;;  %v8778_v36 = vsel %vm302_vm1, %v8759_v47, %v2559_v46  ;;  %v5008_v46 = vld [vmem:[%s9502_s3 + $0x378] sm:$0xff] }
 0x25c   : > { %3634 = vmatprep.mubr.f32.mxu1 %v8076_v32  ;;  %6025 = vmatpush3.msra.mxu1 %v5033_v42  ;;  %v5030_v42 = vld [vmem:[%s9502_s3 + $0x428] sm:$0xff]  ;;  %9759 = vst [vmem:[#allocation47_spill] sm:$0xff] %v8778_v36 }
 0x25d   : > { %6026 = vmatprep.subr.mxu1 %v5032_v26 }
 0x25e   : > { %5215 = vmatmul.mubr.msk.f32.gmra.mxu0 %vm6590_vm2, %v8759_v47  ;;  %6027 = vmatpush3.msra.mxu1 %v5032_v26  ;;  %v5029_v26 = vld [vmem:[%s9502_s3 + $0x420] sm:$0xff]  ;;  %v9765_v47 = vld [vmem:[#allocation24_spill] sm:$0xff] }
 0x25f   : > { %5237 = vmatmul.mubr.msk.f32.gmra.mxu1 %vm6590_vm2, %v8151_v50  ;;  %3309 = vmatprep.mubr.f32.mxu0 %v8635_v1  ;;  %v9764_v1 = vld [vmem:[#allocation21_spill] sm:$0xff] }
 0x260   : > { %3639 = vmatprep.mubr.f32.mxu1 %v8051_v2  ;;  %6028 = vmatprep.subr.mxu1 %v5031_v12 }
 0x261   : > { %6029 = vmatpush3.msra.mxu1 %v5031_v12  ;;  %v5028_v12 = vld [vmem:[%s9502_s3 + $0x418] sm:$0xff] }
 0x262   : > { %3310 = vmatmul.mubr.f32.gmra.mxu0 %v8778_v36  ;;  %6030 = vmatprep.subr.mxu1 %v5030_v42  ;;  %v9763_v36 = vld [vmem:[#allocation20_spill] sm:$0xff] }
 0x263   : > { %3640 = vmatmul.mubr.f32.gmra.mxu1 %v8204_v44  ;;  %5962 = vmatprep.mubr.f32.mxu0 %v9643_v10 }
 0x264   : > { %3644 = vmatprep.mubr.f32.mxu1 %v8100_v13  ;;  %6031 = vmatpush3.msra.mxu1 %v5030_v42  ;;  %v5007_v42 = vld [vmem:[%s9502_s3 + $0x370] sm:$0xff] }
 0x265   : > { %6032 = vmatprep.subr.mxu1 %v5029_v26 }
 0x266   : > { %5963 = vmatmul.mubr.f32.vlgmr.msra.gmra.mxu0 %v9643_v10  ;;  %6033 = vmatpush3.msra.mxu1 %v5029_v26  ;;  %v5006_v26 = vld [vmem:[%s9502_s3 + $0x368] sm:$0xff] }
 0x267   : > { %5239 = vmatmul.mubr.msk.f32.gmra.mxu1 %vm6590_vm2, %v8223_v54  ;;  %5965 = vmatprep.mubr.f32.mxu0 %v8041_v17  ;;  %v5027_v17 = vld [vmem:[%s9502_s3 + $0x410] sm:$0xff] }
 0x268   : > { %3649 = vmatprep.mubr.f32.mxu1 %v8089_v14  ;;  %4136 = vmatpush1.msra.mxu0 %v5008_v46  ;;  %v5005_v46 = vld [vmem:[%s9502_s3 + $0x360] sm:$0xff] }
 0x269   : > { %4137 = vmatprep.subr.mxu0 %v9643_v10  ;;  %6034 = vmatprep.subr.mxu1 %v5028_v12 }
 0x26a   : > { %4138 = vmatpush1.msra.mxu0 %v5007_v42  ;;  %6035 = vmatpush3.msra.mxu1 %v5028_v12  ;;  %v5003_v12 = vld [vmem:[%s9502_s3 + $0x350] sm:$0xff]  ;;  %v5002_v42 = vld [vmem:[%s9502_s3 + $0x348] sm:$0xff] }
 0x26b   : > { %3650 = vmatmul.mubr.f32.gmra.mxu1 %v8268_v3  ;;  %5966 = vmatmul.mubr.msk.f32.gmra.mxu0 %vm464_vm0, %v8025_v22  ;;  %v5004_v22 = vld [vmem:[%s9502_s3 + $0x358] sm:$0xff] }
 0x26c   : > { %4139 = vmatprep.subr.mxu0 %v9643_v10  ;;  %3654 = vmatprep.mubr.f32.mxu1 %v8133_v52 }
 0x26d   : > { %5968 = vmatprep.mubr.f32.mxu0 %v8072_v20  ;;  %4140 = vmatpush1.msra.mxu0 %v5006_v26  ;;  %v5001_v26 = vld [vmem:[%s9502_s3 + $0x340] sm:$0xff] }
 0x26e   : > { %4141 = vmatprep.subr.mxu0 %v9643_v10  ;;  %6036 = vmatprep.subr.mxu1 %v5027_v17 }
 0x26f   : > { %4142 = vmatpush1.msra.mxu0 %v5005_v46  ;;  %5241 = vmatmul.mubr.msk.f32.gmra.mxu1 %vm6590_vm2, %v8289_v5  ;;  %v4999_v46 = vld [vmem:[%s9502_s3 + $0x330] sm:$0xff] }
 0x270   : > { %5969 = vmatmul.mubr.msk.f32.gmra.mxu0 %vm464_vm0, %v8049_v60  ;;  %4143 = vmatprep.subr.mxu0 %v9643_v10 }
 0x271   : > { %3659 = vmatprep.mubr.f32.mxu1 %v8121_v25  ;;  %5971 = vmatprep.mubr.f32.mxu0 %v8111_v58 }
 0x272   : > { %4144 = vmatpush1.msra.mxu0 %v5004_v22  ;;  %6037 = vmatpush3.msra.mxu1 %v5027_v17  ;;  %v5000_v17 = vld [vmem:[%s9502_s3 + $0x338] sm:$0xff]  ;;  %v4998_v22 = vld [vmem:[%s9502_s3 + $0x328] sm:$0xff] }
 0x273   : > { %4145 = vmatprep.subr.mxu0 %v9643_v10  ;;  %3660 = vmatmul.mubr.f32.gmra.mxu1 %v8320_v18 }
 0x274   : > { %4146 = vmatpush1.msra.mxu0 %v5003_v12  ;;  %3664 = vmatprep.mubr.f32.mxu1 %v8175_v62  ;;  %v9760_v12 = vld [vmem:[#allocation16_spill] sm:$0xff] }
 0x275   : > { %5972 = vmatmul.mubr.msk.f32.gmra.mxu0 %vm464_vm0, %v8095_v55  ;;  %4147 = vmatprep.subr.mxu0 %v9643_v10 }
 0x276   : > { %5974 = vmatprep.mubr.f32.mxu0 %v8148_v28  ;;  %4148 = vmatpush1.msra.mxu0 %v5002_v42  ;;  %v4997_v42 = vld [vmem:[%s9502_s3 + $0x320] sm:$0xff] }
 0x277   : > { %4149 = vmatprep.subr.mxu0 %v9643_v10  ;;  %5243 = vmatmul.mubr.msk.f32.gmra.mxu1 %vm6590_vm2, %v8343_v57 }
 0x278   : > { %4150 = vmatpush1.msra.mxu0 %v5001_v26  ;;  %3669 = vmatprep.mubr.f32.mxu1 %v8156_v33  ;;  %v9761_v26 = vld [vmem:[#allocation19_spill] sm:$0xff] }
 0x279   : > { %5975 = vmatmul.mubr.msk.f32.gmra.mxu0 %vm464_vm0, %v8131_v49  ;;  %4151 = vmatprep.subr.mxu0 %v9643_v10 }
 0x27a   : > { %5977 = vmatprep.mubr.f32.mxu0 %v8184_v16  ;;  %4152 = vmatpush1.msra.mxu0 %v5000_v17  ;;  %v9762_v17 = vld [vmem:[#allocation34_spill] sm:$0xff] }
 0x27b   : > { %4153 = vmatprep.subr.mxu0 %v9643_v10  ;;  %3670 = vmatmul.mubr.f32.gmra.mxu1 %v8372_v59 }
 0x27c   : > { %4154 = vmatpush1.msra.mxu0 %v4999_v46  ;;  %3674 = vmatprep.mubr.f32.mxu1 %v8207_v39  ;;  %v4996_v46 = vld [vmem:[%s9502_s3 + $0x318] sm:$0xff] }
 0x27d   : > { %5978 = vmatmul.mubr.msk.f32.gmra.mxu0 %vm464_vm0, %v9760_v12  ;;  %4155 = vmatprep.subr.mxu0 %v9643_v10 }
 0x27e   : > { %5980 = vmatprep.mubr.f32.mxu0 %v9761_v26  ;;  %4156 = vmatpush1.msra.mxu0 %v4998_v22  ;;  %v4995_v22 = vld [vmem:[%s9502_s3 + $0x310] sm:$0xff]  ;;  %v9767_v26 = vld [vmem:[#allocation23_spill] sm:$0xff] }
 0x27f   : > { %4157 = vmatprep.subr.mxu0 %v9643_v10  ;;  %5245 = vmatmul.mubr.msk.f32.gmra.mxu1 %vm6590_vm2, %v9762_v17 }
 0x280   : > { %4158 = vmatpush1.msra.mxu0 %v4997_v42  ;;  %3679 = vmatprep.mubr.f32.mxu1 %v9763_v36  ;;  %v4994_v42 = vld [vmem:[%s9502_s3 + $0x308] sm:$0xff] }
 0x281   : > { %5981 = vmatmul.mubr.msk.f32.gmra.mxu0 %vm464_vm0, %v9764_v1  ;;  %4159 = vmatprep.subr.mxu0 %v9643_v10  ;;  %v9768_v1 = vld [vmem:[#allocation6_spill] sm:$0xff] }
 0x282   : > { %5983 = vmatprep.mubr.f32.mxu0 %v9765_v47  ;;  %4160 = vmatpush1.msra.mxu0 %v4996_v46  ;;  %v4993_v46 = vld [vmem:[%s9502_s3 + $0x300] sm:$0xff]  ;;  %v9769_v47 = vld [vmem:[#allocation26_spill] sm:$0xff] }
 0x283   : > { %4161 = vmatprep.subr.mxu0 %v9643_v10  ;;  %3680 = vmatmul.mubr.f32.gmra.mxu1 %v9766_v35 }
 0x284   : > { %4162 = vmatpush1.msra.mxu0 %v4995_v22  ;;  %3684 = vmatprep.mubr.f32.mxu1 %v9767_v26  ;;  %v5024_v22 = vld [vmem:[%s9502_s3 + $0x3f8] sm:$0xff]  ;;  %v9771_v26 = vld [vmem:[#allocation25_spill] sm:$0xff] }
 0x285   : > { %5984 = vmatmul.mubr.msk.f32.gmra.mxu0 %vm464_vm0, %v9768_v1  ;;  %4163 = vmatprep.subr.mxu0 %v9643_v10  ;;  %v9770_v1 = vld [vmem:[#allocation22_spill] sm:$0xff] }
 0x286   : > { %5986 = vmatprep.mubr.f32.mxu0 %v9769_v47  ;;  %4164 = vmatpush1.msra.mxu0 %v4994_v42  ;;  %v5023_v42 = vld [vmem:[%s9502_s3 + $0x3f0] sm:$0xff] }
 0x287   : > { %4165 = vmatprep.subr.mxu0 %v9643_v10  ;;  %5247 = vmatmul.mubr.msk.f32.gmra.mxu1 %vm6590_vm2, %v8447_v43  ;;  %v9772_v47 = vld [vmem:[#allocation29_spill] sm:$0xff]  ;;  %v9773_v43 = vld [vmem:[#allocation39_spill] sm:$0xff] }
 0x288   : > { %4166 = vmatpush1.msra.mxu0 %v4993_v46  ;;  %3689 = vmatprep.mubr.f32.mxu1 %v9770_v1  ;;  %v5022_v46 = vld [vmem:[%s9502_s3 + $0x3e8] sm:$0xff] }
 0x289   : > { %5987 = vmatmul.mubr.msk.f32.gmra.mxu0 %vm464_vm0, %v9771_v26  ;;  %4167 = vmatprep.subr.mxu0 %v9643_v10  ;;  %v9774_v26 = vld [vmem:[#allocation4_spill] sm:$0xff] }
 0x28a   : > { %5989 = vmatprep.mubr.f32.mxu0 %v9772_v47  ;;  %4168 = vmatpush2.msra.mxu0 %v5024_v22  ;;  %v5021_v22 = vld [vmem:[%s9502_s3 + $0x3e0] sm:$0xff]  ;;  %v9775_v47 = vld [vmem:[#allocation32_spill] sm:$0xff] }
 0x28b   : > { %4169 = vmatprep.subr.mxu0 %v9643_v10  ;;  %3690 = vmatmul.mubr.f32.gmra.mxu1 %v9773_v43  ;;  %v9776_v43 = vld [vmem:[#allocation9_spill] sm:$0xff] }
 0x28c   : > { %4170 = vmatpush2.msra.mxu0 %v5023_v42  ;;  %3694 = vmatprep.mubr.f32.mxu1 %v8280_v31  ;;  %v5020_v42 = vld [vmem:[%s9502_s3 + $0x3d8] sm:$0xff]  ;;  %v9778_v31 = vld [vmem:[#allocation31_spill] sm:$0xff] }
 0x28d   : > { %5990 = vmatmul.mubr.msk.f32.gmra.mxu0 %vm464_vm0, %v9774_v26  ;;  %4171 = vmatprep.subr.mxu0 %v9643_v10  ;;  %v9777_v26 = vld [vmem:[#allocation28_spill] sm:$0xff] }
 0x28e   : > { %5992 = vmatprep.mubr.f32.mxu0 %v9775_v47  ;;  %4172 = vmatpush2.msra.mxu0 %v5022_v46  ;;  %v5019_v46 = vld [vmem:[%s9502_s3 + $0x3d0] sm:$0xff]  ;;  %v9779_v47 = vld [vmem:[#allocation36_spill] sm:$0xff] }
 0x28f   : > { %4173 = vmatprep.subr.mxu0 %v9643_v10  ;;  %5249 = vmatmul.mubr.msk.f32.gmra.mxu1 %vm6590_vm2, %v9776_v43  ;;  %v9780_v43 = vld [vmem:[#allocation40_spill] sm:$0xff] }
 0x290   : > { %4174 = vmatpush2.msra.mxu0 %v5021_v22  ;;  %3699 = vmatprep.mubr.f32.mxu1 %v9777_v26  ;;  %v5018_v22 = vld [vmem:[%s9502_s3 + $0x3c8] sm:$0xff]  ;;  %v9781_v26 = vld [vmem:[#allocation3_spill] sm:$0xff] }
 0x291   : > { %5993 = vmatmul.mubr.msk.f32.gmra.mxu0 %vm464_vm0, %v9778_v31  ;;  %4175 = vmatprep.subr.mxu0 %v9643_v10  ;;  %v9782_v31 = vld [vmem:[#allocation35_spill] sm:$0xff] }
 0x292   : > { %5995 = vmatprep.mubr.f32.mxu0 %v9779_v47  ;;  %4176 = vmatpush2.msra.mxu0 %v5020_v42  ;;  %v5017_v42 = vld [vmem:[%s9502_s3 + $0x3c0] sm:$0xff]  ;;  %v9783_v47 = vld [vmem:[#allocation8_spill] sm:$0xff] }
 0x293   : > { %4177 = vmatprep.subr.mxu0 %v9643_v10  ;;  %3700 = vmatmul.mubr.f32.gmra.mxu1 %v9780_v43 }
 0x294   : > { %4178 = vmatpush2.msra.mxu0 %v5019_v46  ;;  %3704 = vmatprep.mubr.f32.mxu1 %v9781_v26  ;;  %v5016_v46 = vld [vmem:[%s9502_s3 + $0x3b8] sm:$0xff] }
 0x295   : > { %5996 = vmatmul.mubr.msk.f32.gmra.mxu0 %vm464_vm0, %v9782_v31  ;;  %4179 = vmatprep.subr.mxu0 %v9643_v10  ;;  %v9784_v31 = vld [vmem:[#allocation30_spill] sm:$0xff] }
 0x296   : > { %5998 = vmatprep.mubr.f32.mxu0 %v9783_v47  ;;  %4180 = vmatpush2.msra.mxu0 %v5018_v22  ;;  %v9785_v26 = vld [vmem:[#allocation38_spill] sm:$0xff]  ;;  %v5015_v22 = vld [vmem:[%s9502_s3 + $0x3b0] sm:$0xff]  ;;  %v9786_v47 = vld [vmem:[#allocation11_spill] sm:$0xff] }
 0x297   : > { %4181 = vmatprep.subr.mxu0 %v9643_v10  ;;  %5251 = vmatmul.mubr.msk.f32.gmra.mxu1 %vm6590_vm2, %v8543_v21  ;;  %v9787_v21 = vld [vmem:[#allocation41_spill] sm:$0xff] }
 0x298   : > { %4182 = vmatpush2.msra.mxu0 %v5017_v42  ;;  %3709 = vmatprep.mubr.f32.mxu1 %v9784_v31  ;;  %v5014_v42 = vld [vmem:[%s9502_s3 + $0x3a8] sm:$0xff]  ;;  %v9788_v31 = vld [vmem:[#allocation33_spill] sm:$0xff] }
 0x299   : > { %5999 = vmatmul.mubr.msk.f32.gmra.mxu0 %vm464_vm0, %v9785_v26  ;;  %4183 = vmatprep.subr.mxu0 %v9643_v10  ;;  %v9789_v26 = vld [vmem:[#allocation14_spill] sm:$0xff] }
 0x29a   : > { %6001 = vmatprep.mubr.f32.mxu0 %v9786_v47  ;;  %4184 = vmatpush2.msra.mxu0 %v5016_v46  ;;  %v5013_v46 = vld [vmem:[%s9502_s3 + $0x3a0] sm:$0xff]  ;;  %v9790_v47 = vld [vmem:[#allocation12_spill] sm:$0xff] }
 0x29b   : > { %4185 = vmatprep.subr.mxu0 %v9643_v10  ;;  %3710 = vmatmul.mubr.f32.gmra.mxu1 %v9787_v21 }
 0x29c   : > { %4186 = vmatpush2.msra.mxu0 %v5015_v22  ;;  %3714 = vmatprep.mubr.f32.mxu1 %v9788_v31  ;;  %v5012_v22 = vld [vmem:[%s9502_s3 + $0x398] sm:$0xff] }
 0x29d   : > { %6002 = vmatmul.mubr.msk.f32.gmra.mxu0 %vm464_vm0, %v9789_v26  ;;  %4187 = vmatprep.subr.mxu0 %v9643_v10  ;;  %v9791_v26 = vld [vmem:[#allocation17_spill] sm:$0xff] }
 0x29e   : > { %6004 = vmatprep.mubr.f32.mxu0 %v9790_v47  ;;  %4188 = vmatpush2.msra.mxu0 %v5014_v42  ;;  %v5011_v42 = vld [vmem:[%s9502_s3 + $0x390] sm:$0xff] }
 0x29f   : > { %4189 = vmatprep.subr.mxu0 %v9643_v10  ;;  %5253 = vmatmul.mubr.msk.f32.gmra.mxu1 %vm6590_vm2, %v8589_v51 }
 0x2a0   : > { %4190 = vmatpush2.msra.mxu0 %v5013_v46  ;;  %3719 = vmatprep.mubr.f32.mxu1 %v8397_v34  ;;  %v5010_v46 = vld [vmem:[%s9502_s3 + $0x388] sm:$0xff] }
 0x2a1   : > { %6005 = vmatmul.mubr.msk.f32.gmra.mxu0 %vm464_vm0, %v9791_v26  ;;  %4191 = vmatprep.subr.mxu0 %v9643_v10  ;;  %v5026_v26 = vld [vmem:[%s9502_s3 + $0x408] sm:$0xff] }
 0x2a2   : > { %6007 = vmatprep.mubr.f32.mxu0 %v8611_v23  ;;  %4192 = vmatpush2.msra.mxu0 %v5012_v22  ;;  %v5009_v22 = vld [vmem:[%s9502_s3 + $0x380] sm:$0xff] }
 0x2a3   : > { %4193 = vmatprep.subr.mxu0 %v9643_v10  ;;  %3720 = vmatmul.mubr.f32.gmra.mxu1 %v8615_v30 }
 0x2a4   : > { %4194 = vmatpush2.msra.mxu0 %v5011_v42  ;;  %3724 = vmatprep.mubr.f32.mxu1 %v8437_v4 }
 0x2a5   : > { %6008 = vmatmul.mubr.msk.f32.gmra.mxu0 %vm464_vm0, %v8605_v53  ;;  %4195 = vmatprep.subr.mxu0 %v9643_v10 }
 0x2a6   : > { %4196 = vmatpush2.msra.mxu0 %v5010_v46  ;;  %4199 = vmatprep.mubr.f32.mxu0 %v8030_v24  ;;  %v3156_v23 = vpop.f32.mrf.mxu0  ;;  %v5025_v46 = vld [vmem:[%s9502_s3 + $0x400] sm:$0xff] }
 0x2a7   : > { %4197 = vmatprep.subr.mxu0 %v9643_v10  ;;  %5255 = vmatmul.mubr.msk.f32.gmra.mxu1 %vm6590_vm2, %v8633_v40 }
 0x2a8   : > { %4198 = vmatpush2.msra.mxu0 %v5009_v22  ;;  %3729 = vmatprep.mubr.f32.mxu1 %v8449_v19  ;;  %v3158_v42 = vpop.f32.mrf.mxu0 }
 0x2a9   : > { %5278 = vmatmul.mubr.msk.f32.vlgmr.msra.gmra.mxu0 %vm6590_vm2, %v8087_v41  ;;  %v5884_v24 = vpop.f32.mrf.mxu1  ;;  %6038 = vmatprep.subr.mxu1 %v5026_v26 }
 0x2aa   : > { %4204 = vmatprep.mubr.f32.mxu0 %v8016_v56  ;;  %v3161_v10 = vpop.f32.mrf.mxu0  ;;  %6039 = vmatpush3.msra.mxu1 %v5026_v26 }
 0x2ab   : > { %v9029_v53 = vadd.f32 %v5884_v24, %v3161_v10  ;;  %v3381_v22 = vpop.f32.mrf.mxu1  ;;  %3730 = vmatmul.mubr.f32.gmra.mxu1 %v8657_v38  ;;  %6040 = vmatprep.subr.mxu1 %v5025_v46 }
 0x2ac   : > { %v9032_v42 = vadd.f32 %v3381_v22, %v3156_v23  ;;  %3734 = vmatprep.mubr.f32.mxu1 %v8486_v48  ;;  %v3163_v19 = vpop.f32.mrf.mxu0  ;;  %6041 = vmatpush3.msra.mxu1 %v5025_v46 }
 0x2ad   : > { %4205 = vmatmul.mubr.f32.gmra.mxu0 %v8127_v29  ;;  %v5887_v41 = vpop.f32.mrf.mxu1 }
 0x2ae   : > { %4209 = vmatprep.mubr.f32.mxu0 %v8076_v32  ;;  %v3166_v56 = vpop.f32.mrf.mxu0 }
 0x2af   : > { %v3391_v40 = vpop.f32.mrf.mxu1  ;;  %5257 = vmatmul.mubr.msk.f32.gmra.mxu1 %vm6590_vm2, %v8673_v45 }
 0x2b0   : > { %v9040_v10 = vadd.f32 %v3391_v40, %v3166_v56  ;;  %3739 = vmatprep.mubr.f32.mxu1 %v8498_v9  ;;  %v3168_v23 = vpop.f32.mrf.mxu0 }
 0x2b1   : > { %5280 = vmatmul.mubr.msk.f32.gmra.mxu0 %vm6590_vm2, %v8151_v50  ;;  %v5890_v19 = vpop.f32.mrf.mxu1 }
 0x2b2   : > { %4214 = vmatprep.mubr.f32.mxu0 %v8051_v2  ;;  %v3171_v29 = vpop.f32.mrf.mxu0 }
 0x2b3   : > { %v9047_v32 = vadd.f32 %v5887_v41, %v3171_v29  ;;  %v3401_v26 = vpop.f32.mrf.mxu1  ;;  %3740 = vmatmul.mubr.f32.gmra.mxu1 %v8691_v63 }
 0x2b4   : > { %3744 = vmatprep.mubr.f32.mxu1 %v8533_v11  ;;  %v3173_v40 = vpop.f32.mrf.mxu0 }
 0x2b5   : > { %4215 = vmatmul.mubr.f32.gmra.mxu0 %v8204_v44  ;;  %v5893_v46 = vpop.f32.mrf.mxu1 }
 0x2b6   : > { %4219 = vmatprep.mubr.f32.mxu0 %v8100_v13  ;;  %v3176_v24 = vpop.f32.mrf.mxu0 }
 0x2b7   : > { %v9053_v22 = vadd.f32 %v3401_v26, %v3176_v24  ;;  %v3411_v50 = vpop.f32.mrf.mxu1  ;;  %5259 = vmatmul.mubr.msk.f32.gmra.mxu1 %vm6590_vm2, %v8701_v37 }
 0x2b8   : > { %3749 = vmatprep.mubr.f32.mxu1 %v8545_v61  ;;  %v3178_v2 = vpop.f32.mrf.mxu0 }
 0x2b9   : > { %5282 = vmatmul.mubr.msk.f32.gmra.mxu0 %vm6590_vm2, %v8223_v54  ;;  %v5896_v41 = vpop.f32.mrf.mxu1 }
 0x2ba   : > { %4224 = vmatprep.mubr.f32.mxu0 %v8089_v14  ;;  %v3181_v44 = vpop.f32.mrf.mxu0 }
 0x2bb   : > { %v9063_v13 = vadd.f32 %v5890_v19, %v3181_v44  ;;  %3750 = vmatmul.mubr.f32.gmra.mxu1 %v8720_v0  ;;  %v3421_v29 = vpop.f32.mrf.mxu1 }
 0x2bc   : > { %3754 = vmatprep.mubr.f32.mxu1 %v8579_v7  ;;  %v3183_v56 = vpop.f32.mrf.mxu0 }
 0x2bd   : > { %4225 = vmatmul.mubr.f32.gmra.mxu0 %v8268_v3  ;;  %v5899_v3 = vpop.f32.mrf.mxu1 }
 0x2be   : > { %4229 = vmatprep.mubr.f32.mxu0 %v8133_v52  ;;  %v3186_v23 = vpop.f32.mrf.mxu0 }
 0x2bf   : > { %v9069_v26 = vadd.f32 %v3411_v50, %v3186_v23  ;;  %5261 = vmatmul.mubr.msk.f32.gmra.mxu1 %vm6590_vm2, %v8730_v8  ;;  %v3431_v24 = vpop.f32.mrf.mxu1  ;;  %v9796_v23 = vld [vmem:[#allocation5_spill] sm:$0xff] }
 0x2c0   : > { %3759 = vmatprep.mubr.f32.mxu1 %v8591_v15  ;;  %v3188_v14 = vpop.f32.mrf.mxu0 }
 0x2c1   : > { %5284 = vmatmul.mubr.msk.f32.gmra.mxu0 %vm6590_vm2, %v8289_v5  ;;  %v5902_v5 = vpop.f32.mrf.mxu1  ;;  %v9798_v14 = vld [vmem:[#allocation26_spill] sm:$0xff] }
 0x2c2   : > { %4234 = vmatprep.mubr.f32.mxu0 %v8121_v25  ;;  %v3191_v54 = vpop.f32.mrf.mxu0 }
 0x2c3   : > { %v9079_v52 = vadd.f32 %v5893_v46, %v3191_v54  ;;  %3760 = vmatmul.mubr.f32.gmra.mxu1 %v8749_v27 }
 0x2c4   : > { %6042 = vmatprep.mubr.f32.mxu1 %v8072_v20  ;;  %v3193_v19 = vpop.f32.mrf.mxu0 }
 0x2c5   : > { %4235 = vmatmul.mubr.f32.gmra.mxu0 %v8320_v18  ;;  %v9799_v19 = vld [vmem:[#allocation39_spill] sm:$0xff] }
 0x2c6   : > { %4239 = vmatprep.mubr.f32.mxu0 %v8175_v62  ;;  %v3196_v40 = vpop.f32.mrf.mxu0 }
 0x2c7   : > { %v9085_v50 = vadd.f32 %v3421_v29, %v3196_v40  ;;  %6043 = vmatmul.mubr.msk.f32.vlgmr.msra.gmra.mxu1 %vm464_vm0, %v8049_v60  ;;  %v9797_v29 = vld [vmem:[#allocation6_spill] sm:$0xff]  ;;  %v9800_v40 = vld [vmem:[#allocation27_spill] sm:$0xff] }
 0x2c8   : > { %6045 = vmatprep.mubr.f32.mxu1 %v8111_v58  ;;  %v3198_v25 = vpop.f32.mrf.mxu0  ;;  %v3441_v58 = vpop.f32.mrf.mxu1 }
 0x2c9   : > { %5286 = vmatmul.mubr.msk.f32.gmra.mxu0 %vm6590_vm2, %v8343_v57 }
 0x2ca   : > { %4244 = vmatprep.mubr.f32.mxu0 %v8156_v33  ;;  %v3201_v20 = vpop.f32.mrf.mxu0 }
 0x2cb   : > { %v9094_v18 = vadd.f32 %v5896_v41, %v3201_v20  ;;  %6046 = vmatmul.mubr.msk.f32.gmra.mxu1 %vm464_vm0, %v8095_v55 }
 0x2cc   : > { %6048 = vmatprep.mubr.f32.mxu1 %v8148_v28  ;;  %v3203_v62 = vpop.f32.mrf.mxu0  ;;  %v5905_v28 = vpop.f32.mrf.mxu1 }
 0x2cd   : > { %4245 = vmatmul.mubr.f32.gmra.mxu0 %v8372_v59  ;;  %v9801_v62 = vld [vmem:[#allocation25_spill] sm:$0xff] }
 0x2ce   : > { %4249 = vmatprep.mubr.f32.mxu0 %v8207_v39  ;;  %v3206_v60 = vpop.f32.mrf.mxu0  ;;  %v9792_v39 = vld [vmem:[#allocation19_spill] sm:$0xff]  ;;  %v3451_v2 = vpop.f32.mrf.mxu1 }
 0x2cf   : > { %v9101_v46 = vadd.f32 %v3431_v24, %v3206_v60  ;;  %6049 = vmatmul.mubr.msk.f32.gmra.mxu1 %vm464_vm0, %v8131_v49  ;;  %v9793_v49 = vld [vmem:[#allocation23_spill] sm:$0xff]  ;;  %v9803_v60 = vld [vmem:[#allocation9_spill] sm:$0xff] }
 0x2d0   : > { %6051 = vmatprep.mubr.f32.mxu1 %v8184_v16  ;;  %v3208_v33 = vpop.f32.mrf.mxu0  ;;  %v5908_v56 = vpop.f32.mrf.mxu1 }
 0x2d1   : > { %5288 = vmatmul.mubr.msk.f32.gmra.mxu0 %vm6590_vm2, %v9762_v17  ;;  %v9794_v17 = vld [vmem:[#allocation21_spill] sm:$0xff] }
 0x2d2   : > { %4254 = vmatprep.mubr.f32.mxu0 %v9763_v36  ;;  %v3211_v55 = vpop.f32.mrf.mxu0  ;;  %v9795_v36 = vld [vmem:[#allocation24_spill] sm:$0xff] }
 0x2d3   : > { %v9110_v57 = vadd.f32 %v5899_v3, %v3211_v55  ;;  %6052 = vmatmul.mubr.msk.f32.gmra.mxu1 %vm464_vm0, %v9760_v12  ;;  %v3461_v3 = vpop.f32.mrf.mxu1 }
 0x2d4   : > { %6054 = vmatprep.mubr.f32.mxu1 %v9792_v39  ;;  %v3213_v59 = vpop.f32.mrf.mxu0 }
 0x2d5   : > { %4255 = vmatmul.mubr.f32.gmra.mxu0 %v9766_v35  ;;  %v5911_v25 = vpop.f32.mrf.mxu1  ;;  %v9805_v59 = vld [vmem:[#allocation4_spill] sm:$0xff] }
 0x2d6   : > { %4259 = vmatprep.mubr.f32.mxu0 %v9793_v49  ;;  %v3216_v16 = vpop.f32.mrf.mxu0  ;;  %v9806_v49 = vld [vmem:[#allocation32_spill] sm:$0xff] }
 0x2d7   : > { %v9117_v44 = vadd.f32 %v3441_v58, %v3216_v16  ;;  %6055 = vmatmul.mubr.msk.f32.gmra.mxu1 %vm464_vm0, %v9794_v17  ;;  %v9804_v58 = vld [vmem:[#allocation28_spill] sm:$0xff]  ;;  %v3471_v55 = vpop.f32.mrf.mxu1  ;;  %v9807_v17 = vld [vmem:[#allocation3_spill] sm:$0xff] }
 0x2d8   : > { %6057 = vmatprep.mubr.f32.mxu1 %v9795_v36  ;;  %v3218_v41 = vpop.f32.mrf.mxu0 }
 0x2d9   : > { %5290 = vmatmul.mubr.msk.f32.gmra.mxu0 %vm6590_vm2, %v9796_v23  ;;  %v9808_v23 = vld [vmem:[#allocation31_spill] sm:$0xff] }
 0x2da   : > { %4264 = vmatprep.mubr.f32.mxu0 %v9770_v1  ;;  %v3221_v35 = vpop.f32.mrf.mxu0  ;;  %v9802_v1 = vld [vmem:[#allocation29_spill] sm:$0xff] }
 0x2db   : > { %v9126_v12 = vadd.f32 %v5902_v5, %v3221_v35  ;;  %6058 = vmatmul.mubr.msk.f32.gmra.mxu1 %vm464_vm0, %v9797_v29  ;;  %v9809_v35 = vld [vmem:[#allocation36_spill] sm:$0xff] }
 0x2dc   : > { %6060 = vmatprep.mubr.f32.mxu1 %v9798_v14  ;;  %v3223_v54 = vpop.f32.mrf.mxu0  ;;  %v9810_v14 = vld [vmem:[#allocation7_spill] sm:$0xff] }
 0x2dd   : > { %4265 = vmatmul.mubr.f32.gmra.mxu0 %v9799_v19  ;;  %v9811_v54 = vld [vmem:[#allocation30_spill] sm:$0xff] }
 0x2de   : > { %4269 = vmatprep.mubr.f32.mxu0 %v9800_v40  ;;  %v3226_v24 = vpop.f32.mrf.mxu0 }
 0x2df   : > { %v9133_v20 = vadd.f32 %v3451_v2, %v3226_v24  ;;  %6061 = vmatmul.mubr.msk.f32.gmra.mxu1 %vm464_vm0, %v9801_v62  ;;  %v5914_v2 = vpop.f32.mrf.mxu1  ;;  %v9812_v24 = vld [vmem:[#allocation35_spill] sm:$0xff] }
 0x2e0   : > { %6063 = vmatprep.mubr.f32.mxu1 %v9802_v1  ;;  %v3228_v5 = vpop.f32.mrf.mxu0 }
 0x2e1   : > { %5292 = vmatmul.mubr.msk.f32.gmra.mxu0 %vm6590_vm2, %v9803_v60  ;;  %v3481_v29 = vpop.f32.mrf.mxu1 }
 0x2e2   : > { %4274 = vmatprep.mubr.f32.mxu0 %v9804_v58  ;;  %v3231_v33 = vpop.f32.mrf.mxu0  ;;  %v9814_v58 = vld [vmem:[#allocation38_spill] sm:$0xff] }
 0x2e3   : > { %v9142_v39 = vadd.f32 %v5905_v28, %v3231_v33  ;;  %6064 = vmatmul.mubr.msk.f32.gmra.mxu1 %vm464_vm0, %v9805_v59  ;;  %v9815_v33 = vld [vmem:[#allocation11_spill] sm:$0xff] }
 0x2e4   : > { %6066 = vmatprep.mubr.f32.mxu1 %v9806_v49  ;;  %v3233_v16 = vpop.f32.mrf.mxu0 }
 0x2e5   : > { %4275 = vmatmul.mubr.f32.gmra.mxu0 %v9780_v43  ;;  %v5917_v43 = vpop.f32.mrf.mxu1 }
 0x2e6   : > { %4279 = vmatprep.mubr.f32.mxu0 %v9807_v17  ;;  %v3236_v36 = vpop.f32.mrf.mxu0 }
 0x2e7   : > { %v9149_v41 = vadd.f32 %v3461_v3, %v3236_v36  ;;  %6067 = vmatmul.mubr.msk.f32.gmra.mxu1 %vm464_vm0, %v9808_v23  ;;  %v9813_v3 = vld [vmem:[#allocation8_spill] sm:$0xff]  ;;  %v3491_v5 = vpop.f32.mrf.mxu1 }
 0x2e8   : > { %6069 = vmatprep.mubr.f32.mxu1 %v9809_v35  ;;  %v3238_v28 = vpop.f32.mrf.mxu0  ;;  %v9819_v35 = vld [vmem:[#allocation42_spill] sm:$0xff] }
 0x2e9   : > { %5294 = vmatmul.mubr.msk.f32.gmra.mxu0 %vm6590_vm2, %v9810_v14 }
 0x2ea   : > { %4284 = vmatprep.mubr.f32.mxu0 %v9811_v54  ;;  %v3241_v19 = vpop.f32.mrf.mxu0 }
 0x2eb   : > { %v9158_v40 = vadd.f32 %v5908_v56, %v3241_v19  ;;  %6070 = vmatmul.mubr.msk.f32.gmra.mxu1 %vm464_vm0, %v9812_v24  ;;  %v5920_v59 = vpop.f32.mrf.mxu1 }
 0x2ec   : > { %6072 = vmatprep.mubr.f32.mxu1 %v9813_v3  ;;  %v3243_v62 = vpop.f32.mrf.mxu0 }
 0x2ed   : > { %4285 = vmatmul.mubr.f32.gmra.mxu0 %v9787_v21  ;;  %v3501_v16 = vpop.f32.mrf.mxu1  ;;  %v9823_v62 = vld [vmem:[#allocation44_spill] sm:$0xff] }
 0x2ee   : > { %4289 = vmatprep.mubr.f32.mxu0 %v9788_v31  ;;  %v3246_v1 = vpop.f32.mrf.mxu0  ;;  %v9816_v31 = vld [vmem:[#allocation14_spill] sm:$0xff] }
 0x2ef   : > { %v9165_v60 = vadd.f32 %v3471_v55, %v3246_v1  ;;  %6073 = vmatmul.mubr.msk.f32.gmra.mxu1 %vm464_vm0, %v9814_v58 }
 0x2f0   : > { %6075 = vmatprep.mubr.f32.mxu1 %v9815_v33  ;;  %v3248_v56 = vpop.f32.mrf.mxu0 }
 0x2f1   : > { %5296 = vmatmul.mubr.msk.f32.gmra.mxu0 %vm6590_vm2, %v8589_v51  ;;  %v9817_v51 = vld [vmem:[#allocation17_spill] sm:$0xff] }
 0x2f2   : > { %4294 = vmatprep.mubr.f32.mxu0 %v8397_v34  ;;  %v3251_v21 = vpop.f32.mrf.mxu0  ;;  %v9818_v34 = vld [vmem:[#allocation18_spill] sm:$0xff] }
 0x2f3   : > { %v9174_v49 = vadd.f32 %v5911_v25, %v3251_v21  ;;  %6076 = vmatmul.mubr.msk.f32.gmra.mxu1 %vm464_vm0, %v9816_v31  ;;  %v5923_v36 = vpop.f32.mrf.mxu1 }
 0x2f4   : > { %6078 = vmatprep.mubr.f32.mxu1 %v9790_v47  ;;  %v3253_v55 = vpop.f32.mrf.mxu0  ;;  %v9820_v47 = vld [vmem:[#allocation13_spill] sm:$0xff] }
 0x2f5   : > { %4295 = vmatmul.mubr.f32.gmra.mxu0 %v8615_v30  ;;  %v3511_v30 = vpop.f32.mrf.mxu1 }
 0x2f6   : > { %4299 = vmatprep.mubr.f32.mxu0 %v8437_v4  ;;  %v3256_v17 = vpop.f32.mrf.mxu0  ;;  %v9821_v4 = vld [vmem:[#allocation10_spill] sm:$0xff] }
 0x2f7   : > { %v9181_v23 = vadd.f32 %v3481_v29, %v3256_v17  ;;  %6079 = vmatmul.mubr.msk.f32.gmra.mxu1 %vm464_vm0, %v9817_v51  ;;  %v9822_v29 = vld [vmem:[#allocation45_spill] sm:$0xff] }
 0x2f8   : > { %6081 = vmatprep.mubr.f32.mxu1 %v9818_v34  ;;  %v3258_v25 = vpop.f32.mrf.mxu0 }
 0x2f9   : > { %5298 = vmatmul.mubr.msk.f32.gmra.mxu0 %vm6590_vm2, %v9819_v35 }
 0x2fa   : > { %4304 = vmatprep.mubr.f32.mxu0 %v9820_v47  ;;  %v3261_v28 = vpop.f32.mrf.mxu0 }
 0x2fb   : > { %v9190_v14 = vadd.f32 %v5914_v2, %v3261_v28  ;;  %6082 = vmatmul.mubr.msk.f32.gmra.mxu1 %vm464_vm0, %v9821_v4  ;;  %v5926_v19 = vpop.f32.mrf.mxu1  ;;  %v9824_v2 = vmov 0.0   ;;  %v9825_v4 = vld [vmem:[#allocation15_spill] sm:$0xff] }
 0x2fc   : > { %6084 = vmatprep.mubr.f32.mxu1 %v9822_v29  ;;  %v3263_v54 = vpop.f32.mrf.mxu0 }
 0x2fd   : > { %4305 = vmatmul.mubr.f32.gmra.mxu0 %v8657_v38  ;;  %v3521_v58 = vpop.f32.mrf.mxu1 }
 0x2fe   : > { %4309 = vmatprep.mubr.f32.mxu0 %v8486_v48  ;;  %v3266_v24 = vpop.f32.mrf.mxu0 }
 0x2ff   : > { %v9197_v3 = vadd.f32 %v3491_v5, %v3266_v24  ;;  %6085 = vmatmul.mubr.msk.f32.gmra.mxu1 %vm464_vm0, %v9823_v62  ;;  %v9827_v62 = vld [vmem:[#allocation43_spill] sm:$0xff] }
 0x300   : > { %v3268_v1 = vpop.f32.mrf.mxu0  ;;  %6087 = vmatprep.mubr.f32.mxu1 %v9824_v2 }
 0x301   : > { %5300 = vmatmul.mubr.msk.f32.gmra.mxu0 %vm6590_vm2, %v8673_v45 }
 0x302   : > { %4314 = vmatprep.mubr.f32.mxu0 %v8498_v9  ;;  %v3271_v33 = vpop.f32.mrf.mxu0 }
 0x303   : > { %v9206_v38 = vadd.f32 %v5917_v43, %v3271_v33  ;;  %v9208_v48 = vpop.f32.mrf.mxu1  ;;  %6088 = vmatmul.mubr.f32.gmra.mxu1 %v9824_v2 }
 0x304   : > { %v3273_v5 = vpop.f32.mrf.mxu0 }
 0x305   : > { %4315 = vmatmul.mubr.f32.gmra.mxu0 %v8691_v63  ;;  %v3531_v56 = vpop.f32.mrf.mxu1 }
 0x306   : > { %4319 = vmatprep.mubr.f32.mxu0 %v8533_v11  ;;  %v3276_v21 = vpop.f32.mrf.mxu0 }
 0x307   : > { %v9213_v31 = vadd.f32 %v3501_v16, %v3276_v21  ;;  %v3606_v55 = vpop.f32.mrf.mxu1 }
 0x308   : > { %v9216_v45 = vadd.f32 %v3606_v55, %v9032_v42  ;;  %v3278_v9 = vpop.f32.mrf.mxu0 }
 0x309   : > { %5302 = vmatmul.mubr.msk.f32.gmra.mxu0 %vm6590_vm2, %v8701_v37  ;;  %v3608_v43 = vpop.f32.mrf.mxu1 }
 0x30a   : > { %4324 = vmatprep.mubr.f32.mxu0 %v8545_v61  ;;  %v3281_v17 = vpop.f32.mrf.mxu0 }
 0x30b   : > { %v9222_v63 = vadd.f32 %v5920_v59, %v3281_v17  ;;  %v3611_v51 = vpop.f32.mrf.mxu1 }
 0x30c   : > { %v3612_v11 = vadd.f32 %v3611_v51, %v9029_v53  ;;  %v3283_v16 = vpop.f32.mrf.mxu0 }
 0x30d   : > { %4325 = vmatmul.mubr.f32.gmra.mxu0 %v8720_v0  ;;  %v3613_v34 = vpop.f32.mrf.mxu1 }
 0x30e   : > { %4329 = vmatprep.mubr.f32.mxu0 %v8579_v7  ;;  %v3286_v42 = vpop.f32.mrf.mxu0 }
 0x30f   : > { %v9227_v25 = vadd.f32 %v3511_v30, %v3286_v42  ;;  %v3616_v35 = vpop.f32.mrf.mxu1 }
 0x310   : > { %v3617_v37 = vadd.f32 %v3616_v35, %v9040_v10  ;;  %v3288_v47 = vpop.f32.mrf.mxu0 }
 0x311   : > { %5304 = vmatmul.mubr.msk.f32.gmra.mxu0 %vm6590_vm2, %v8730_v8  ;;  %v3618_v61 = vpop.f32.mrf.mxu1 }
 0x312   : > { %4334 = vmatprep.mubr.f32.mxu0 %v8591_v15  ;;  %v3291_v53 = vpop.f32.mrf.mxu0  ;;  %v9826_v15 = vld [vmem:[#allocation46_spill] sm:$0xff] }
 0x313   : > { %v9234_v59 = vadd.f32 %v5923_v36, %v3291_v53  ;;  %v3621_v0 = vpop.f32.mrf.mxu1 }
 0x314   : > { %v3622_v7 = vadd.f32 %v3621_v0, %v9047_v32  ;;  %v3293_v28 = vpop.f32.mrf.mxu0 }
 0x315   : > { %4335 = vmatmul.mubr.f32.gmra.mxu0 %v8749_v27  ;;  %v3623_v30 = vpop.f32.mrf.mxu1 }
 0x316   : > { %4339 = vmatprep.mubr.f32.mxu0 %v9825_v4  ;;  %v3296_v10 = vpop.f32.mrf.mxu0 }
 0x317   : > { %v9239_v29 = vadd.f32 %v3521_v58, %v3296_v10  ;;  %v3626_v54 = vpop.f32.mrf.mxu1  ;;  %v9828_v58 = vld [vmem:[#allocation47_spill] sm:$0xff] }
 0x318   : > { %v3627_v8 = vadd.f32 %v3626_v54, %v9053_v22  ;;  %v3298_v24 = vpop.f32.mrf.mxu0 }
 0x319   : > { %5306 = vmatmul.mubr.msk.f32.gmra.mxu0 %vm6590_vm2, %v9826_v15  ;;  %v3628_v36 = vpop.f32.mrf.mxu1 }
 0x31a   : > { %4344 = vmatprep.mubr.f32.mxu0 %v9827_v62  ;;  %v3301_v32 = vpop.f32.mrf.mxu0 }
 0x31b   : > { %v9246_v1 = vadd.f32 %v5926_v19, %v3301_v32  ;;  %v3631_v27 = vpop.f32.mrf.mxu1 }
 0x31c   : > { %v3632_v33 = vadd.f32 %v3631_v27, %v9063_v13  ;;  %v3303_v5 = vpop.f32.mrf.mxu0 }
 0x31d   : > { %4345 = vmatmul.mubr.f32.gmra.mxu0 %v9828_v58  ;;  %v3633_v21 = vpop.f32.mrf.mxu1 }
 0x31e   : > { %4349 = vmatprep.mubr.f32.mxu0 %v9824_v2  ;;  %v3306_v22 = vpop.f32.mrf.mxu0 }
 0x31f   : > { %v9251_v55 = vadd.f32 %v3531_v56, %v3306_v22  ;;  %v3636_v6 = vpop.f32.mrf.mxu1 }
 0x320   : > { %v3637_v9 = vadd.f32 %v3636_v6, %v9069_v26  ;;  %v3308_v43 = vpop.f32.mrf.mxu0 }
 0x321   : > { %4350 = vmatmul.mubr.f32.gmra.mxu0 %v9824_v2  ;;  %v3638_v19 = vpop.f32.mrf.mxu1 }
 0x322   : > { %4354 = vmatprep.mubr.f32.mxu0 %v9824_v2  ;;  %v3311_v17 = vpop.f32.mrf.mxu0 }
 0x323   : > { %v9257_v13 = vadd.f32 %v9208_v48, %v3311_v17  ;;  %v3641_v51 = vpop.f32.mrf.mxu1 }
 0x324   : > { %v3642_v16 = vadd.f32 %v3641_v51, %v9079_v52  ;;  %v3313_v34 = vpop.f32.mrf.mxu0 }
 0x325   : > { %4355 = vmatmul.mubr.f32.gmra.mxu0 %v9824_v2  ;;  %v3643_v56 = vpop.f32.mrf.mxu1 }
 0x326   : > { %v5964_v42 = vpop.f32.mrf.mxu0 }
 0x327   : > { %v3646_v35 = vpop.f32.mrf.mxu1  ;;  %v9261_v26 = vadd.f32 %v5964_v42, %v3612_v11 }
 0x328   : > { %v3647_v47 = vadd.f32 %v3646_v35, %v9085_v50  ;;  %v3831_v61 = vpop.f32.mrf.mxu0 }
 0x329   : > { %v3648_v53 = vpop.f32.mrf.mxu1  ;;  %v9265_v0 = vadd.f32 %v3831_v61, %v9216_v45 }
 0x32b   : > { %v3651_v48 = vpop.f32.mrf.mxu1  ;;  %v5967_v28 = vpop.f32.mrf.mxu0 }
 0x32c   : > { %v3652_v30 = vadd.f32 %v3651_v48, %v9094_v18  ;;  %v9268_v52 = vadd.f32 %v5967_v28, %v3622_v7 }
 0x32d   : > { %v3653_v4 = vpop.f32.mrf.mxu1  ;;  %v3841_v2 = vpop.f32.mrf.mxu0 }
 0x32e   : > { %v9270_v10 = vadd.f32 %v3841_v2, %v3617_v37 }
 0x32f   : > { %v3656_v54 = vpop.f32.mrf.mxu1 }
 0x330   : > { %v3657_v11 = vadd.f32 %v3656_v54, %v9101_v46  ;;  %v5970_v24 = vpop.f32.mrf.mxu0 }
 0x331   : > { %v9273_v50 = vadd.f32 %v5970_v24, %v3632_v33  ;;  %v3658_v15 = vpop.f32.mrf.mxu1 }
 0x332   : > { %v3851_v36 = vpop.f32.mrf.mxu0 }
 0x333   : > { %v9275_v45 = vadd.f32 %v3851_v36, %v3627_v8  ;;  %v3661_v62 = vpop.f32.mrf.mxu1 }
 0x334   : > { %v3662_v32 = vadd.f32 %v3661_v62, %v9110_v57 }
 0x335   : > { %v5973_v18 = vpop.f32.mrf.mxu0  ;;  %v3663_v7 = vpop.f32.mrf.mxu1 }
 0x336   : > { %v9278_v27 = vadd.f32 %v5973_v18, %v3642_v16 }
 0x337   : > { %v3861_v5 = vpop.f32.mrf.mxu0  ;;  %v3666_v37 = vpop.f32.mrf.mxu1 }
 0x338   : > { %v9280_v58 = vadd.f32 %v3861_v5, %v3637_v9  ;;  %v3667_v46 = vadd.f32 %v3666_v37, %v9117_v44 }
 0x339   : > { %v5976_v21 = vpop.f32.mrf.mxu0  ;;  %v3668_v33 = vpop.f32.mrf.mxu1 }
 0x33a   : > { %v9283_v22 = vadd.f32 %v5976_v21, %v3652_v30 }
 0x33b   : > { %v3871_v6 = vpop.f32.mrf.mxu0  ;;  %v3671_v8 = vpop.f32.mrf.mxu1 }
 0x33c   : > { %v9285_v43 = vadd.f32 %v3871_v6, %v3647_v47  ;;  %v3672_v57 = vadd.f32 %v3671_v8, %v9126_v12 }
 0x33d   : > { %v5979_v19 = vpop.f32.mrf.mxu0  ;;  %v3673_v17 = vpop.f32.mrf.mxu1 }
 0x33e   : > { %v9288_v51 = vadd.f32 %v5979_v19, %v3662_v32 }
 0x33f   : > { %v3881_v16 = vpop.f32.mrf.mxu0  ;;  %v3676_v34 = vpop.f32.mrf.mxu1 }
 0x340   : > { %v9290_v9 = vadd.f32 %v3881_v16, %v3657_v11  ;;  %v3677_v44 = vadd.f32 %v3676_v34, %v9133_v20 }
 0x341   : > { %v5982_v56 = vpop.f32.mrf.mxu0  ;;  %v3678_v42 = vpop.f32.mrf.mxu1 }
 0x342   : > { %v9293_v35 = vadd.f32 %v5982_v56, %v3672_v57 }
 0x343   : > { %v3891_v61 = vpop.f32.mrf.mxu0  ;;  %v3681_v53 = vpop.f32.mrf.mxu1 }
 0x344   : > { %v9295_v47 = vadd.f32 %v3891_v61, %v3667_v46  ;;  %v3682_v12 = vadd.f32 %v3681_v53, %v9142_v39 }
 0x345   : > { %v5985_v48 = vpop.f32.mrf.mxu0  ;;  %v3683_v28 = vpop.f32.mrf.mxu1 }
 0x346   : > { %v9298_v30 = vadd.f32 %v5985_v48, %v3682_v12 }
 0x347   : > { %v3901_v4 = vpop.f32.mrf.mxu0  ;;  %v3686_v2 = vpop.f32.mrf.mxu1 }
 0x348   : > { %v9300_v54 = vadd.f32 %v3901_v4, %v3677_v44  ;;  %v3687_v20 = vadd.f32 %v3686_v2, %v9149_v41 }
 0x349   : > { %v5988_v11 = vpop.f32.mrf.mxu0  ;;  %v3688_v24 = vpop.f32.mrf.mxu1 }
 0x34b   : > { %v3911_v15 = vpop.f32.mrf.mxu0  ;;  %v3691_v36 = vpop.f32.mrf.mxu1 }
 0x34c   : > { %v9303_v62 = vadd.f32 %v3911_v15, %v3687_v20  ;;  %v3692_v32 = vadd.f32 %v3691_v36, %v9158_v40 }
 0x34d   : > { %v5991_v18 = vpop.f32.mrf.mxu0  ;;  %v3693_v39 = vpop.f32.mrf.mxu1 }
 0x34e   : > { %v9306_v7 = vadd.f32 %v5988_v11, %v3692_v32 }
 0x34f   : > { %v3921_v5 = vpop.f32.mrf.mxu0  ;;  %v3696_v37 = vpop.f32.mrf.mxu1 }
 0x350   : > { %v3697_v46 = vadd.f32 %v3696_v37, %v9165_v60 }
 0x351   : > { %v5994_v21 = vpop.f32.mrf.mxu0  ;;  %v3698_v33 = vpop.f32.mrf.mxu1 }
 0x352   : > { %v9309_v6 = vadd.f32 %v3921_v5, %v3697_v46 }
 0x353   : > { %v3931_v41 = vpop.f32.mrf.mxu0  ;;  %v3701_v8 = vpop.f32.mrf.mxu1 }
 0x354   : > { %v3702_v57 = vadd.f32 %v3701_v8, %v9174_v49 }
 0x355   : > { %v5997_v19 = vpop.f32.mrf.mxu0  ;;  %v3703_v17 = vpop.f32.mrf.mxu1 }
 0x356   : > { %v9312_v16 = vadd.f32 %v5991_v18, %v3702_v57 }
 0x357   : > { %v3941_v40 = vpop.f32.mrf.mxu0  ;;  %v3706_v34 = vpop.f32.mrf.mxu1 }
 0x358   : > { %v3707_v44 = vadd.f32 %v3706_v34, %v9181_v23 }
 0x359   : > { %v6000_v56 = vpop.f32.mrf.mxu0  ;;  %v3708_v42 = vpop.f32.mrf.mxu1 }
 0x35a   : > { %v9315_v61 = vadd.f32 %v3931_v41, %v3707_v44 }
 0x35b   : > { %v3951_v60 = vpop.f32.mrf.mxu0  ;;  %v3711_v53 = vpop.f32.mrf.mxu1 }
 0x35c   : > { %v3712_v12 = vadd.f32 %v3711_v53, %v9190_v14 }
 0x35d   : > { %v6003_v48 = vpop.f32.mrf.mxu0  ;;  %v3713_v28 = vpop.f32.mrf.mxu1 }
 0x35e   : > { %v9318_v4 = vadd.f32 %v5994_v21, %v3712_v12 }
 0x35f   : > { %v3961_v49 = vpop.f32.mrf.mxu0  ;;  %v3716_v2 = vpop.f32.mrf.mxu1 }
 0x360   : > { %v3717_v20 = vadd.f32 %v3716_v2, %v9197_v3 }
 0x361   : > { %v6006_v11 = vpop.f32.mrf.mxu0  ;;  %v3718_v24 = vpop.f32.mrf.mxu1 }
 0x362   : > { %v9321_v15 = vadd.f32 %v3941_v40, %v3717_v20 }
 0x363   : > { %v3971_v23 = vpop.f32.mrf.mxu0  ;;  %v3721_v36 = vpop.f32.mrf.mxu1 }
 0x364   : > { %v3722_v32 = vadd.f32 %v3721_v36, %v9206_v38 }
 0x365   : > { %v6009_v18 = vpop.f32.mrf.mxu0  ;;  %v3723_v39 = vpop.f32.mrf.mxu1 }
 0x366   : > { %v9324_v5 = vadd.f32 %v5997_v19, %v3722_v32 }
 0x367   : > { %v3981_v14 = vpop.f32.mrf.mxu0  ;;  %v3726_v37 = vpop.f32.mrf.mxu1 }
 0x368   : > { %v3727_v46 = vadd.f32 %v3726_v37, %v9213_v31 }
 0x369   : > { %v4201_v21 = vpop.f32.mrf.mxu0  ;;  %v3728_v33 = vpop.f32.mrf.mxu1 }
 0x36a   : > { %v9327_v41 = vadd.f32 %v3951_v60, %v3727_v46 }
 0x36b   : > { %v4203_v3 = vpop.f32.mrf.mxu0  ;;  %v3731_v8 = vpop.f32.mrf.mxu1 }
 0x36c   : > { %v3732_v57 = vadd.f32 %v3731_v8, %v9222_v63 }
 0x36d   : > { %v4206_v17 = vpop.f32.mrf.mxu0  ;;  %v3733_v40 = vpop.f32.mrf.mxu1 }
 0x36e   : > { %v9330_v34 = vadd.f32 %v6000_v56, %v3732_v57 }
 0x36f   : > { %v4208_v38 = vpop.f32.mrf.mxu0  ;;  %v3736_v44 = vpop.f32.mrf.mxu1 }
 0x370   : > { %v3737_v19 = vadd.f32 %v3736_v44, %v9227_v25 }
 0x371   : > { %v4211_v42 = vpop.f32.mrf.mxu0  ;;  %v3738_v53 = vpop.f32.mrf.mxu1 }
 0x372   : > { %v9333_v12 = vadd.f32 %v3961_v49, %v3737_v19 }
 0x373   : > { %v4213_v31 = vpop.f32.mrf.mxu0  ;;  %v3741_v28 = vpop.f32.mrf.mxu1 }
 0x374   : > { %v3742_v60 = vadd.f32 %v3741_v28, %v9234_v59 }
 0x375   : > { %v4216_v2 = vpop.f32.mrf.mxu0  ;;  %v3743_v20 = vpop.f32.mrf.mxu1 }
 0x376   : > { %v9336_v24 = vadd.f32 %v6003_v48, %v3742_v60 }
 0x377   : > { %v4218_v63 = vpop.f32.mrf.mxu0  ;;  %v3746_v36 = vpop.f32.mrf.mxu1 }
 0x378   : > { %v3747_v56 = vadd.f32 %v3746_v36, %v9239_v29  ;;  %v4657_v36 = vld [vmem:[%s6267_s23 + $0x8] sm:$0xff] }
 0x379   : > { %v4221_v32 = vpop.f32.mrf.mxu0  ;;  %v3748_v39 = vpop.f32.mrf.mxu1 }
 0x37a   : > { %v9339_v37 = vadd.f32 %v3971_v23, %v3747_v56 }
 0x37b   : > { %v4223_v25 = vpop.f32.mrf.mxu0  ;;  %v3751_v46 = vpop.f32.mrf.mxu1 }
 0x37c   : > { %v3752_v49 = vadd.f32 %v3751_v46, %v9246_v1  ;;  %v4656_v46 = vld [vmem:[%s6267_s23] sm:$0xff] }
 0x37d   : > { %v4226_v33 = vpop.f32.mrf.mxu0  ;;  %v3753_v3 = vpop.f32.mrf.mxu1 }
 0x37e   : > { %v9342_v8 = vadd.f32 %v6006_v11, %v3752_v49 }
 0x37f   : > { %v4228_v59 = vpop.f32.mrf.mxu0  ;;  %v3756_v57 = vpop.f32.mrf.mxu1 }
 0x380   : > { %v3757_v48 = vadd.f32 %v3756_v57, %v9251_v55  ;;  %v9357_v55 = vld [vmem:[%s9503_s4] ss:$0 sm:$0xff] }
 0x381   : > { %v9345_v40 = vpop.f32.mrf.mxu0  ;;  %v3758_v38 = vpop.f32.mrf.mxu1 }
 0x382   : > { %v9347_v29 = vadd.f32 %v3981_v14, %v3757_v48 }
 0x383   : > { %v4233_v23 = vpop.f32.mrf.mxu0  ;;  %v3761_v44 = vpop.f32.mrf.mxu1 }
 0x384   : > { %v3762_v19 = vadd.f32 %v3761_v44, %v9257_v13 }
 0x385   : > { %v4236_v53 = vpop.f32.mrf.mxu0  ;;  %v3763_v1 = vpop.f32.mrf.mxu1 }
 0x386   : > { %v9350_v31 = vadd.f32 %v6009_v18, %v3762_v19 }
 0x387   : > { %v4238_v11 = vpop.f32.mrf.mxu0  ;;  %v6044_v28 = vpop.f32.mrf.mxu1 }
 0x388   : > { %v4432_v60 = vadd.f32 %v6044_v28, %v4206_v17 }
 0x389   : > { %v9352_v20 = vpop.f32.mrf.mxu0  ;;  %v4426_v14 = vpop.f32.mrf.mxu1 }
 0x38a   : > { %v4586_v63 = vadd.f32 %v4432_v60, %v9261_v26  ;;  %v4427_v13 = vadd.f32 %v4426_v14, %v4201_v21  ;;  %v4659_v21 = vld [vmem:[%s6267_s23 + $0x18] sm:$0xff] }
 0x38b   : > { %v4243_v56 = vpop.f32.mrf.mxu0  ;;  %v6047_v18 = vpop.f32.mrf.mxu1 }
 0x38c   : > { %v4625_v39 = vadd.f32 %v9357_v55, %v4586_v63  ;;  %v4585_v17 = vadd.f32 %v4427_v13, %v9265_v0  ;;  %v4442_v25 = vadd.f32 %v6047_v18, %v4216_v2 }
 0x38d   : > { %v4246_v49 = vpop.f32.mrf.mxu0  ;;  %v4436_v3 = vpop.f32.mrf.mxu1 }
 0x38e   : > { %v4689_v59 = vadd.f32 %v4657_v36, %v4625_v39  ;;  %v4624_v57 = vadd.f32 %v9357_v55, %v4585_v17  ;;  %v4588_v48 = vadd.f32 %v4442_v25, %v9268_v52  ;;  %v4437_v26 = vadd.f32 %v4436_v3, %v4211_v42  ;;  %v4658_v52 = vld [vmem:[%s6267_s23 + $0x10] sm:$0xff]  ;;  %v4661_v39 = vld [vmem:[%s6267_s23 + $0x28] sm:$0xff] }
 0x38f   : > { %v4248_v0 = vpop.f32.mrf.mxu0  ;;  %v6050_v2 = vpop.f32.mrf.mxu1 }
 0x390   : > { %v4721_v38 = vmax.f32 %v4689_v59, 0.0  ;;  %v4688_v23 = vadd.f32 %v4656_v46, %v4624_v57  ;;  %v4627_v44 = vadd.f32 %v9357_v55, %v4588_v48  ;;  %v4587_v19 = vadd.f32 %v4437_v26, %v9270_v10  ;;  %v4660_v46 = vld [vmem:[%s6267_s23 + $0x20] sm:$0xff] }
 0x391   : > { %v4251_v42 = vpop.f32.mrf.mxu0  ;;  %v4452_v1 = vadd.f32 %v6050_v2, %v4226_v33  ;;  %v4446_v11 = vpop.f32.mrf.mxu1 }
 0x392   : > { %4753 = vst [vmem:[%s9371_s10 + $0x8] sm:$0xff] %v4721_v38  ;;  %v4720_v28 = vmax.f32 %v4688_v23, 0.0  ;;  %v4691_v60 = vadd.f32 %v4659_v21, %v4627_v44  ;;  %v4626_v14 = vadd.f32 %v9357_v55, %v4587_v19  ;;  %v4447_v63 = vadd.f32 %v4446_v11, %v4221_v32  ;;  %v4663_v21 = vld [vmem:[%s6267_s23 + $0x38] sm:$0xff]  ;;  %v4662_v19 = vld [vmem:[%s6267_s23 + $0x30] sm:$0xff] }
 0x393   : > { %v4590_v13 = vadd.f32 %v4452_v1, %v9273_v50  ;;  %v4253_v36 = vpop.f32.mrf.mxu0  ;;  %v6053_v56 = vpop.f32.mrf.mxu1 }
 0x394   : > { %4752 = vst [vmem:[%s9371_s10] sm:$0xff] %v4720_v28  ;;  %v4723_v10 = vmax.f32 %v4691_v60, 0.0  ;;  %v4690_v18 = vadd.f32 %v4658_v52, %v4626_v14  ;;  %v4589_v33 = vadd.f32 %v4447_v63, %v9275_v45  ;;  %v4462_v17 = vadd.f32 %v6053_v56, %v4236_v53  ;;  %v4665_v60 = vld [vmem:[%s6267_s23 + $0x48] sm:$0xff] }
 0x395   : > { %v4629_v25 = vadd.f32 %v9357_v55, %v4590_v13  ;;  %v4256_v3 = vpop.f32.mrf.mxu0  ;;  %v4456_v59 = vpop.f32.mrf.mxu1 }
 0x396   : > { %4755 = vst [vmem:[%s9371_s10 + $0x18] sm:$0xff] %v4723_v10  ;;  %v4722_v32 = vmax.f32 %v4690_v18, 0.0  ;;  %v4628_v50 = vadd.f32 %v9357_v55, %v4589_v33  ;;  %v4592_v57 = vadd.f32 %v4462_v17, %v9278_v27  ;;  %v4457_v48 = vadd.f32 %v4456_v59, %v9345_v40  ;;  %v4664_v17 = vld [vmem:[%s6267_s23 + $0x40] sm:$0xff]  ;;  %v4667_v59 = vld [vmem:[%s6267_s23 + $0x58] sm:$0xff] }
 0x397   : > { %v4693_v26 = vadd.f32 %v4661_v39, %v4629_v25  ;;  %v4258_v0 = vpop.f32.mrf.mxu0  ;;  %v6056_v45 = vpop.f32.mrf.mxu1 }
 0x398   : > { %4754 = vst [vmem:[%s9371_s10 + $0x10] sm:$0xff] %v4722_v32  ;;  %v4692_v53 = vadd.f32 %v4660_v46, %v4628_v50  ;;  %v4631_v2 = vadd.f32 %v9357_v55, %v4592_v57  ;;  %v4591_v38 = vadd.f32 %v4457_v48, %v9280_v58  ;;  %v4472_v23 = vadd.f32 %v6056_v45, %v4246_v49 }
 0x399   : > { %v4725_v44 = vmax.f32 %v4693_v26, 0.0  ;;  %v4261_v52 = vpop.f32.mrf.mxu0  ;;  %v4466_v27 = vpop.f32.mrf.mxu1 }
 0x39a   : > { %v4724_v1 = vmax.f32 %v4692_v53, 0.0  ;;  %v4695_v40 = vadd.f32 %v4663_v21, %v4631_v2  ;;  %v4630_v11 = vadd.f32 %v9357_v55, %v4591_v38  ;;  %v4594_v28 = vadd.f32 %v4472_v23, %v9283_v22  ;;  %v4666_v21 = vld [vmem:[%s6267_s23 + $0x50] sm:$0xff]  ;;  %v4669_v23 = vld [vmem:[%s6267_s23 + $0x68] sm:$0xff] }
 0x39b   : > { %4757 = vst [vmem:[%s9371_s10 + $0x28] sm:$0xff] %v4725_v44  ;;  %v4263_v14 = vpop.f32.mrf.mxu0  ;;  %v4467_v63 = vadd.f32 %v4466_v27, %v9352_v20  ;;  %v6059_v13 = vpop.f32.mrf.mxu1 }
 0x39c   : > { %4756 = vst [vmem:[%s9371_s10 + $0x20] sm:$0xff] %v4724_v1  ;;  %v4727_v58 = vmax.f32 %v4695_v40, 0.0  ;;  %v4694_v49 = vadd.f32 %v4662_v19, %v4630_v11  ;;  %v4633_v36 = vadd.f32 %v9357_v55, %v4594_v28  ;;  %v4482_v56 = vadd.f32 %v6059_v13, %v4256_v3  ;;  %v4668_v11 = vld [vmem:[%s6267_s23 + $0x60] sm:$0xff] }
 0x39d   : > { %v4593_v10 = vadd.f32 %v4467_v63, %v9285_v43  ;;  %v4266_v18 = vpop.f32.mrf.mxu0  ;;  %v4476_v39 = vpop.f32.mrf.mxu1 }
 0x39e   : > { %4759 = vst [vmem:[%s9371_s10 + $0x38] sm:$0xff] %v4727_v58  ;;  %v4726_v22 = vmax.f32 %v4694_v49, 0.0  ;;  %v4697_v33 = vadd.f32 %v4665_v60, %v4633_v36  ;;  %v4596_v20 = vadd.f32 %v4482_v56, %v9288_v51  ;;  %v4477_v25 = vadd.f32 %v4476_v39, %v4251_v42 }
 0x39f   : > { %v4632_v46 = vadd.f32 %v9357_v55, %v4593_v10  ;;  %v4268_v32 = vpop.f32.mrf.mxu0  ;;  %v6062_v50 = vpop.f32.mrf.mxu1  ;;  %v4671_v10 = vld [vmem:[%s6267_s23 + $0x78] sm:$0xff] }
 0x3a0   : > { %4758 = vst [vmem:[%s9371_s10 + $0x30] sm:$0xff] %v4726_v22  ;;  %v4729_v3 = vmax.f32 %v4697_v33, 0.0  ;;  %v4635_v43 = vadd.f32 %v9357_v55, %v4596_v20  ;;  %v4595_v57 = vadd.f32 %v4477_v25, %v9290_v9  ;;  %v4492_v48 = vadd.f32 %v6062_v50, %v4266_v18  ;;  %v4670_v20 = vld [vmem:[%s6267_s23 + $0x70] sm:$0xff] }
 0x3a1   : > { %v4696_v26 = vadd.f32 %v4664_v17, %v4632_v46  ;;  %v4271_v0 = vpop.f32.mrf.mxu0  ;;  %v4486_v51 = vpop.f32.mrf.mxu1 }
 0x3a2   : > { %4761 = vst [vmem:[%s9371_s10 + $0x48] sm:$0xff] %v4729_v3  ;;  %v4699_v42 = vadd.f32 %v4667_v59, %v4635_v43  ;;  %v4634_v45 = vadd.f32 %v9357_v55, %v4595_v57  ;;  %v4598_v53 = vadd.f32 %v4492_v48, %v9293_v35  ;;  %v4487_v2 = vadd.f32 %v4486_v51, %v4261_v52 }
 0x3a3   : > { %v4728_v38 = vmax.f32 %v4696_v26, 0.0  ;;  %v4273_v44 = vpop.f32.mrf.mxu0  ;;  %v6065_v19 = vpop.f32.mrf.mxu1 }
 0x3a4   : > { %v4731_v9 = vmax.f32 %v4699_v42, 0.0  ;;  %v4698_v27 = vadd.f32 %v4666_v21, %v4634_v45  ;;  %v4637_v1 = vadd.f32 %v9357_v55, %v4598_v53  ;;  %v4597_v40 = vadd.f32 %v4487_v2, %v9295_v47  ;;  %v4673_v45 = vld [vmem:[%s6267_s23 + $0x88] sm:$0xff] }
 0x3a5   : > { %4760 = vst [vmem:[%s9371_s10 + $0x40] sm:$0xff] %v4728_v38  ;;  %v4276_v28 = vpop.f32.mrf.mxu0  ;;  %v4496_v60 = vpop.f32.mrf.mxu1 }
 0x3a6   : > { %4763 = vst [vmem:[%s9371_s10 + $0x58] sm:$0xff] %v4731_v9  ;;  %v4730_v35 = vmax.f32 %v4698_v27, 0.0  ;;  %v4701_v52 = vadd.f32 %v4669_v23, %v4637_v1  ;;  %v4636_v14 = vadd.f32 %v9357_v55, %v4597_v40  ;;  %v4502_v63 = vadd.f32 %v6065_v19, %v4276_v28  ;;  %v4674_v27 = vld [vmem:[%s6267_s23 + $0x90] sm:$0xff] }
 0x3a7   : > { %v4278_v13 = vpop.f32.mrf.mxu0  ;;  %v4497_v58 = vadd.f32 %v4496_v60, %v4271_v0  ;;  %v6068_v49 = vpop.f32.mrf.mxu1 }
 0x3a8   : > { %4762 = vst [vmem:[%s9371_s10 + $0x50] sm:$0xff] %v4730_v35  ;;  %v4733_v36 = vmax.f32 %v4701_v52, 0.0  ;;  %v4700_v47 = vadd.f32 %v4668_v11, %v4636_v14  ;;  %v4600_v56 = vadd.f32 %v4502_v63, %v9298_v30  ;;  %v4675_v63 = vld [vmem:[%s6267_s23 + $0x98] sm:$0xff] }
 0x3a9   : > { %v4599_v18 = vadd.f32 %v4497_v58, %v9300_v54  ;;  %v4281_v39 = vpop.f32.mrf.mxu0  ;;  %v4506_v22 = vpop.f32.mrf.mxu1  ;;  %v4672_v54 = vld [vmem:[%s6267_s23 + $0x80] sm:$0xff] }
 0x3aa   : > { %4765 = vst [vmem:[%s9371_s10 + $0x68] sm:$0xff] %v4733_v36  ;;  %v4732_v33 = vmax.f32 %v4700_v47, 0.0  ;;  %v4639_v17 = vadd.f32 %v9357_v55, %v4600_v56  ;;  %v4507_v25 = vadd.f32 %v4506_v22, %v4281_v39 }
 0x3ab   : > { %v4638_v46 = vadd.f32 %v9357_v55, %v4599_v18  ;;  %v4283_v59 = vpop.f32.mrf.mxu0  ;;  %v6071_v43 = vpop.f32.mrf.mxu1  ;;  %v4676_v18 = vld [vmem:[%s6267_s23 + $0xa0] sm:$0xff] }
 0x3ac   : > { %4764 = vst [vmem:[%s9371_s10 + $0x60] sm:$0xff] %v4732_v33  ;;  %v4703_v30 = vadd.f32 %v4671_v10, %v4639_v17  ;;  %v4601_v32 = vadd.f32 %v4507_v25, %v9303_v62  ;;  %v4677_v59 = vld [vmem:[%s6267_s23 + $0xa8] sm:$0xff] }
 0x3ad   : > { %v4702_v50 = vadd.f32 %v4670_v20, %v4638_v46  ;;  %v4286_v3 = vpop.f32.mrf.mxu0  ;;  %v4516_v53 = vpop.f32.mrf.mxu1 }
 0x3ae   : > { %v4735_v57 = vmax.f32 %v4703_v30, 0.0  ;;  %v4640_v48 = vadd.f32 %v9357_v55, %v4601_v32  ;;  %v4512_v26 = vadd.f32 %v6068_v49, %v4286_v3 }
 0x3af   : > { %v4734_v21 = vmax.f32 %v4702_v50, 0.0  ;;  %v4288_v0 = vpop.f32.mrf.mxu0  ;;  %v6074_v1 = vpop.f32.mrf.mxu1 }
 0x3b0   : > { %4767 = vst [vmem:[%s9371_s10 + $0x78] sm:$0xff] %v4735_v57  ;;  %v4704_v51 = vadd.f32 %v4672_v54, %v4640_v48  ;;  %v4602_v42 = vadd.f32 %v4512_v26, %v9306_v7  ;;  %v4678_v48 = vld [vmem:[%s6267_s23 + $0xb0] sm:$0xff] }
 0x3b1   : > { %4766 = vst [vmem:[%s9371_s10 + $0x70] sm:$0xff] %v4734_v21  ;;  %v4291_v62 = vpop.f32.mrf.mxu0  ;;  %v4526_v14 = vpop.f32.mrf.mxu1 }
 0x3b2   : > { %v4736_v2 = vmax.f32 %v4704_v51, 0.0  ;;  %v4641_v38 = vadd.f32 %v9357_v55, %v4602_v42  ;;  %v4517_v23 = vadd.f32 %v4516_v53, %v4291_v62  ;;  %v4679_v62 = vld [vmem:[%s6267_s23 + $0xb8] sm:$0xff] }
 0x3b3   : > { %v4293_v44 = vpop.f32.mrf.mxu0  ;;  %v6077_v10 = vpop.f32.mrf.mxu1 }
 0x3b4   : > { %4768 = vst [vmem:[%s9371_s10 + $0x80] sm:$0xff] %v4736_v2  ;;  %v4705_v19 = vadd.f32 %v4673_v45, %v4641_v38  ;;  %v4603_v9 = vadd.f32 %v4517_v23, %v9309_v6 }
 0x3b5   : > { %v4296_v40 = vpop.f32.mrf.mxu0  ;;  %v4536_v46 = vpop.f32.mrf.mxu1 }
 0x3b6   : > { %v4737_v7 = vmax.f32 %v4705_v19, 0.0  ;;  %v4642_v11 = vadd.f32 %v9357_v55, %v4603_v9  ;;  %v4522_v28 = vadd.f32 %v6071_v43, %v4296_v40 }
 0x3b7   : > { %v4298_v60 = vpop.f32.mrf.mxu0  ;;  %v6080_v57 = vpop.f32.mrf.mxu1 }
 0x3b8   : > { %4769 = vst [vmem:[%s9371_s10 + $0x88] sm:$0xff] %v4737_v7  ;;  %v4706_v35 = vadd.f32 %v4674_v27, %v4642_v11  ;;  %v4604_v52 = vadd.f32 %v4522_v28, %v9312_v16 }
 0x3b9   : > { %v4301_v13 = vpop.f32.mrf.mxu0  ;;  %v4546_v53 = vpop.f32.mrf.mxu1 }
 0x3ba   : > { %v4738_v58 = vmax.f32 %v4706_v35, 0.0  ;;  %v4643_v6 = vadd.f32 %v9357_v55, %v4604_v52  ;;  %v4527_v49 = vadd.f32 %v4526_v14, %v4301_v13  ;;  %v4681_v14 = vld [vmem:[%s6267_s23 + $0xc8] sm:$0xff] }
 0x3bb   : > { %v4303_v36 = vpop.f32.mrf.mxu0  ;;  %v6083_v27 = vpop.f32.mrf.mxu1 }
 0x3bc   : > { %4770 = vst [vmem:[%s9371_s10 + $0x90] sm:$0xff] %v4738_v58  ;;  %v4707_v47 = vadd.f32 %v4675_v63, %v4643_v6  ;;  %v4605_v56 = vadd.f32 %v4527_v49, %v9315_v61 }
 0x3bd   : > { %v4306_v39 = vpop.f32.mrf.mxu0  ;;  %v4556_v52 = vpop.f32.mrf.mxu1 }
 0x3be   : > { %v4739_v22 = vmax.f32 %v4707_v47, 0.0  ;;  %v4644_v16 = vadd.f32 %v9357_v55, %v4605_v56  ;;  %v4532_v33 = vadd.f32 %v6074_v1, %v4306_v39  ;;  %v4680_v1 = vld [vmem:[%s6267_s23 + $0xc0] sm:$0xff]  ;;  %v4682_v56 = vld [vmem:[%s6267_s23 + $0xd0] sm:$0xff] }
 0x3bf   : > { %v4308_v17 = vpop.f32.mrf.mxu0  ;;  %v6086_v47 = vpop.f32.mrf.mxu1 }
 0x3c0   : > { %4771 = vst [vmem:[%s9371_s10 + $0x98] sm:$0xff] %v4739_v22  ;;  %v4708_v20 = vadd.f32 %v4676_v18, %v4644_v16  ;;  %v4606_v25 = vadd.f32 %v4532_v33, %v9318_v4 }
 0x3c1   : > { %v4311_v30 = vpop.f32.mrf.mxu0  ;;  %v4566_v17 = vpop.f32.mrf.mxu1 }
 0x3c2   : > { %v4740_v32 = vmax.f32 %v4708_v20, 0.0  ;;  %v4645_v61 = vadd.f32 %v9357_v55, %v4606_v25  ;;  %v4537_v50 = vadd.f32 %v4536_v46, %v4311_v30  ;;  %v4683_v20 = vld [vmem:[%s6267_s23 + $0xd8] sm:$0xff] }
 0x3c3   : > { %v4313_v54 = vpop.f32.mrf.mxu0 }
 0x3c4   : > { %4772 = vst [vmem:[%s9371_s10 + $0xa0] sm:$0xff] %v4740_v32  ;;  %v4709_v3 = vadd.f32 %v4677_v59, %v4645_v61  ;;  %v4607_v43 = vadd.f32 %v4537_v50, %v9321_v15  ;;  %v6089_v32 = vpop.f32.mrf.mxu1  ;;  %v4684_v54 = vld [vmem:[%s6267_s23 + $0xe0] sm:$0xff] }
 0x3c5   : > { %v4316_v26 = vpop.f32.mrf.mxu0 }
 0x3c6   : > { %v4741_v21 = vmax.f32 %v4709_v3, 0.0  ;;  %v4646_v4 = vadd.f32 %v9357_v55, %v4607_v43  ;;  %v4542_v0 = vadd.f32 %v6077_v10, %v4316_v26  ;;  %v4576_v26 = vpop.f32.mrf.mxu1 }
 0x3c7   : > { %v4318_v51 = vpop.f32.mrf.mxu0 }
 0x3c8   : > { %4773 = vst [vmem:[%s9371_s10 + $0xa8] sm:$0xff] %v4741_v21  ;;  %v4710_v42 = vadd.f32 %v4678_v48, %v4646_v4  ;;  %v4608_v45 = vadd.f32 %v4542_v0, %v9324_v5  ;;  %v4685_v0 = vld [vmem:[%s6267_s23 + $0xe8] sm:$0xff] }
 0x3c9   : > { %v4321_v2 = vpop.f32.mrf.mxu0 }
 0x3ca   : > { %v4742_v38 = vmax.f32 %v4710_v42, 0.0  ;;  %v4647_v15 = vadd.f32 %v9357_v55, %v4608_v45  ;;  %v4547_v23 = vadd.f32 %v4546_v53, %v4321_v2 }
 0x3cb   : > { %v4323_v44 = vpop.f32.mrf.mxu0 }
 0x3cc   : > { %4774 = vst [vmem:[%s9371_s10 + $0xb0] sm:$0xff] %v4742_v38  ;;  %v4711_v19 = vadd.f32 %v4679_v62, %v4647_v15  ;;  %v4609_v9 = vadd.f32 %v4547_v23, %v9327_v41  ;;  %v4686_v38 = vld [vmem:[%s6267_s23 + $0xf0] sm:$0xff] }
 0x3cd   : > { %v4326_v40 = vpop.f32.mrf.mxu0 }
 0x3ce   : > { %v4743_v7 = vmax.f32 %v4711_v19, 0.0  ;;  %v4648_v5 = vadd.f32 %v9357_v55, %v4609_v9  ;;  %v4552_v11 = vadd.f32 %v6080_v57, %v4326_v40 }
 0x3cf   : > { %v4328_v28 = vpop.f32.mrf.mxu0 }
 0x3d0   : > { %4775 = vst [vmem:[%s9371_s10 + $0xb8] sm:$0xff] %v4743_v7  ;;  %v4712_v60 = vadd.f32 %v4680_v1, %v4648_v5  ;;  %v4610_v35 = vadd.f32 %v4552_v11, %v9330_v34  ;;  %v4687_v1 = vld [vmem:[%s6267_s23 + $0xf8] sm:$0xff] }
 0x3d1   : > { %v4331_v63 = vpop.f32.mrf.mxu0 }
 0x3d2   : > { %v4744_v13 = vmax.f32 %v4712_v60, 0.0  ;;  %v4649_v41 = vadd.f32 %v9357_v55, %v4610_v35  ;;  %v4557_v58 = vadd.f32 %v4556_v52, %v4331_v63 }
 0x3d3   : > { %v4333_v6 = vpop.f32.mrf.mxu0 }
 0x3d4   : > { %4776 = vst [vmem:[%s9371_s10 + $0xc0] sm:$0xff] %v4744_v13  ;;  %v4713_v49 = vadd.f32 %v4681_v14, %v4649_v41  ;;  %v4611_v36 = vadd.f32 %v4557_v58, %v9333_v12 }
 0x3d5   : > { %v4336_v10 = vpop.f32.mrf.mxu0 }
 0x3d6   : > { %v4745_v18 = vmax.f32 %v4713_v49, 0.0  ;;  %v4650_v34 = vadd.f32 %v9357_v55, %v4611_v36  ;;  %v4562_v39 = vadd.f32 %v6083_v27, %v4336_v10 }
 0x3d7   : > { %v4338_v22 = vpop.f32.mrf.mxu0 }
 0x3d8   : > { %4777 = vst [vmem:[%s9371_s10 + $0xc8] sm:$0xff] %v4745_v18  ;;  %v4714_v16 = vadd.f32 %v4682_v56, %v4650_v34  ;;  %v4612_v33 = vadd.f32 %v4562_v39, %v9336_v24 }
 0x3d9   : > { %v4341_v25 = vpop.f32.mrf.mxu0 }
 0x3da   : > { %v4746_v46 = vmax.f32 %v4714_v16, 0.0  ;;  %v4651_v12 = vadd.f32 %v9357_v55, %v4612_v33  ;;  %v4567_v59 = vadd.f32 %v4566_v17, %v4341_v25 }
 0x3db   : > { %v4343_v30 = vpop.f32.mrf.mxu0 }
 0x3dc   : > { %4778 = vst [vmem:[%s9371_s10 + $0xd0] sm:$0xff] %v4746_v46  ;;  %v4715_v61 = vadd.f32 %v4683_v20, %v4651_v12  ;;  %v4613_v50 = vadd.f32 %v4567_v59, %v9339_v37 }
 0x3dd   : > { %v4346_v3 = vpop.f32.mrf.mxu0 }
 0x3de   : > { %v4747_v43 = vmax.f32 %v4715_v61, 0.0  ;;  %v4652_v24 = vadd.f32 %v9357_v55, %v4613_v50  ;;  %v4572_v57 = vadd.f32 %v6086_v47, %v4346_v3 }
 0x3df   : > { %v4348_v48 = vpop.f32.mrf.mxu0 }
 0x3e0   : > { %4779 = vst [vmem:[%s9371_s10 + $0xd8] sm:$0xff] %v4747_v43  ;;  %v4716_v21 = vadd.f32 %v4684_v54, %v4652_v24  ;;  %v4614_v4 = vadd.f32 %v4572_v57, %v9342_v8 }
 0x3e1   : > { %v4351_v51 = vpop.f32.mrf.mxu0 }
 0x3e2   : > { %v4748_v42 = vmax.f32 %v4716_v21, 0.0  ;;  %v4653_v37 = vadd.f32 %v9357_v55, %v4614_v4  ;;  %v4577_v45 = vadd.f32 %v4576_v26, %v4351_v51 }
 0x3e3   : > { %v4353_v53 = vpop.f32.mrf.mxu0 }
 0x3e4   : > { %4780 = vst [vmem:[%s9371_s10 + $0xe0] sm:$0xff] %v4748_v42  ;;  %v4717_v62 = vadd.f32 %v4685_v0, %v4653_v37  ;;  %v4615_v2 = vadd.f32 %v4577_v45, %v9347_v29 }
 0x3e5   : > { %v4356_v15 = vpop.f32.mrf.mxu0 }
 0x3e6   : > { %v4749_v23 = vmax.f32 %v4717_v62, 0.0  ;;  %v4654_v8 = vadd.f32 %v9357_v55, %v4615_v2  ;;  %v4582_v44 = vadd.f32 %v6089_v32, %v4356_v15 }
 0x3e7   : > { %v4358_v19 = vpop.f32.mrf.mxu0 }
 0x3e8   : > { %4781 = vst [vmem:[%s9371_s10 + $0xe8] sm:$0xff] %v4749_v23  ;;  %v4718_v9 = vadd.f32 %v4686_v38, %v4654_v8  ;;  %v4616_v27 = vadd.f32 %v4582_v44, %v9350_v31 }
 0x3ea   : > { %v4750_v40 = vmax.f32 %v4718_v9, 0.0  ;;  %v4655_v7 = vadd.f32 %v9357_v55, %v4616_v27 }
 0x3ec   : > { %4782 = vst [vmem:[%s9371_s10 + $0xf0] sm:$0xff] %v4750_v40  ;;  %v4719_v5 = vadd.f32 %v4687_v1, %v4655_v7 }
 0x3ee   : > { %v4751_v11 = vmax.f32 %v4719_v5, 0.0 }
 0x3f0   : > { %4783 = vst [vmem:[%s9371_s10 + $0xf8] sm:$0xff] %v4751_v11 }
 0x3f1 PF: > { %s15_s18 = sadd.s32 1, %s6135_s18  }
 0x3f2   : > { %p12_p4 = scmp.ge.s32.totalorder %s15_s18, 4  }
 0x3f4   :  { %14 = sbr.rel (!%p12_p4) target bundleno = 1 (0x1), region = 77 }

</bundles_post_ra>
